<compile_context>
chip_gen: v7x
topology: tpu7x:2x2x1
jax: 0.10.0
libtpu: 0.0.40
codegen_flags: <defaults>
</compile_context>

<pallas_src>
import jax
import jax.numpy as jnp
from jax.experimental import pallas as pl
from jax.experimental.pallas import tpu as pltpu

f32 = jnp.float32
bf16 = jnp.bfloat16


# --------------------------- constant builders --------------------------------

def _pool_matrix(H, W):
    """(H*W, H2*W2): x_flat @ P == 2x2 average pool (channels-major layout)."""
    H2, W2 = H // 2, W // 2
    p = jnp.arange(H * W)
    py, px = p // W, p % W
    q_of_p = (py // 2) * W2 + (px // 2)
    eye = (q_of_p[:, None] == jnp.arange(H2 * W2)[None, :])
    return eye.astype(f32) * 0.25                      # 0.25 exact in bf16


def _tap_masks(H2, W2, pack):
    """(9, 1, pack*H2*W2) 0/1 masks zeroing out-of-image (and cross-image)
    contributions of the rolled 3x3-conv taps, tap j = (dy+1)*3 + (dx+1)."""
    HW4 = H2 * W2
    q = jnp.arange(HW4)
    y, x = q // W2, q % W2
    rows = []
    for dy in (-1, 0, 1):
        for dx in (-1, 0, 1):
            valid = ((y + dy >= 0) & (y + dy < H2)
                     & (x + dx >= 0) & (x + dx < W2))
            rows.append(jnp.tile(valid.astype(f32), pack))
    return jnp.stack(rows)[:, None, :]


def _shuffle_scatter(H2, W2):
    """(4*H2*W2, H*W): z_cat @ S == PixelShuffle(2) placement, where z_cat has
    lane layout k*HW4 + q (k = phase (ry*2+rx), q = pooled pixel)."""
    H, W = 2 * H2, 2 * W2
    HW4 = H2 * W2
    P = jnp.arange(H * W)
    Y, X = P // W, P % W
    kP = (Y % 2) * 2 + (X % 2)
    qP = (Y // 2) * W2 + (X // 2)
    rows = jnp.arange(4 * HW4)
    kr, qr = rows // HW4, rows % HW4
    return ((kr[:, None] == kP[None, :])
            & (qr[:, None] == qP[None, :])).astype(f32)


# ------------------------------ parameters ------------------------------------

def init_params(key, InChan, OutChan, G, C):
    """Deterministic synthetic parameters (shapes follow Cont_RDB.__init__)."""
    keys = iter(jax.random.split(key, 64))

    def nxt():
        return next(keys)

    def w_init(k, shape, fan_in):
        return (jax.random.normal(k, shape, f32)
                / jnp.sqrt(jnp.float32(fan_in)))

    params = {}
    if InChan != G:
        params['InConv_w'] = w_init(nxt(), (G, InChan), InChan)      # (Cout, Cin)
        params['InConv_b'] = w_init(nxt(), (G,), InChan)
    if OutChan != G and OutChan != InChan:
        params['OutConv_w'] = w_init(nxt(), (OutChan, InChan), InChan)
        params['OutConv_b'] = w_init(nxt(), (OutChan,), InChan)
    params['Convs'] = []
    params['Shrink'] = []
    for i in range(C):
        params['Convs'].append((w_init(nxt(), (G, G, 3, 3), 9 * G),  # OIHW
                                w_init(nxt(), (G,), 9 * G)))
        if i < C - 1:
            cin = (2 + i) * G
            params['Shrink'].append((w_init(nxt(), (G, cin), cin),
                                     w_init(nxt(), (G,), cin)))
        else:
            cin = ((2 + i) * G) // 4
            params['Shrink'].append((w_init(nxt(), (OutChan, cin), cin),
                                     w_init(nxt(), (OutChan,), cin)))
    return params


# ------------------------- fused Pallas forward pass --------------------------

def cont_rdb_pallas(x_nchw, params, InChan, OutChan, G, C):
    """Cont_RDB.forward as a single fused Pallas kernel.  Input/output NCHW."""
    N, Cin, H, W = x_nchw.shape
    assert Cin == InChan
    assert H % 2 == 0 and W % 2 == 0
    HW = H * W
    H2, W2 = H // 2, W // 2
    HW4 = H2 * W2
    PACK = 2                         # images per grid step (128-lane pooled path)
    L = PACK * HW4                   # pooled lane width per step
    ncc = (C + 1) * G
    has_inconv = InChan != G
    has_outconv = (OutChan != G) and (OutChan != InChan)

    # ---- operand packing (layout / weight prep only, outside the kernel) ----
    x3 = x_nchw.reshape(N, InChan, HW).astype(f32)
    Npad = ((N + PACK - 1) // PACK) * PACK
    if Npad != N:
        x3 = jnp.concatenate(
            [x3, jnp.zeros((Npad - N, InChan, HW), f32)], axis=0)

    pool_mat = _pool_matrix(H, W).astype(bf16)               # (HW, HW4)
    masks = _tap_masks(H2, W2, PACK)                         # (9, 1, L) f32
    s_all = _shuffle_scatter(H2, W2).astype(bf16)            # (4*HW4, HW)

    # 3x3 conv weights as (G, 9G):   col j*G + ci == tap j=(ky*3+kx), in-chan ci
    cw = jnp.stack([w.transpose(0, 2, 3, 1).reshape(G, 9 * G)
                    for (w, _) in params['Convs']]).astype(bf16)     # (C, G, 9G)
    cb = jnp.stack([b.reshape(G, 1) for (_, b) in params['Convs']]).astype(f32)

    # Final ShrinkConv fused with PixelShuffle: Wk[o, cc] = Ws[o, cc//4]*(cc%4==k)
    ws_fin, bs_fin = params['Shrink'][C - 1]
    ccidx = jnp.arange(ncc)
    wk = jnp.stack([ws_fin[:, ccidx // 4]
                    * (ccidx % 4 == k).astype(f32)[None, :]
                    for k in range(4)]).astype(bf16)                 # (4, OutChan, ncc)
    fb = bs_fin.reshape(OutChan, 1).astype(f32)

    inputs = [x3, pool_mat, masks, s_all, cw, cb]
    if has_inconv:
        inputs += [params['InConv_w'].astype(bf16),
                   params['InConv_b'].reshape(G, 1).astype(f32)]
    if has_outconv:
        inputs += [params['OutConv_w'].astype(bf16),
                   params['OutConv_b'].reshape(OutChan, 1).astype(f32)]
    for i in range(C - 1):
        w_s, b_s = params['Shrink'][i]
        inputs += [w_s.astype(bf16), b_s.reshape(G, 1).astype(f32)]
    inputs += [wk, fb]
    n_in = len(inputs)

    tap_shifts = [dy * W2 + dx for dy in (-1, 0, 1) for dx in (-1, 0, 1)]

    # -------------------------------- kernel ---------------------------------
    def kernel(*refs):
        it = iter(refs[:n_in])
        x_ref = next(it)
        pool_ref = next(it)
        mask_ref = next(it)
        sall_ref = next(it)
        cw_ref = next(it)
        cb_ref = next(it)
        in_w = in_b = out_w = out_b = None
        if has_inconv:
            in_w, in_b = next(it), next(it)
        if has_outconv:
            out_w, out_b = next(it), next(it)
        shrinks = [(next(it), next(it)) for _ in range(C - 1)]
        wk_ref, fb_ref = next(it), next(it)
        out_ref = refs[n_in]
        conc_ref = refs[n_in + 1]
        zbuf_ref = refs[n_in + 2]

        pool_b = pool_ref[...]                        # (HW, HW4) bf16

        # ---- 2x2 avg pool (+ folded 1x1 InConv), packed along the lane axis --
        for p in range(PACK):
            xp = x_ref[p].astype(bf16)                # (InChan, HW)
            pooled = jnp.dot(xp, pool_b, preferred_element_type=f32)
            if has_inconv:
                # pool and 1x1 conv commute (pool weights sum to 1).
                pooled = (jnp.dot(in_w[...], pooled.astype(bf16),
                                  preferred_element_type=f32) + in_b[...])
            conc_ref[0:G, p * HW4:(p + 1) * HW4] = pooled
        x_in = conc_ref[0:G, :]                       # (G, L) f32

        # ---- C dense layers: (conv3x3+ReLU) x3 -> concat -> 1x1 shrink -------
        for i in range(C):
            wcat = cw_ref[i]                          # (G, 9G) bf16
            b3 = cb_ref[i]                            # (G, 1)  f32
            h = x_in
            for _ in range(3):                        # same conv applied 3x
                taps = []
                for j, s in enumerate(tap_shifts):
                    if s == 0:
                        t = h
                    else:
                        t = pltpu.roll(h, (-s) % L, axis=1)   # XLU lane rotate
                        t = t * mask_ref[j]           # zero out-of-image taps
                    taps.append(t)
                stacked = jnp.concatenate(taps, axis=0).astype(bf16)  # (9G, L)
                h = jnp.maximum(
                    jnp.dot(wcat, stacked, preferred_element_type=f32) + b3,
                    0.0)
            conc_ref[(i + 1) * G:(i + 2) * G, :] = h  # channel concat
            n_cc = (2 + i) * G
            if i < C - 1:
                w_s, b_s = shrinks[i]
                x_in = (jnp.dot(w_s[...], conc_ref[0:n_cc, :].astype(bf16),
                                preferred_element_type=f32) + b_s[...])

        # ---- PixelShuffle(2) + final 1x1 shrink + residual, per image --------
        sall_b = sall_ref[...]                        # (4*HW4, HW) bf16
        for p in range(PACK):
            xc_p = conc_ref[:, p * HW4:(p + 1) * HW4].astype(bf16)   # (ncc, HW4)
            for k in range(4):                        # per-phase 1x1 conv
                zk = jnp.dot(wk_ref[k], xc_p, preferred_element_type=f32)
                zbuf_ref[:, k * HW4:(k + 1) * HW4] = zk
            y = (jnp.dot(zbuf_ref[...].astype(bf16), sall_b,
                         preferred_element_type=f32) + fb_ref[...])  # (OutChan, HW)
            xfull = x_ref[p]                          # (InChan, HW) f32
            if OutChan == InChan:
                res = xfull
            elif OutChan == G:
                res = (jnp.dot(in_w[...], xfull.astype(bf16),
                               preferred_element_type=f32) + in_b[...])
            else:
                res = (jnp.dot(out_w[...], xfull.astype(bf16),
                               preferred_element_type=f32) + out_b[...])
            out_ref[p] = (res + y).astype(out_ref.dtype)

    # ------------------------------ specs / call ------------------------------
    def _bspec(a):
        nd = a.ndim
        return pl.BlockSpec(a.shape, lambda n, _nd=nd: (0,) * _nd)

    in_specs = [pl.BlockSpec((PACK, InChan, HW), lambda n: (n, 0, 0))]
    in_specs += [_bspec(a) for a in inputs[1:]]

    flops_per_img = (
        2 * InChan * HW * HW4
        + (2 * G * InChan * HW4 if has_inconv else 0)
        + C * 3 * 2 * G * (9 * G) * HW4
        + sum(2 * G * (2 + i) * G * HW4 for i in range(C - 1))
        + 4 * 2 * OutChan * ncc * HW4
        + 2 * OutChan * (4 * HW4) * HW
        + (2 * OutChan * InChan * HW if has_outconv else 0)
        + OutChan * HW)
    bytes_accessed = int(sum(int(a.size) * a.dtype.itemsize for a in inputs)
                         + Npad * OutChan * HW * 4)

    out = pl.pallas_call(
        kernel,
        grid=(Npad // PACK,),
        in_specs=in_specs,
        out_specs=pl.BlockSpec((PACK, OutChan, HW), lambda n: (n, 0, 0)),
        out_shape=jax.ShapeDtypeStruct((Npad, OutChan, HW), f32),
        scratch_shapes=[pltpu.VMEM((ncc, L), f32),           # x_conc
                        pltpu.VMEM((OutChan, 4 * HW4), f32)],  # phase-z staging
        compiler_params=pltpu.CompilerParams(
            dimension_semantics=("parallel",)),
        cost_estimate=pl.CostEstimate(flops=int(Npad * flops_per_img),
                                      transcendentals=0,
                                      bytes_accessed=bytes_accessed),
    )(*inputs)
    return out[:N].reshape(N, OutChan, H, W)


# ----------------------- pure-JAX reference (checking) ------------------------

def cont_rdb_ref(x_nchw, params, InChan, OutChan, G, C):
    x = x_nchw.astype(f32)

    def c1(t, w, b):                                   # w: (Cout, Cin)
        return jnp.einsum('oc,nchw->nohw', w, t) + b[None, :, None, None]

    def c3(t, w, b):                                   # w: (Cout, Cin, 3, 3)
        y = jax.lax.conv_general_dilated(
            t, w, (1, 1), 'SAME',
            dimension_numbers=('NCHW', 'OIHW', 'NCHW'))
        return jnp.maximum(y + b[None, :, None, None], 0.0)

    def pool(t):
        n, c, h, w = t.shape
        return t.reshape(n, c, h // 2, 2, w // 2, 2).mean(axis=(3, 5))

    def shup(t):
        n, c, h2, w2 = t.shape
        cp = c // 4
        t = t.reshape(n, cp, 2, 2, h2, w2)
        t = jnp.transpose(t, (0, 1, 4, 2, 5, 3))
        return t.reshape(n, cp, h2 * 2, w2 * 2)

    x_InC = None
    if InChan != G:
        x_InC = c1(x, params['InConv_w'], params['InConv_b'])
        x_in = pool(x_InC)
    else:
        x_in = pool(x)
    x_conc = x_in
    for i in range(C):
        w3, b3 = params['Convs'][i]
        xi = c3(x_in, w3, b3)
        xi = c3(xi, w3, b3)
        xi = c3(xi, w3, b3)
        x_conc = jnp.concatenate([x_conc, xi], axis=1)
        ws, bs = params['Shrink'][i]
        if i == C - 1:
            x_conc = shup(x_conc)
            x_in = c1(x_conc, ws, bs)
        else:
            x_in = c1(x_conc, ws, bs)
    if OutChan == InChan:
        res = x
    elif OutChan == G:
        res = x_InC
    else:
        res = c1(x, params['OutConv_w'], params['OutConv_b'])
    return res + x_in


# ----------------------------------- main -------------------------------------

if __name__ == "__main__":
    # Cont_RDB(InChannel=4, OutChannel=4, growRate=8, nConvLayers=3, kSize=3)
    InChan, OutChan, G, C = 4, 4, 8, 3
    N, H, W = 4, 16, 16          # N=4 -> 2 packed grid steps (both v7x TCs busy)

    key = jax.random.PRNGKey(0)
    kx, kp = jax.random.split(key)
    x = jax.random.normal(kx, (N, InChan, H, W), f32)   # NCHW input
    params = init_params(kp, InChan, OutChan, G, C)

    out = cont_rdb_pallas(x, params, InChan, OutChan, G, C)
    out = jax.block_until_ready(out)

    ref = cont_rdb_ref(x, params, InChan, OutChan, G, C)
    assert out.shape == (N, OutChan, H, W), out.shape
    max_err = float(jnp.max(jnp.abs(out - ref)))
    assert max_err < 5e-2, f"max abs err {max_err}"    # bf16 MXU operands

    print("KERNEL_OK")
</pallas_src>

<mosaic_0001>
module attributes {stable_mosaic.version = 11 : i64} {
  func.func @kernel(%arg0: i32, %arg1: memref<2x4x256xf32, #tpu.memory_space<vmem>>, %arg2: memref<256x64xbf16, #tpu.memory_space<vmem>>, %arg3: memref<9x1x128xf32, #tpu.memory_space<vmem>>, %arg4: memref<256x256xbf16, #tpu.memory_space<vmem>>, %arg5: memref<3x8x72xbf16, #tpu.memory_space<vmem>>, %arg6: memref<3x8x1xf32, #tpu.memory_space<vmem>>, %arg7: memref<8x4xbf16, #tpu.memory_space<vmem>>, %arg8: memref<8x1xf32, #tpu.memory_space<vmem>>, %arg9: memref<8x16xbf16, #tpu.memory_space<vmem>>, %arg10: memref<8x1xf32, #tpu.memory_space<vmem>>, %arg11: memref<8x24xbf16, #tpu.memory_space<vmem>>, %arg12: memref<8x1xf32, #tpu.memory_space<vmem>>, %arg13: memref<4x4x32xbf16, #tpu.memory_space<vmem>>, %arg14: memref<4x1xf32, #tpu.memory_space<vmem>>, %arg15: memref<2x4x256xf32, #tpu.memory_space<vmem>>, %arg16: memref<32x128xf32, #tpu.memory_space<vmem>>, %arg17: memref<4x256xf32, #tpu.memory_space<vmem>>) attributes {dimension_semantics = [#tpu.dimension_semantics<parallel>], iteration_bounds = array<i64: 2>, scalar_prefetch = 0 : i64, scratch_operands = 2 : i64, tpu.core_type = #tpu.core_type<tc>, window_params = [{transform_indices = @transform_0, window_bounds = array<i64: 2, 4, 256>}, {pipeline_mode = #tpu.pipeline_mode<synchronous>, transform_indices = @transform_1, window_bounds = array<i64: 256, 64>}, {pipeline_mode = #tpu.pipeline_mode<synchronous>, transform_indices = @transform_2, window_bounds = array<i64: 9, 1, 128>}, {pipeline_mode = #tpu.pipeline_mode<synchronous>, transform_indices = @transform_3, window_bounds = array<i64: 256, 256>}, {pipeline_mode = #tpu.pipeline_mode<synchronous>, transform_indices = @transform_4, window_bounds = array<i64: 3, 8, 72>}, {pipeline_mode = #tpu.pipeline_mode<synchronous>, transform_indices = @transform_5, window_bounds = array<i64: 3, 8, 1>}, {pipeline_mode = #tpu.pipeline_mode<synchronous>, transform_indices = @transform_6, window_bounds = array<i64: 8, 4>}, {pipeline_mode = #tpu.pipeline_mode<synchronous>, transform_indices = @transform_7, window_bounds = array<i64: 8, 1>}, {pipeline_mode = #tpu.pipeline_mode<synchronous>, transform_indices = @transform_8, window_bounds = array<i64: 8, 16>}, {pipeline_mode = #tpu.pipeline_mode<synchronous>, transform_indices = @transform_9, window_bounds = array<i64: 8, 1>}, {pipeline_mode = #tpu.pipeline_mode<synchronous>, transform_indices = @transform_10, window_bounds = array<i64: 8, 24>}, {pipeline_mode = #tpu.pipeline_mode<synchronous>, transform_indices = @transform_11, window_bounds = array<i64: 8, 1>}, {pipeline_mode = #tpu.pipeline_mode<synchronous>, transform_indices = @transform_12, window_bounds = array<i64: 4, 4, 32>}, {pipeline_mode = #tpu.pipeline_mode<synchronous>, transform_indices = @transform_13, window_bounds = array<i64: 4, 1>}, {transform_indices = @transform_14, window_bounds = array<i64: 2, 4, 256>}]} {
    %c0 = arith.constant 0 : index
    %c0_0 = arith.constant 0 : index
    %0 = vector.load %arg2[%c0, %c0_0] : memref<256x64xbf16, #tpu.memory_space<vmem>>, vector<256x64xbf16>
    %c0_1 = arith.constant 0 : index
    %c0_2 = arith.constant 0 : index
    %c0_3 = arith.constant 0 : index
    %1 = vector.load %arg1[%c0_1, %c0_2, %c0_3] : memref<2x4x256xf32, #tpu.memory_space<vmem>>, vector<1x4x256xf32>
    %2 = vector.shape_cast %1 : vector<1x4x256xf32> to vector<4x256xf32>
    %3 = arith.truncf %2 : vector<4x256xf32> to vector<4x256xbf16>
    %cst = arith.constant dense<0.000000e+00> : vector<4x64xf32>
    %4 = tpu.matmul %3, %0, %cst {dimension_numbers = #tpu.dot_dimension_numbers<[1], [0], [0], [1], [0, 0, 1, 1], [], []>} : vector<4x256xbf16>, vector<256x64xbf16>, vector<4x64xf32> -> vector<4x64xf32>
    %c0_4 = arith.constant 0 : index
    %c0_5 = arith.constant 0 : index
    %5 = vector.load %arg7[%c0_4, %c0_5] : memref<8x4xbf16, #tpu.memory_space<vmem>>, vector<8x4xbf16>
    %6 = arith.truncf %4 : vector<4x64xf32> to vector<4x64xbf16>
    %cst_6 = arith.constant dense<0.000000e+00> : vector<8x64xf32>
    %7 = tpu.matmul %5, %6, %cst_6 {dimension_numbers = #tpu.dot_dimension_numbers<[1], [0], [0], [1], [0, 0, 1, 1], [], []>} : vector<8x4xbf16>, vector<4x64xbf16>, vector<8x64xf32> -> vector<8x64xf32>
    %c0_7 = arith.constant 0 : index
    %c0_8 = arith.constant 0 : index
    %8 = vector.load %arg8[%c0_7, %c0_8] : memref<8x1xf32, #tpu.memory_space<vmem>>, vector<8x1xf32>
    %9 = vector.broadcast %8 : vector<8x1xf32> to vector<8x64xf32>
    %10 = arith.addf %7, %9 : vector<8x64xf32>
    %c0_9 = arith.constant 0 : index
    %c0_10 = arith.constant 0 : index
    %11 = vector.load %arg16[%c0_9, %c0_10] : memref<32x128xf32, #tpu.memory_space<vmem>>, vector<8x64xf32>
    tpu.vector_store %arg16[%c0_9, %c0_10], %10 {strides = array<i32>} : memref<32x128xf32, #tpu.memory_space<vmem>>, vector<8x64xf32>,
    %c1 = arith.constant 1 : index
    %c0_11 = arith.constant 0 : index
    %c0_12 = arith.constant 0 : index
    %12 = vector.load %arg1[%c1, %c0_11, %c0_12] : memref<2x4x256xf32, #tpu.memory_space<vmem>>, vector<1x4x256xf32>
    %13 = vector.shape_cast %12 : vector<1x4x256xf32> to vector<4x256xf32>
    %14 = arith.truncf %13 : vector<4x256xf32> to vector<4x256xbf16>
    %cst_13 = arith.constant dense<0.000000e+00> : vector<4x64xf32>
    %15 = tpu.matmul %14, %0, %cst_13 {dimension_numbers = #tpu.dot_dimension_numbers<[1], [0], [0], [1], [0, 0, 1, 1], [], []>} : vector<4x256xbf16>, vector<256x64xbf16>, vector<4x64xf32> -> vector<4x64xf32>
    %c0_14 = arith.constant 0 : index
    %c0_15 = arith.constant 0 : index
    %16 = vector.load %arg7[%c0_14, %c0_15] : memref<8x4xbf16, #tpu.memory_space<vmem>>, vector<8x4xbf16>
    %17 = arith.truncf %15 : vector<4x64xf32> to vector<4x64xbf16>
    %cst_16 = arith.constant dense<0.000000e+00> : vector<8x64xf32>
    %18 = tpu.matmul %16, %17, %cst_16 {dimension_numbers = #tpu.dot_dimension_numbers<[1], [0], [0], [1], [0, 0, 1, 1], [], []>} : vector<8x4xbf16>, vector<4x64xbf16>, vector<8x64xf32> -> vector<8x64xf32>
    %c0_17 = arith.constant 0 : index
    %c0_18 = arith.constant 0 : index
    %19 = vector.load %arg8[%c0_17, %c0_18] : memref<8x1xf32, #tpu.memory_space<vmem>>, vector<8x1xf32>
    %20 = vector.broadcast %19 : vector<8x1xf32> to vector<8x64xf32>
    %21 = arith.addf %18, %20 : vector<8x64xf32>
    %c0_19 = arith.constant 0 : index
    %c64 = arith.constant 64 : index
    %22 = vector.load %arg16[%c0_19, %c64] : memref<32x128xf32, #tpu.memory_space<vmem>>, vector<8x64xf32>
    tpu.vector_store %arg16[%c0_19, %c64], %21 {strides = array<i32>} : memref<32x128xf32, #tpu.memory_space<vmem>>, vector<8x64xf32>,
    %c0_20 = arith.constant 0 : index
    %c0_21 = arith.constant 0 : index
    %23 = vector.load %arg16[%c0_20, %c0_21] : memref<32x128xf32, #tpu.memory_space<vmem>>, vector<8x128xf32>
    %c0_22 = arith.constant 0 : index
    %c0_23 = arith.constant 0 : index
    %c0_24 = arith.constant 0 : index
    %24 = vector.load %arg5[%c0_22, %c0_23, %c0_24] : memref<3x8x72xbf16, #tpu.memory_space<vmem>>, vector<1x8x72xbf16>
    %25 = vector.shape_cast %24 : vector<1x8x72xbf16> to vector<8x72xbf16>
    %c0_25 = arith.constant 0 : index
    %c0_26 = arith.constant 0 : index
    %c0_27 = arith.constant 0 : index
    %26 = vector.load %arg6[%c0_25, %c0_26, %c0_27] : memref<3x8x1xf32, #tpu.memory_space<vmem>>, vector<1x8x1xf32>
    %27 = vector.shape_cast %26 : vector<1x8x1xf32> to vector<8x1xf32>
    %c9_i32 = arith.constant 9 : i32
    %28 = tpu.dynamic_rotate %23 by %c9_i32 dim 1 : vector<8x128xf32>, i32 -> vector<8x128xf32>
    %c0_28 = arith.constant 0 : index
    %c0_29 = arith.constant 0 : index
    %c0_30 = arith.constant 0 : index
    %29 = vector.load %arg3[%c0_28, %c0_29, %c0_30] : memref<9x1x128xf32, #tpu.memory_space<vmem>>, vector<1x1x128xf32>
    %30 = vector.shape_cast %29 : vector<1x1x128xf32> to vector<1x128xf32>
    %31 = vector.broadcast %30 : vector<1x128xf32> to vector<8x128xf32>
    %32 = arith.mulf %28, %31 : vector<8x128xf32>
    %c8_i32 = arith.constant 8 : i32
    %33 = tpu.dynamic_rotate %23 by %c8_i32 dim 1 : vector<8x128xf32>, i32 -> vector<8x128xf32>
    %c1_31 = arith.constant 1 : index
    %c0_32 = arith.constant 0 : index
    %c0_33 = arith.constant 0 : index
    %34 = vector.load %arg3[%c1_31, %c0_32, %c0_33] : memref<9x1x128xf32, #tpu.memory_space<vmem>>, vector<1x1x128xf32>
    %35 = vector.shape_cast %34 : vector<1x1x128xf32> to vector<1x128xf32>
    %36 = vector.broadcast %35 : vector<1x128xf32> to vector<8x128xf32>
    %37 = arith.mulf %33, %36 : vector<8x128xf32>
    %c7_i32 = arith.constant 7 : i32
    %38 = tpu.dynamic_rotate %23 by %c7_i32 dim 1 : vector<8x128xf32>, i32 -> vector<8x128xf32>
    %c2 = arith.constant 2 : index
    %c0_34 = arith.constant 0 : index
    %c0_35 = arith.constant 0 : index
    %39 = vector.load %arg3[%c2, %c0_34, %c0_35] : memref<9x1x128xf32, #tpu.memory_space<vmem>>, vector<1x1x128xf32>
    %40 = vector.shape_cast %39 : vector<1x1x128xf32> to vector<1x128xf32>
    %41 = vector.broadcast %40 : vector<1x128xf32> to vector<8x128xf32>
    %42 = arith.mulf %38, %41 : vector<8x128xf32>
    %c1_i32 = arith.constant 1 : i32
    %43 = tpu.dynamic_rotate %23 by %c1_i32 dim 1 : vector<8x128xf32>, i32 -> vector<8x128xf32>
    %c3 = arith.constant 3 : index
    %c0_36 = arith.constant 0 : index
    %c0_37 = arith.constant 0 : index
    %44 = vector.load %arg3[%c3, %c0_36, %c0_37] : memref<9x1x128xf32, #tpu.memory_space<vmem>>, vector<1x1x128xf32>
    %45 = vector.shape_cast %44 : vector<1x1x128xf32> to vector<1x128xf32>
    %46 = vector.broadcast %45 : vector<1x128xf32> to vector<8x128xf32>
    %47 = arith.mulf %43, %46 : vector<8x128xf32>
    %c127_i32 = arith.constant 127 : i32
    %48 = tpu.dynamic_rotate %23 by %c127_i32 dim 1 : vector<8x128xf32>, i32 -> vector<8x128xf32>
    %c5 = arith.constant 5 : index
    %c0_38 = arith.constant 0 : index
    %c0_39 = arith.constant 0 : index
    %49 = vector.load %arg3[%c5, %c0_38, %c0_39] : memref<9x1x128xf32, #tpu.memory_space<vmem>>, vector<1x1x128xf32>
    %50 = vector.shape_cast %49 : vector<1x1x128xf32> to vector<1x128xf32>
    %51 = vector.broadcast %50 : vector<1x128xf32> to vector<8x128xf32>
    %52 = arith.mulf %48, %51 : vector<8x128xf32>
    %c121_i32 = arith.constant 121 : i32
    %53 = tpu.dynamic_rotate %23 by %c121_i32 dim 1 : vector<8x128xf32>, i32 -> vector<8x128xf32>
    %c6 = arith.constant 6 : index
    %c0_40 = arith.constant 0 : index
    %c0_41 = arith.constant 0 : index
    %54 = vector.load %arg3[%c6, %c0_40, %c0_41] : memref<9x1x128xf32, #tpu.memory_space<vmem>>, vector<1x1x128xf32>
    %55 = vector.shape_cast %54 : vector<1x1x128xf32> to vector<1x128xf32>
    %56 = vector.broadcast %55 : vector<1x128xf32> to vector<8x128xf32>
    %57 = arith.mulf %53, %56 : vector<8x128xf32>
    %c120_i32 = arith.constant 120 : i32
    %58 = tpu.dynamic_rotate %23 by %c120_i32 dim 1 : vector<8x128xf32>, i32 -> vector<8x128xf32>
    %c7 = arith.constant 7 : index
    %c0_42 = arith.constant 0 : index
    %c0_43 = arith.constant 0 : index
    %59 = vector.load %arg3[%c7, %c0_42, %c0_43] : memref<9x1x128xf32, #tpu.memory_space<vmem>>, vector<1x1x128xf32>
    %60 = vector.shape_cast %59 : vector<1x1x128xf32> to vector<1x128xf32>
    %61 = vector.broadcast %60 : vector<1x128xf32> to vector<8x128xf32>
    %62 = arith.mulf %58, %61 : vector<8x128xf32>
    %c119_i32 = arith.constant 119 : i32
    %63 = tpu.dynamic_rotate %23 by %c119_i32 dim 1 : vector<8x128xf32>, i32 -> vector<8x128xf32>
    %c8 = arith.constant 8 : index
    %c0_44 = arith.constant 0 : index
    %c0_45 = arith.constant 0 : index
    %64 = vector.load %arg3[%c8, %c0_44, %c0_45] : memref<9x1x128xf32, #tpu.memory_space<vmem>>, vector<1x1x128xf32>
    %65 = vector.shape_cast %64 : vector<1x1x128xf32> to vector<1x128xf32>
    %66 = vector.broadcast %65 : vector<1x128xf32> to vector<8x128xf32>
    %67 = arith.mulf %63, %66 : vector<8x128xf32>
    %68 = tpu.concatenate %32, %37, %42, %47, %23, %52, %57, %62, %67 in 0 : vector<8x128xf32>, vector<8x128xf32>, vector<8x128xf32>, vector<8x128xf32>, vector<8x128xf32>, vector<8x128xf32>, vector<8x128xf32>, vector<8x128xf32>, vector<8x128xf32> -> vector<72x128xf32>
    %69 = arith.truncf %68 : vector<72x128xf32> to vector<72x128xbf16>
    %cst_46 = arith.constant dense<0.000000e+00> : vector<8x128xf32>
    %70 = tpu.matmul %25, %69, %cst_46 {dimension_numbers = #tpu.dot_dimension_numbers<[1], [0], [0], [1], [0, 0, 1, 1], [], []>} : vector<8x72xbf16>, vector<72x128xbf16>, vector<8x128xf32> -> vector<8x128xf32>
    %71 = vector.broadcast %27 : vector<8x1xf32> to vector<8x128xf32>
    %72 = arith.addf %70, %71 : vector<8x128xf32>
    %cst_47 = arith.constant 0.000000e+00 : f32
    %73 = vector.broadcast %cst_47 : f32 to vector<8x128xf32>
    %74 = arith.maximumf %72, %73 : vector<8x128xf32>
    %c9_i32_48 = arith.constant 9 : i32
    %75 = tpu.dynamic_rotate %74 by %c9_i32_48 dim 1 : vector<8x128xf32>, i32 -> vector<8x128xf32>
    %c0_49 = arith.constant 0 : index
    %c0_50 = arith.constant 0 : index
    %c0_51 = arith.constant 0 : index
    %76 = vector.load %arg3[%c0_49, %c0_50, %c0_51] : memref<9x1x128xf32, #tpu.memory_space<vmem>>, vector<1x1x128xf32>
    %77 = vector.shape_cast %76 : vector<1x1x128xf32> to vector<1x128xf32>
    %78 = vector.broadcast %77 : vector<1x128xf32> to vector<8x128xf32>
    %79 = arith.mulf %75, %78 : vector<8x128xf32>
    %c8_i32_52 = arith.constant 8 : i32
    %80 = tpu.dynamic_rotate %74 by %c8_i32_52 dim 1 : vector<8x128xf32>, i32 -> vector<8x128xf32>
    %c1_53 = arith.constant 1 : index
    %c0_54 = arith.constant 0 : index
    %c0_55 = arith.constant 0 : index
    %81 = vector.load %arg3[%c1_53, %c0_54, %c0_55] : memref<9x1x128xf32, #tpu.memory_space<vmem>>, vector<1x1x128xf32>
    %82 = vector.shape_cast %81 : vector<1x1x128xf32> to vector<1x128xf32>
    %83 = vector.broadcast %82 : vector<1x128xf32> to vector<8x128xf32>
    %84 = arith.mulf %80, %83 : vector<8x128xf32>
    %c7_i32_56 = arith.constant 7 : i32
    %85 = tpu.dynamic_rotate %74 by %c7_i32_56 dim 1 : vector<8x128xf32>, i32 -> vector<8x128xf32>
    %c2_57 = arith.constant 2 : index
    %c0_58 = arith.constant 0 : index
    %c0_59 = arith.constant 0 : index
    %86 = vector.load %arg3[%c2_57, %c0_58, %c0_59] : memref<9x1x128xf32, #tpu.memory_space<vmem>>, vector<1x1x128xf32>
    %87 = vector.shape_cast %86 : vector<1x1x128xf32> to vector<1x128xf32>
    %88 = vector.broadcast %87 : vector<1x128xf32> to vector<8x128xf32>
    %89 = arith.mulf %85, %88 : vector<8x128xf32>
    %c1_i32_60 = arith.constant 1 : i32
    %90 = tpu.dynamic_rotate %74 by %c1_i32_60 dim 1 : vector<8x128xf32>, i32 -> vector<8x128xf32>
    %c3_61 = arith.constant 3 : index
    %c0_62 = arith.constant 0 : index
    %c0_63 = arith.constant 0 : index
    %91 = vector.load %arg3[%c3_61, %c0_62, %c0_63] : memref<9x1x128xf32, #tpu.memory_space<vmem>>, vector<1x1x128xf32>
    %92 = vector.shape_cast %91 : vector<1x1x128xf32> to vector<1x128xf32>
    %93 = vector.broadcast %92 : vector<1x128xf32> to vector<8x128xf32>
    %94 = arith.mulf %90, %93 : vector<8x128xf32>
    %c127_i32_64 = arith.constant 127 : i32
    %95 = tpu.dynamic_rotate %74 by %c127_i32_64 dim 1 : vector<8x128xf32>, i32 -> vector<8x128xf32>
    %c5_65 = arith.constant 5 : index
    %c0_66 = arith.constant 0 : index
    %c0_67 = arith.constant 0 : index
    %96 = vector.load %arg3[%c5_65, %c0_66, %c0_67] : memref<9x1x128xf32, #tpu.memory_space<vmem>>, vector<1x1x128xf32>
    %97 = vector.shape_cast %96 : vector<1x1x128xf32> to vector<1x128xf32>
    %98 = vector.broadcast %97 : vector<1x128xf32> to vector<8x128xf32>
    %99 = arith.mulf %95, %98 : vector<8x128xf32>
    %c121_i32_68 = arith.constant 121 : i32
    %100 = tpu.dynamic_rotate %74 by %c121_i32_68 dim 1 : vector<8x128xf32>, i32 -> vector<8x128xf32>
    %c6_69 = arith.constant 6 : index
    %c0_70 = arith.constant 0 : index
    %c0_71 = arith.constant 0 : index
    %101 = vector.load %arg3[%c6_69, %c0_70, %c0_71] : memref<9x1x128xf32, #tpu.memory_space<vmem>>, vector<1x1x128xf32>
    %102 = vector.shape_cast %101 : vector<1x1x128xf32> to vector<1x128xf32>
    %103 = vector.broadcast %102 : vector<1x128xf32> to vector<8x128xf32>
    %104 = arith.mulf %100, %103 : vector<8x128xf32>
    %c120_i32_72 = arith.constant 120 : i32
    %105 = tpu.dynamic_rotate %74 by %c120_i32_72 dim 1 : vector<8x128xf32>, i32 -> vector<8x128xf32>
    %c7_73 = arith.constant 7 : index
    %c0_74 = arith.constant 0 : index
    %c0_75 = arith.constant 0 : index
    %106 = vector.load %arg3[%c7_73, %c0_74, %c0_75] : memref<9x1x128xf32, #tpu.memory_space<vmem>>, vector<1x1x128xf32>
    %107 = vector.shape_cast %106 : vector<1x1x128xf32> to vector<1x128xf32>
    %108 = vector.broadcast %107 : vector<1x128xf32> to vector<8x128xf32>
    %109 = arith.mulf %105, %108 : vector<8x128xf32>
    %c119_i32_76 = arith.constant 119 : i32
    %110 = tpu.dynamic_rotate %74 by %c119_i32_76 dim 1 : vector<8x128xf32>, i32 -> vector<8x128xf32>
    %c8_77 = arith.constant 8 : index
    %c0_78 = arith.constant 0 : index
    %c0_79 = arith.constant 0 : index
    %111 = vector.load %arg3[%c8_77, %c0_78, %c0_79] : memref<9x1x128xf32, #tpu.memory_space<vmem>>, vector<1x1x128xf32>
    %112 = vector.shape_cast %111 : vector<1x1x128xf32> to vector<1x128xf32>
    %113 = vector.broadcast %112 : vector<1x128xf32> to vector<8x128xf32>
    %114 = arith.mulf %110, %113 : vector<8x128xf32>
    %115 = tpu.concatenate %79, %84, %89, %94, %74, %99, %104, %109, %114 in 0 : vector<8x128xf32>, vector<8x128xf32>, vector<8x128xf32>, vector<8x128xf32>, vector<8x128xf32>, vector<8x128xf32>, vector<8x128xf32>, vector<8x128xf32>, vector<8x128xf32> -> vector<72x128xf32>
    %116 = arith.truncf %115 : vector<72x128xf32> to vector<72x128xbf16>
    %cst_80 = arith.constant dense<0.000000e+00> : vector<8x128xf32>
    %117 = tpu.matmul %25, %116, %cst_80 {dimension_numbers = #tpu.dot_dimension_numbers<[1], [0], [0], [1], [0, 0, 1, 1], [], []>} : vector<8x72xbf16>, vector<72x128xbf16>, vector<8x128xf32> -> vector<8x128xf32>
    %118 = vector.broadcast %27 : vector<8x1xf32> to vector<8x128xf32>
    %119 = arith.addf %117, %118 : vector<8x128xf32>
    %cst_81 = arith.constant 0.000000e+00 : f32
    %120 = vector.broadcast %cst_81 : f32 to vector<8x128xf32>
    %121 = arith.maximumf %119, %120 : vector<8x128xf32>
    %c9_i32_82 = arith.constant 9 : i32
    %122 = tpu.dynamic_rotate %121 by %c9_i32_82 dim 1 : vector<8x128xf32>, i32 -> vector<8x128xf32>
    %c0_83 = arith.constant 0 : index
    %c0_84 = arith.constant 0 : index
    %c0_85 = arith.constant 0 : index
    %123 = vector.load %arg3[%c0_83, %c0_84, %c0_85] : memref<9x1x128xf32, #tpu.memory_space<vmem>>, vector<1x1x128xf32>
    %124 = vector.shape_cast %123 : vector<1x1x128xf32> to vector<1x128xf32>
    %125 = vector.broadcast %124 : vector<1x128xf32> to vector<8x128xf32>
    %126 = arith.mulf %122, %125 : vector<8x128xf32>
    %c8_i32_86 = arith.constant 8 : i32
    %127 = tpu.dynamic_rotate %121 by %c8_i32_86 dim 1 : vector<8x128xf32>, i32 -> vector<8x128xf32>
    %c1_87 = arith.constant 1 : index
    %c0_88 = arith.constant 0 : index
    %c0_89 = arith.constant 0 : index
    %128 = vector.load %arg3[%c1_87, %c0_88, %c0_89] : memref<9x1x128xf32, #tpu.memory_space<vmem>>, vector<1x1x128xf32>
    %129 = vector.shape_cast %128 : vector<1x1x128xf32> to vector<1x128xf32>
    %130 = vector.broadcast %129 : vector<1x128xf32> to vector<8x128xf32>
    %131 = arith.mulf %127, %130 : vector<8x128xf32>
    %c7_i32_90 = arith.constant 7 : i32
    %132 = tpu.dynamic_rotate %121 by %c7_i32_90 dim 1 : vector<8x128xf32>, i32 -> vector<8x128xf32>
    %c2_91 = arith.constant 2 : index
    %c0_92 = arith.constant 0 : index
    %c0_93 = arith.constant 0 : index
    %133 = vector.load %arg3[%c2_91, %c0_92, %c0_93] : memref<9x1x128xf32, #tpu.memory_space<vmem>>, vector<1x1x128xf32>
    %134 = vector.shape_cast %133 : vector<1x1x128xf32> to vector<1x128xf32>
    %135 = vector.broadcast %134 : vector<1x128xf32> to vector<8x128xf32>
    %136 = arith.mulf %132, %135 : vector<8x128xf32>
    %c1_i32_94 = arith.constant 1 : i32
    %137 = tpu.dynamic_rotate %121 by %c1_i32_94 dim 1 : vector<8x128xf32>, i32 -> vector<8x128xf32>
    %c3_95 = arith.constant 3 : index
    %c0_96 = arith.constant 0 : index
    %c0_97 = arith.constant 0 : index
    %138 = vector.load %arg3[%c3_95, %c0_96, %c0_97] : memref<9x1x128xf32, #tpu.memory_space<vmem>>, vector<1x1x128xf32>
    %139 = vector.shape_cast %138 : vector<1x1x128xf32> to vector<1x128xf32>
    %140 = vector.broadcast %139 : vector<1x128xf32> to vector<8x128xf32>
    %141 = arith.mulf %137, %140 : vector<8x128xf32>
    %c127_i32_98 = arith.constant 127 : i32
    %142 = tpu.dynamic_rotate %121 by %c127_i32_98 dim 1 : vector<8x128xf32>, i32 -> vector<8x128xf32>
    %c5_99 = arith.constant 5 : index
    %c0_100 = arith.constant 0 : index
    %c0_101 = arith.constant 0 : index
    %143 = vector.load %arg3[%c5_99, %c0_100, %c0_101] : memref<9x1x128xf32, #tpu.memory_space<vmem>>, vector<1x1x128xf32>
    %144 = vector.shape_cast %143 : vector<1x1x128xf32> to vector<1x128xf32>
    %145 = vector.broadcast %144 : vector<1x128xf32> to vector<8x128xf32>
    %146 = arith.mulf %142, %145 : vector<8x128xf32>
    %c121_i32_102 = arith.constant 121 : i32
    %147 = tpu.dynamic_rotate %121 by %c121_i32_102 dim 1 : vector<8x128xf32>, i32 -> vector<8x128xf32>
    %c6_103 = arith.constant 6 : index
    %c0_104 = arith.constant 0 : index
    %c0_105 = arith.constant 0 : index
    %148 = vector.load %arg3[%c6_103, %c0_104, %c0_105] : memref<9x1x128xf32, #tpu.memory_space<vmem>>, vector<1x1x128xf32>
    %149 = vector.shape_cast %148 : vector<1x1x128xf32> to vector<1x128xf32>
    %150 = vector.broadcast %149 : vector<1x128xf32> to vector<8x128xf32>
    %151 = arith.mulf %147, %150 : vector<8x128xf32>
    %c120_i32_106 = arith.constant 120 : i32
    %152 = tpu.dynamic_rotate %121 by %c120_i32_106 dim 1 : vector<8x128xf32>, i32 -> vector<8x128xf32>
    %c7_107 = arith.constant 7 : index
    %c0_108 = arith.constant 0 : index
    %c0_109 = arith.constant 0 : index
    %153 = vector.load %arg3[%c7_107, %c0_108, %c0_109] : memref<9x1x128xf32, #tpu.memory_space<vmem>>, vector<1x1x128xf32>
    %154 = vector.shape_cast %153 : vector<1x1x128xf32> to vector<1x128xf32>
    %155 = vector.broadcast %154 : vector<1x128xf32> to vector<8x128xf32>
    %156 = arith.mulf %152, %155 : vector<8x128xf32>
    %c119_i32_110 = arith.constant 119 : i32
    %157 = tpu.dynamic_rotate %121 by %c119_i32_110 dim 1 : vector<8x128xf32>, i32 -> vector<8x128xf32>
    %c8_111 = arith.constant 8 : index
    %c0_112 = arith.constant 0 : index
    %c0_113 = arith.constant 0 : index
    %158 = vector.load %arg3[%c8_111, %c0_112, %c0_113] : memref<9x1x128xf32, #tpu.memory_space<vmem>>, vector<1x1x128xf32>
    %159 = vector.shape_cast %158 : vector<1x1x128xf32> to vector<1x128xf32>
    %160 = vector.broadcast %159 : vector<1x128xf32> to vector<8x128xf32>
    %161 = arith.mulf %157, %160 : vector<8x128xf32>
    %162 = tpu.concatenate %126, %131, %136, %141, %121, %146, %151, %156, %161 in 0 : vector<8x128xf32>, vector<8x128xf32>, vector<8x128xf32>, vector<8x128xf32>, vector<8x128xf32>, vector<8x128xf32>, vector<8x128xf32>, vector<8x128xf32>, vector<8x128xf32> -> vector<72x128xf32>
    %163 = arith.truncf %162 : vector<72x128xf32> to vector<72x128xbf16>
    %cst_114 = arith.constant dense<0.000000e+00> : vector<8x128xf32>
    %164 = tpu.matmul %25, %163, %cst_114 {dimension_numbers = #tpu.dot_dimension_numbers<[1], [0], [0], [1], [0, 0, 1, 1], [], []>} : vector<8x72xbf16>, vector<72x128xbf16>, vector<8x128xf32> -> vector<8x128xf32>
    %165 = vector.broadcast %27 : vector<8x1xf32> to vector<8x128xf32>
    %166 = arith.addf %164, %165 : vector<8x128xf32>
    %cst_115 = arith.constant 0.000000e+00 : f32
    %167 = vector.broadcast %cst_115 : f32 to vector<8x128xf32>
    %168 = arith.maximumf %166, %167 : vector<8x128xf32>
    %c8_116 = arith.constant 8 : index
    %c0_117 = arith.constant 0 : index
    %169 = vector.load %arg16[%c8_116, %c0_117] : memref<32x128xf32, #tpu.memory_space<vmem>>, vector<8x128xf32>
    tpu.vector_store %arg16[%c8_116, %c0_117], %168 {strides = array<i32>} : memref<32x128xf32, #tpu.memory_space<vmem>>, vector<8x128xf32>,
    %c0_118 = arith.constant 0 : index
    %c0_119 = arith.constant 0 : index
    %170 = vector.load %arg9[%c0_118, %c0_119] : memref<8x16xbf16, #tpu.memory_space<vmem>>, vector<8x16xbf16>
    %c0_120 = arith.constant 0 : index
    %c0_121 = arith.constant 0 : index
    %171 = vector.load %arg16[%c0_120, %c0_121] : memref<32x128xf32, #tpu.memory_space<vmem>>, vector<16x128xf32>
    %172 = arith.truncf %171 : vector<16x128xf32> to vector<16x128xbf16>
    %cst_122 = arith.constant dense<0.000000e+00> : vector<8x128xf32>
    %173 = tpu.matmul %170, %172, %cst_122 {dimension_numbers = #tpu.dot_dimension_numbers<[1], [0], [0], [1], [0, 0, 1, 1], [], []>} : vector<8x16xbf16>, vector<16x128xbf16>, vector<8x128xf32> -> vector<8x128xf32>
    %c0_123 = arith.constant 0 : index
    %c0_124 = arith.constant 0 : index
    %174 = vector.load %arg10[%c0_123, %c0_124] : memref<8x1xf32, #tpu.memory_space<vmem>>, vector<8x1xf32>
    %175 = vector.broadcast %174 : vector<8x1xf32> to vector<8x128xf32>
    %176 = arith.addf %173, %175 : vector<8x128xf32>
    %c1_125 = arith.constant 1 : index
    %c0_126 = arith.constant 0 : index
    %c0_127 = arith.constant 0 : index
    %177 = vector.load %arg5[%c1_125, %c0_126, %c0_127] : memref<3x8x72xbf16, #tpu.memory_space<vmem>>, vector<1x8x72xbf16>
    %178 = vector.shape_cast %177 : vector<1x8x72xbf16> to vector<8x72xbf16>
    %c1_128 = arith.constant 1 : index
    %c0_129 = arith.constant 0 : index
    %c0_130 = arith.constant 0 : index
    %179 = vector.load %arg6[%c1_128, %c0_129, %c0_130] : memref<3x8x1xf32, #tpu.memory_space<vmem>>, vector<1x8x1xf32>
    %180 = vector.shape_cast %179 : vector<1x8x1xf32> to vector<8x1xf32>
    %c9_i32_131 = arith.constant 9 : i32
    %181 = tpu.dynamic_rotate %176 by %c9_i32_131 dim 1 : vector<8x128xf32>, i32 -> vector<8x128xf32>
    %c0_132 = arith.constant 0 : index
    %c0_133 = arith.constant 0 : index
    %c0_134 = arith.constant 0 : index
    %182 = vector.load %arg3[%c0_132, %c0_133, %c0_134] : memref<9x1x128xf32, #tpu.memory_space<vmem>>, vector<1x1x128xf32>
    %183 = vector.shape_cast %182 : vector<1x1x128xf32> to vector<1x128xf32>
    %184 = vector.broadcast %183 : vector<1x128xf32> to vector<8x128xf32>
    %185 = arith.mulf %181, %184 : vector<8x128xf32>
    %c8_i32_135 = arith.constant 8 : i32
    %186 = tpu.dynamic_rotate %176 by %c8_i32_135 dim 1 : vector<8x128xf32>, i32 -> vector<8x128xf32>
    %c1_136 = arith.constant 1 : index
    %c0_137 = arith.constant 0 : index
    %c0_138 = arith.constant 0 : index
    %187 = vector.load %arg3[%c1_136, %c0_137, %c0_138] : memref<9x1x128xf32, #tpu.memory_space<vmem>>, vector<1x1x128xf32>
    %188 = vector.shape_cast %187 : vector<1x1x128xf32> to vector<1x128xf32>
    %189 = vector.broadcast %188 : vector<1x128xf32> to vector<8x128xf32>
    %190 = arith.mulf %186, %189 : vector<8x128xf32>
    %c7_i32_139 = arith.constant 7 : i32
    %191 = tpu.dynamic_rotate %176 by %c7_i32_139 dim 1 : vector<8x128xf32>, i32 -> vector<8x128xf32>
    %c2_140 = arith.constant 2 : index
    %c0_141 = arith.constant 0 : index
    %c0_142 = arith.constant 0 : index
    %192 = vector.load %arg3[%c2_140, %c0_141, %c0_142] : memref<9x1x128xf32, #tpu.memory_space<vmem>>, vector<1x1x128xf32>
    %193 = vector.shape_cast %192 : vector<1x1x128xf32> to vector<1x128xf32>
    %194 = vector.broadcast %193 : vector<1x128xf32> to vector<8x128xf32>
    %195 = arith.mulf %191, %194 : vector<8x128xf32>
    %c1_i32_143 = arith.constant 1 : i32
    %196 = tpu.dynamic_rotate %176 by %c1_i32_143 dim 1 : vector<8x128xf32>, i32 -> vector<8x128xf32>
    %c3_144 = arith.constant 3 : index
    %c0_145 = arith.constant 0 : index
    %c0_146 = arith.constant 0 : index
    %197 = vector.load %arg3[%c3_144, %c0_145, %c0_146] : memref<9x1x128xf32, #tpu.memory_space<vmem>>, vector<1x1x128xf32>
    %198 = vector.shape_cast %197 : vector<1x1x128xf32> to vector<1x128xf32>
    %199 = vector.broadcast %198 : vector<1x128xf32> to vector<8x128xf32>
    %200 = arith.mulf %196, %199 : vector<8x128xf32>
    %c127_i32_147 = arith.constant 127 : i32
    %201 = tpu.dynamic_rotate %176 by %c127_i32_147 dim 1 : vector<8x128xf32>, i32 -> vector<8x128xf32>
    %c5_148 = arith.constant 5 : index
    %c0_149 = arith.constant 0 : index
    %c0_150 = arith.constant 0 : index
    %202 = vector.load %arg3[%c5_148, %c0_149, %c0_150] : memref<9x1x128xf32, #tpu.memory_space<vmem>>, vector<1x1x128xf32>
    %203 = vector.shape_cast %202 : vector<1x1x128xf32> to vector<1x128xf32>
    %204 = vector.broadcast %203 : vector<1x128xf32> to vector<8x128xf32>
    %205 = arith.mulf %201, %204 : vector<8x128xf32>
    %c121_i32_151 = arith.constant 121 : i32
    %206 = tpu.dynamic_rotate %176 by %c121_i32_151 dim 1 : vector<8x128xf32>, i32 -> vector<8x128xf32>
    %c6_152 = arith.constant 6 : index
    %c0_153 = arith.constant 0 : index
    %c0_154 = arith.constant 0 : index
    %207 = vector.load %arg3[%c6_152, %c0_153, %c0_154] : memref<9x1x128xf32, #tpu.memory_space<vmem>>, vector<1x1x128xf32>
    %208 = vector.shape_cast %207 : vector<1x1x128xf32> to vector<1x128xf32>
    %209 = vector.broadcast %208 : vector<1x128xf32> to vector<8x128xf32>
    %210 = arith.mulf %206, %209 : vector<8x128xf32>
    %c120_i32_155 = arith.constant 120 : i32
    %211 = tpu.dynamic_rotate %176 by %c120_i32_155 dim 1 : vector<8x128xf32>, i32 -> vector<8x128xf32>
    %c7_156 = arith.constant 7 : index
    %c0_157 = arith.constant 0 : index
    %c0_158 = arith.constant 0 : index
    %212 = vector.load %arg3[%c7_156, %c0_157, %c0_158] : memref<9x1x128xf32, #tpu.memory_space<vmem>>, vector<1x1x128xf32>
    %213 = vector.shape_cast %212 : vector<1x1x128xf32> to vector<1x128xf32>
    %214 = vector.broadcast %213 : vector<1x128xf32> to vector<8x128xf32>
    %215 = arith.mulf %211, %214 : vector<8x128xf32>
    %c119_i32_159 = arith.constant 119 : i32
    %216 = tpu.dynamic_rotate %176 by %c119_i32_159 dim 1 : vector<8x128xf32>, i32 -> vector<8x128xf32>
    %c8_160 = arith.constant 8 : index
    %c0_161 = arith.constant 0 : index
    %c0_162 = arith.constant 0 : index
    %217 = vector.load %arg3[%c8_160, %c0_161, %c0_162] : memref<9x1x128xf32, #tpu.memory_space<vmem>>, vector<1x1x128xf32>
    %218 = vector.shape_cast %217 : vector<1x1x128xf32> to vector<1x128xf32>
    %219 = vector.broadcast %218 : vector<1x128xf32> to vector<8x128xf32>
    %220 = arith.mulf %216, %219 : vector<8x128xf32>
    %221 = tpu.concatenate %185, %190, %195, %200, %176, %205, %210, %215, %220 in 0 : vector<8x128xf32>, vector<8x128xf32>, vector<8x128xf32>, vector<8x128xf32>, vector<8x128xf32>, vector<8x128xf32>, vector<8x128xf32>, vector<8x128xf32>, vector<8x128xf32> -> vector<72x128xf32>
    %222 = arith.truncf %221 : vector<72x128xf32> to vector<72x128xbf16>
    %cst_163 = arith.constant dense<0.000000e+00> : vector<8x128xf32>
    %223 = tpu.matmul %178, %222, %cst_163 {dimension_numbers = #tpu.dot_dimension_numbers<[1], [0], [0], [1], [0, 0, 1, 1], [], []>} : vector<8x72xbf16>, vector<72x128xbf16>, vector<8x128xf32> -> vector<8x128xf32>
    %224 = vector.broadcast %180 : vector<8x1xf32> to vector<8x128xf32>
    %225 = arith.addf %223, %224 : vector<8x128xf32>
    %cst_164 = arith.constant 0.000000e+00 : f32
    %226 = vector.broadcast %cst_164 : f32 to vector<8x128xf32>
    %227 = arith.maximumf %225, %226 : vector<8x128xf32>
    %c9_i32_165 = arith.constant 9 : i32
    %228 = tpu.dynamic_rotate %227 by %c9_i32_165 dim 1 : vector<8x128xf32>, i32 -> vector<8x128xf32>
    %c0_166 = arith.constant 0 : index
    %c0_167 = arith.constant 0 : index
    %c0_168 = arith.constant 0 : index
    %229 = vector.load %arg3[%c0_166, %c0_167, %c0_168] : memref<9x1x128xf32, #tpu.memory_space<vmem>>, vector<1x1x128xf32>
    %230 = vector.shape_cast %229 : vector<1x1x128xf32> to vector<1x128xf32>
    %231 = vector.broadcast %230 : vector<1x128xf32> to vector<8x128xf32>
    %232 = arith.mulf %228, %231 : vector<8x128xf32>
    %c8_i32_169 = arith.constant 8 : i32
    %233 = tpu.dynamic_rotate %227 by %c8_i32_169 dim 1 : vector<8x128xf32>, i32 -> vector<8x128xf32>
    %c1_170 = arith.constant 1 : index
    %c0_171 = arith.constant 0 : index
    %c0_172 = arith.constant 0 : index
    %234 = vector.load %arg3[%c1_170, %c0_171, %c0_172] : memref<9x1x128xf32, #tpu.memory_space<vmem>>, vector<1x1x128xf32>
    %235 = vector.shape_cast %234 : vector<1x1x128xf32> to vector<1x128xf32>
    %236 = vector.broadcast %235 : vector<1x128xf32> to vector<8x128xf32>
    %237 = arith.mulf %233, %236 : vector<8x128xf32>
    %c7_i32_173 = arith.constant 7 : i32
    %238 = tpu.dynamic_rotate %227 by %c7_i32_173 dim 1 : vector<8x128xf32>, i32 -> vector<8x128xf32>
    %c2_174 = arith.constant 2 : index
    %c0_175 = arith.constant 0 : index
    %c0_176 = arith.constant 0 : index
    %239 = vector.load %arg3[%c2_174, %c0_175, %c0_176] : memref<9x1x128xf32, #tpu.memory_space<vmem>>, vector<1x1x128xf32>
    %240 = vector.shape_cast %239 : vector<1x1x128xf32> to vector<1x128xf32>
    %241 = vector.broadcast %240 : vector<1x128xf32> to vector<8x128xf32>
    %242 = arith.mulf %238, %241 : vector<8x128xf32>
    %c1_i32_177 = arith.constant 1 : i32
    %243 = tpu.dynamic_rotate %227 by %c1_i32_177 dim 1 : vector<8x128xf32>, i32 -> vector<8x128xf32>
    %c3_178 = arith.constant 3 : index
    %c0_179 = arith.constant 0 : index
    %c0_180 = arith.constant 0 : index
    %244 = vector.load %arg3[%c3_178, %c0_179, %c0_180] : memref<9x1x128xf32, #tpu.memory_space<vmem>>, vector<1x1x128xf32>
    %245 = vector.shape_cast %244 : vector<1x1x128xf32> to vector<1x128xf32>
    %246 = vector.broadcast %245 : vector<1x128xf32> to vector<8x128xf32>
    %247 = arith.mulf %243, %246 : vector<8x128xf32>
    %c127_i32_181 = arith.constant 127 : i32
    %248 = tpu.dynamic_rotate %227 by %c127_i32_181 dim 1 : vector<8x128xf32>, i32 -> vector<8x128xf32>
    %c5_182 = arith.constant 5 : index
    %c0_183 = arith.constant 0 : index
    %c0_184 = arith.constant 0 : index
    %249 = vector.load %arg3[%c5_182, %c0_183, %c0_184] : memref<9x1x128xf32, #tpu.memory_space<vmem>>, vector<1x1x128xf32>
    %250 = vector.shape_cast %249 : vector<1x1x128xf32> to vector<1x128xf32>
    %251 = vector.broadcast %250 : vector<1x128xf32> to vector<8x128xf32>
    %252 = arith.mulf %248, %251 : vector<8x128xf32>
    %c121_i32_185 = arith.constant 121 : i32
    %253 = tpu.dynamic_rotate %227 by %c121_i32_185 dim 1 : vector<8x128xf32>, i32 -> vector<8x128xf32>
    %c6_186 = arith.constant 6 : index
    %c0_187 = arith.constant 0 : index
    %c0_188 = arith.constant 0 : index
    %254 = vector.load %arg3[%c6_186, %c0_187, %c0_188] : memref<9x1x128xf32, #tpu.memory_space<vmem>>, vector<1x1x128xf32>
    %255 = vector.shape_cast %254 : vector<1x1x128xf32> to vector<1x128xf32>
    %256 = vector.broadcast %255 : vector<1x128xf32> to vector<8x128xf32>
    %257 = arith.mulf %253, %256 : vector<8x128xf32>
    %c120_i32_189 = arith.constant 120 : i32
    %258 = tpu.dynamic_rotate %227 by %c120_i32_189 dim 1 : vector<8x128xf32>, i32 -> vector<8x128xf32>
    %c7_190 = arith.constant 7 : index
    %c0_191 = arith.constant 0 : index
    %c0_192 = arith.constant 0 : index
    %259 = vector.load %arg3[%c7_190, %c0_191, %c0_192] : memref<9x1x128xf32, #tpu.memory_space<vmem>>, vector<1x1x128xf32>
    %260 = vector.shape_cast %259 : vector<1x1x128xf32> to vector<1x128xf32>
    %261 = vector.broadcast %260 : vector<1x128xf32> to vector<8x128xf32>
    %262 = arith.mulf %258, %261 : vector<8x128xf32>
    %c119_i32_193 = arith.constant 119 : i32
    %263 = tpu.dynamic_rotate %227 by %c119_i32_193 dim 1 : vector<8x128xf32>, i32 -> vector<8x128xf32>
    %c8_194 = arith.constant 8 : index
    %c0_195 = arith.constant 0 : index
    %c0_196 = arith.constant 0 : index
    %264 = vector.load %arg3[%c8_194, %c0_195, %c0_196] : memref<9x1x128xf32, #tpu.memory_space<vmem>>, vector<1x1x128xf32>
    %265 = vector.shape_cast %264 : vector<1x1x128xf32> to vector<1x128xf32>
    %266 = vector.broadcast %265 : vector<1x128xf32> to vector<8x128xf32>
    %267 = arith.mulf %263, %266 : vector<8x128xf32>
    %268 = tpu.concatenate %232, %237, %242, %247, %227, %252, %257, %262, %267 in 0 : vector<8x128xf32>, vector<8x128xf32>, vector<8x128xf32>, vector<8x128xf32>, vector<8x128xf32>, vector<8x128xf32>, vector<8x128xf32>, vector<8x128xf32>, vector<8x128xf32> -> vector<72x128xf32>
    %269 = arith.truncf %268 : vector<72x128xf32> to vector<72x128xbf16>
    %cst_197 = arith.constant dense<0.000000e+00> : vector<8x128xf32>
    %270 = tpu.matmul %178, %269, %cst_197 {dimension_numbers = #tpu.dot_dimension_numbers<[1], [0], [0], [1], [0, 0, 1, 1], [], []>} : vector<8x72xbf16>, vector<72x128xbf16>, vector<8x128xf32> -> vector<8x128xf32>
    %271 = vector.broadcast %180 : vector<8x1xf32> to vector<8x128xf32>
    %272 = arith.addf %270, %271 : vector<8x128xf32>
    %cst_198 = arith.constant 0.000000e+00 : f32
    %273 = vector.broadcast %cst_198 : f32 to vector<8x128xf32>
    %274 = arith.maximumf %272, %273 : vector<8x128xf32>
    %c9_i32_199 = arith.constant 9 : i32
    %275 = tpu.dynamic_rotate %274 by %c9_i32_199 dim 1 : vector<8x128xf32>, i32 -> vector<8x128xf32>
    %c0_200 = arith.constant 0 : index
    %c0_201 = arith.constant 0 : index
    %c0_202 = arith.constant 0 : index
    %276 = vector.load %arg3[%c0_200, %c0_201, %c0_202] : memref<9x1x128xf32, #tpu.memory_space<vmem>>, vector<1x1x128xf32>
    %277 = vector.shape_cast %276 : vector<1x1x128xf32> to vector<1x128xf32>
    %278 = vector.broadcast %277 : vector<1x128xf32> to vector<8x128xf32>
    %279 = arith.mulf %275, %278 : vector<8x128xf32>
    %c8_i32_203 = arith.constant 8 : i32
    %280 = tpu.dynamic_rotate %274 by %c8_i32_203 dim 1 : vector<8x128xf32>, i32 -> vector<8x128xf32>
    %c1_204 = arith.constant 1 : index
    %c0_205 = arith.constant 0 : index
    %c0_206 = arith.constant 0 : index
    %281 = vector.load %arg3[%c1_204, %c0_205, %c0_206] : memref<9x1x128xf32, #tpu.memory_space<vmem>>, vector<1x1x128xf32>
    %282 = vector.shape_cast %281 : vector<1x1x128xf32> to vector<1x128xf32>
    %283 = vector.broadcast %282 : vector<1x128xf32> to vector<8x128xf32>
    %284 = arith.mulf %280, %283 : vector<8x128xf32>
    %c7_i32_207 = arith.constant 7 : i32
    %285 = tpu.dynamic_rotate %274 by %c7_i32_207 dim 1 : vector<8x128xf32>, i32 -> vector<8x128xf32>
    %c2_208 = arith.constant 2 : index
    %c0_209 = arith.constant 0 : index
    %c0_210 = arith.constant 0 : index
    %286 = vector.load %arg3[%c2_208, %c0_209, %c0_210] : memref<9x1x128xf32, #tpu.memory_space<vmem>>, vector<1x1x128xf32>
    %287 = vector.shape_cast %286 : vector<1x1x128xf32> to vector<1x128xf32>
    %288 = vector.broadcast %287 : vector<1x128xf32> to vector<8x128xf32>
    %289 = arith.mulf %285, %288 : vector<8x128xf32>
    %c1_i32_211 = arith.constant 1 : i32
    %290 = tpu.dynamic_rotate %274 by %c1_i32_211 dim 1 : vector<8x128xf32>, i32 -> vector<8x128xf32>
    %c3_212 = arith.constant 3 : index
    %c0_213 = arith.constant 0 : index
    %c0_214 = arith.constant 0 : index
    %291 = vector.load %arg3[%c3_212, %c0_213, %c0_214] : memref<9x1x128xf32, #tpu.memory_space<vmem>>, vector<1x1x128xf32>
    %292 = vector.shape_cast %291 : vector<1x1x128xf32> to vector<1x128xf32>
    %293 = vector.broadcast %292 : vector<1x128xf32> to vector<8x128xf32>
    %294 = arith.mulf %290, %293 : vector<8x128xf32>
    %c127_i32_215 = arith.constant 127 : i32
    %295 = tpu.dynamic_rotate %274 by %c127_i32_215 dim 1 : vector<8x128xf32>, i32 -> vector<8x128xf32>
    %c5_216 = arith.constant 5 : index
    %c0_217 = arith.constant 0 : index
    %c0_218 = arith.constant 0 : index
    %296 = vector.load %arg3[%c5_216, %c0_217, %c0_218] : memref<9x1x128xf32, #tpu.memory_space<vmem>>, vector<1x1x128xf32>
    %297 = vector.shape_cast %296 : vector<1x1x128xf32> to vector<1x128xf32>
    %298 = vector.broadcast %297 : vector<1x128xf32> to vector<8x128xf32>
    %299 = arith.mulf %295, %298 : vector<8x128xf32>
    %c121_i32_219 = arith.constant 121 : i32
    %300 = tpu.dynamic_rotate %274 by %c121_i32_219 dim 1 : vector<8x128xf32>, i32 -> vector<8x128xf32>
    %c6_220 = arith.constant 6 : index
    %c0_221 = arith.constant 0 : index
    %c0_222 = arith.constant 0 : index
    %301 = vector.load %arg3[%c6_220, %c0_221, %c0_222] : memref<9x1x128xf32, #tpu.memory_space<vmem>>, vector<1x1x128xf32>
    %302 = vector.shape_cast %301 : vector<1x1x128xf32> to vector<1x128xf32>
    %303 = vector.broadcast %302 : vector<1x128xf32> to vector<8x128xf32>
    %304 = arith.mulf %300, %303 : vector<8x128xf32>
    %c120_i32_223 = arith.constant 120 : i32
    %305 = tpu.dynamic_rotate %274 by %c120_i32_223 dim 1 : vector<8x128xf32>, i32 -> vector<8x128xf32>
    %c7_224 = arith.constant 7 : index
    %c0_225 = arith.constant 0 : index
    %c0_226 = arith.constant 0 : index
    %306 = vector.load %arg3[%c7_224, %c0_225, %c0_226] : memref<9x1x128xf32, #tpu.memory_space<vmem>>, vector<1x1x128xf32>
    %307 = vector.shape_cast %306 : vector<1x1x128xf32> to vector<1x128xf32>
    %308 = vector.broadcast %307 : vector<1x128xf32> to vector<8x128xf32>
    %309 = arith.mulf %305, %308 : vector<8x128xf32>
    %c119_i32_227 = arith.constant 119 : i32
    %310 = tpu.dynamic_rotate %274 by %c119_i32_227 dim 1 : vector<8x128xf32>, i32 -> vector<8x128xf32>
    %c8_228 = arith.constant 8 : index
    %c0_229 = arith.constant 0 : index
    %c0_230 = arith.constant 0 : index
    %311 = vector.load %arg3[%c8_228, %c0_229, %c0_230] : memref<9x1x128xf32, #tpu.memory_space<vmem>>, vector<1x1x128xf32>
    %312 = vector.shape_cast %311 : vector<1x1x128xf32> to vector<1x128xf32>
    %313 = vector.broadcast %312 : vector<1x128xf32> to vector<8x128xf32>
    %314 = arith.mulf %310, %313 : vector<8x128xf32>
    %315 = tpu.concatenate %279, %284, %289, %294, %274, %299, %304, %309, %314 in 0 : vector<8x128xf32>, vector<8x128xf32>, vector<8x128xf32>, vector<8x128xf32>, vector<8x128xf32>, vector<8x128xf32>, vector<8x128xf32>, vector<8x128xf32>, vector<8x128xf32> -> vector<72x128xf32>
    %316 = arith.truncf %315 : vector<72x128xf32> to vector<72x128xbf16>
    %cst_231 = arith.constant dense<0.000000e+00> : vector<8x128xf32>
    %317 = tpu.matmul %178, %316, %cst_231 {dimension_numbers = #tpu.dot_dimension_numbers<[1], [0], [0], [1], [0, 0, 1, 1], [], []>} : vector<8x72xbf16>, vector<72x128xbf16>, vector<8x128xf32> -> vector<8x128xf32>
    %318 = vector.broadcast %180 : vector<8x1xf32> to vector<8x128xf32>
    %319 = arith.addf %317, %318 : vector<8x128xf32>
    %cst_232 = arith.constant 0.000000e+00 : f32
    %320 = vector.broadcast %cst_232 : f32 to vector<8x128xf32>
    %321 = arith.maximumf %319, %320 : vector<8x128xf32>
    %c16 = arith.constant 16 : index
    %c0_233 = arith.constant 0 : index
    %322 = vector.load %arg16[%c16, %c0_233] : memref<32x128xf32, #tpu.memory_space<vmem>>, vector<8x128xf32>
    tpu.vector_store %arg16[%c16, %c0_233], %321 {strides = array<i32>} : memref<32x128xf32, #tpu.memory_space<vmem>>, vector<8x128xf32>,
    %c0_234 = arith.constant 0 : index
    %c0_235 = arith.constant 0 : index
    %323 = vector.load %arg11[%c0_234, %c0_235] : memref<8x24xbf16, #tpu.memory_space<vmem>>, vector<8x24xbf16>
    %c0_236 = arith.constant 0 : index
    %c0_237 = arith.constant 0 : index
    %324 = vector.load %arg16[%c0_236, %c0_237] : memref<32x128xf32, #tpu.memory_space<vmem>>, vector<24x128xf32>
    %325 = arith.truncf %324 : vector<24x128xf32> to vector<24x128xbf16>
    %cst_238 = arith.constant dense<0.000000e+00> : vector<8x128xf32>
    %326 = tpu.matmul %323, %325, %cst_238 {dimension_numbers = #tpu.dot_dimension_numbers<[1], [0], [0], [1], [0, 0, 1, 1], [], []>} : vector<8x24xbf16>, vector<24x128xbf16>, vector<8x128xf32> -> vector<8x128xf32>
    %c0_239 = arith.constant 0 : index
    %c0_240 = arith.constant 0 : index
    %327 = vector.load %arg12[%c0_239, %c0_240] : memref<8x1xf32, #tpu.memory_space<vmem>>, vector<8x1xf32>
    %328 = vector.broadcast %327 : vector<8x1xf32> to vector<8x128xf32>
    %329 = arith.addf %326, %328 : vector<8x128xf32>
    %c2_241 = arith.constant 2 : index
    %c0_242 = arith.constant 0 : index
    %c0_243 = arith.constant 0 : index
    %330 = vector.load %arg5[%c2_241, %c0_242, %c0_243] : memref<3x8x72xbf16, #tpu.memory_space<vmem>>, vector<1x8x72xbf16>
    %331 = vector.shape_cast %330 : vector<1x8x72xbf16> to vector<8x72xbf16>
    %c2_244 = arith.constant 2 : index
    %c0_245 = arith.constant 0 : index
    %c0_246 = arith.constant 0 : index
    %332 = vector.load %arg6[%c2_244, %c0_245, %c0_246] : memref<3x8x1xf32, #tpu.memory_space<vmem>>, vector<1x8x1xf32>
    %333 = vector.shape_cast %332 : vector<1x8x1xf32> to vector<8x1xf32>
    %c9_i32_247 = arith.constant 9 : i32
    %334 = tpu.dynamic_rotate %329 by %c9_i32_247 dim 1 : vector<8x128xf32>, i32 -> vector<8x128xf32>
    %c0_248 = arith.constant 0 : index
    %c0_249 = arith.constant 0 : index
    %c0_250 = arith.constant 0 : index
    %335 = vector.load %arg3[%c0_248, %c0_249, %c0_250] : memref<9x1x128xf32, #tpu.memory_space<vmem>>, vector<1x1x128xf32>
    %336 = vector.shape_cast %335 : vector<1x1x128xf32> to vector<1x128xf32>
    %337 = vector.broadcast %336 : vector<1x128xf32> to vector<8x128xf32>
    %338 = arith.mulf %334, %337 : vector<8x128xf32>
    %c8_i32_251 = arith.constant 8 : i32
    %339 = tpu.dynamic_rotate %329 by %c8_i32_251 dim 1 : vector<8x128xf32>, i32 -> vector<8x128xf32>
    %c1_252 = arith.constant 1 : index
    %c0_253 = arith.constant 0 : index
    %c0_254 = arith.constant 0 : index
    %340 = vector.load %arg3[%c1_252, %c0_253, %c0_254] : memref<9x1x128xf32, #tpu.memory_space<vmem>>, vector<1x1x128xf32>
    %341 = vector.shape_cast %340 : vector<1x1x128xf32> to vector<1x128xf32>
    %342 = vector.broadcast %341 : vector<1x128xf32> to vector<8x128xf32>
    %343 = arith.mulf %339, %342 : vector<8x128xf32>
    %c7_i32_255 = arith.constant 7 : i32
    %344 = tpu.dynamic_rotate %329 by %c7_i32_255 dim 1 : vector<8x128xf32>, i32 -> vector<8x128xf32>
    %c2_256 = arith.constant 2 : index
    %c0_257 = arith.constant 0 : index
    %c0_258 = arith.constant 0 : index
    %345 = vector.load %arg3[%c2_256, %c0_257, %c0_258] : memref<9x1x128xf32, #tpu.memory_space<vmem>>, vector<1x1x128xf32>
    %346 = vector.shape_cast %345 : vector<1x1x128xf32> to vector<1x128xf32>
    %347 = vector.broadcast %346 : vector<1x128xf32> to vector<8x128xf32>
    %348 = arith.mulf %344, %347 : vector<8x128xf32>
    %c1_i32_259 = arith.constant 1 : i32
    %349 = tpu.dynamic_rotate %329 by %c1_i32_259 dim 1 : vector<8x128xf32>, i32 -> vector<8x128xf32>
    %c3_260 = arith.constant 3 : index
    %c0_261 = arith.constant 0 : index
    %c0_262 = arith.constant 0 : index
    %350 = vector.load %arg3[%c3_260, %c0_261, %c0_262] : memref<9x1x128xf32, #tpu.memory_space<vmem>>, vector<1x1x128xf32>
    %351 = vector.shape_cast %350 : vector<1x1x128xf32> to vector<1x128xf32>
    %352 = vector.broadcast %351 : vector<1x128xf32> to vector<8x128xf32>
    %353 = arith.mulf %349, %352 : vector<8x128xf32>
    %c127_i32_263 = arith.constant 127 : i32
    %354 = tpu.dynamic_rotate %329 by %c127_i32_263 dim 1 : vector<8x128xf32>, i32 -> vector<8x128xf32>
    %c5_264 = arith.constant 5 : index
    %c0_265 = arith.constant 0 : index
    %c0_266 = arith.constant 0 : index
    %355 = vector.load %arg3[%c5_264, %c0_265, %c0_266] : memref<9x1x128xf32, #tpu.memory_space<vmem>>, vector<1x1x128xf32>
    %356 = vector.shape_cast %355 : vector<1x1x128xf32> to vector<1x128xf32>
    %357 = vector.broadcast %356 : vector<1x128xf32> to vector<8x128xf32>
    %358 = arith.mulf %354, %357 : vector<8x128xf32>
    %c121_i32_267 = arith.constant 121 : i32
    %359 = tpu.dynamic_rotate %329 by %c121_i32_267 dim 1 : vector<8x128xf32>, i32 -> vector<8x128xf32>
    %c6_268 = arith.constant 6 : index
    %c0_269 = arith.constant 0 : index
    %c0_270 = arith.constant 0 : index
    %360 = vector.load %arg3[%c6_268, %c0_269, %c0_270] : memref<9x1x128xf32, #tpu.memory_space<vmem>>, vector<1x1x128xf32>
    %361 = vector.shape_cast %360 : vector<1x1x128xf32> to vector<1x128xf32>
    %362 = vector.broadcast %361 : vector<1x128xf32> to vector<8x128xf32>
    %363 = arith.mulf %359, %362 : vector<8x128xf32>
    %c120_i32_271 = arith.constant 120 : i32
    %364 = tpu.dynamic_rotate %329 by %c120_i32_271 dim 1 : vector<8x128xf32>, i32 -> vector<8x128xf32>
    %c7_272 = arith.constant 7 : index
    %c0_273 = arith.constant 0 : index
    %c0_274 = arith.constant 0 : index
    %365 = vector.load %arg3[%c7_272, %c0_273, %c0_274] : memref<9x1x128xf32, #tpu.memory_space<vmem>>, vector<1x1x128xf32>
    %366 = vector.shape_cast %365 : vector<1x1x128xf32> to vector<1x128xf32>
    %367 = vector.broadcast %366 : vector<1x128xf32> to vector<8x128xf32>
    %368 = arith.mulf %364, %367 : vector<8x128xf32>
    %c119_i32_275 = arith.constant 119 : i32
    %369 = tpu.dynamic_rotate %329 by %c119_i32_275 dim 1 : vector<8x128xf32>, i32 -> vector<8x128xf32>
    %c8_276 = arith.constant 8 : index
    %c0_277 = arith.constant 0 : index
    %c0_278 = arith.constant 0 : index
    %370 = vector.load %arg3[%c8_276, %c0_277, %c0_278] : memref<9x1x128xf32, #tpu.memory_space<vmem>>, vector<1x1x128xf32>
    %371 = vector.shape_cast %370 : vector<1x1x128xf32> to vector<1x128xf32>
    %372 = vector.broadcast %371 : vector<1x128xf32> to vector<8x128xf32>
    %373 = arith.mulf %369, %372 : vector<8x128xf32>
    %374 = tpu.concatenate %338, %343, %348, %353, %329, %358, %363, %368, %373 in 0 : vector<8x128xf32>, vector<8x128xf32>, vector<8x128xf32>, vector<8x128xf32>, vector<8x128xf32>, vector<8x128xf32>, vector<8x128xf32>, vector<8x128xf32>, vector<8x128xf32> -> vector<72x128xf32>
    %375 = arith.truncf %374 : vector<72x128xf32> to vector<72x128xbf16>
    %cst_279 = arith.constant dense<0.000000e+00> : vector<8x128xf32>
    %376 = tpu.matmul %331, %375, %cst_279 {dimension_numbers = #tpu.dot_dimension_numbers<[1], [0], [0], [1], [0, 0, 1, 1], [], []>} : vector<8x72xbf16>, vector<72x128xbf16>, vector<8x128xf32> -> vector<8x128xf32>
    %377 = vector.broadcast %333 : vector<8x1xf32> to vector<8x128xf32>
    %378 = arith.addf %376, %377 : vector<8x128xf32>
    %cst_280 = arith.constant 0.000000e+00 : f32
    %379 = vector.broadcast %cst_280 : f32 to vector<8x128xf32>
    %380 = arith.maximumf %378, %379 : vector<8x128xf32>
    %c9_i32_281 = arith.constant 9 : i32
    %381 = tpu.dynamic_rotate %380 by %c9_i32_281 dim 1 : vector<8x128xf32>, i32 -> vector<8x128xf32>
    %c0_282 = arith.constant 0 : index
    %c0_283 = arith.constant 0 : index
    %c0_284 = arith.constant 0 : index
    %382 = vector.load %arg3[%c0_282, %c0_283, %c0_284] : memref<9x1x128xf32, #tpu.memory_space<vmem>>, vector<1x1x128xf32>
    %383 = vector.shape_cast %382 : vector<1x1x128xf32> to vector<1x128xf32>
    %384 = vector.broadcast %383 : vector<1x128xf32> to vector<8x128xf32>
    %385 = arith.mulf %381, %384 : vector<8x128xf32>
    %c8_i32_285 = arith.constant 8 : i32
    %386 = tpu.dynamic_rotate %380 by %c8_i32_285 dim 1 : vector<8x128xf32>, i32 -> vector<8x128xf32>
    %c1_286 = arith.constant 1 : index
    %c0_287 = arith.constant 0 : index
    %c0_288 = arith.constant 0 : index
    %387 = vector.load %arg3[%c1_286, %c0_287, %c0_288] : memref<9x1x128xf32, #tpu.memory_space<vmem>>, vector<1x1x128xf32>
    %388 = vector.shape_cast %387 : vector<1x1x128xf32> to vector<1x128xf32>
    %389 = vector.broadcast %388 : vector<1x128xf32> to vector<8x128xf32>
    %390 = arith.mulf %386, %389 : vector<8x128xf32>
    %c7_i32_289 = arith.constant 7 : i32
    %391 = tpu.dynamic_rotate %380 by %c7_i32_289 dim 1 : vector<8x128xf32>, i32 -> vector<8x128xf32>
    %c2_290 = arith.constant 2 : index
    %c0_291 = arith.constant 0 : index
    %c0_292 = arith.constant 0 : index
    %392 = vector.load %arg3[%c2_290, %c0_291, %c0_292] : memref<9x1x128xf32, #tpu.memory_space<vmem>>, vector<1x1x128xf32>
    %393 = vector.shape_cast %392 : vector<1x1x128xf32> to vector<1x128xf32>
    %394 = vector.broadcast %393 : vector<1x128xf32> to vector<8x128xf32>
    %395 = arith.mulf %391, %394 : vector<8x128xf32>
    %c1_i32_293 = arith.constant 1 : i32
    %396 = tpu.dynamic_rotate %380 by %c1_i32_293 dim 1 : vector<8x128xf32>, i32 -> vector<8x128xf32>
    %c3_294 = arith.constant 3 : index
    %c0_295 = arith.constant 0 : index
    %c0_296 = arith.constant 0 : index
    %397 = vector.load %arg3[%c3_294, %c0_295, %c0_296] : memref<9x1x128xf32, #tpu.memory_space<vmem>>, vector<1x1x128xf32>
    %398 = vector.shape_cast %397 : vector<1x1x128xf32> to vector<1x128xf32>
    %399 = vector.broadcast %398 : vector<1x128xf32> to vector<8x128xf32>
    %400 = arith.mulf %396, %399 : vector<8x128xf32>
    %c127_i32_297 = arith.constant 127 : i32
    %401 = tpu.dynamic_rotate %380 by %c127_i32_297 dim 1 : vector<8x128xf32>, i32 -> vector<8x128xf32>
    %c5_298 = arith.constant 5 : index
    %c0_299 = arith.constant 0 : index
    %c0_300 = arith.constant 0 : index
    %402 = vector.load %arg3[%c5_298, %c0_299, %c0_300] : memref<9x1x128xf32, #tpu.memory_space<vmem>>, vector<1x1x128xf32>
    %403 = vector.shape_cast %402 : vector<1x1x128xf32> to vector<1x128xf32>
    %404 = vector.broadcast %403 : vector<1x128xf32> to vector<8x128xf32>
    %405 = arith.mulf %401, %404 : vector<8x128xf32>
    %c121_i32_301 = arith.constant 121 : i32
    %406 = tpu.dynamic_rotate %380 by %c121_i32_301 dim 1 : vector<8x128xf32>, i32 -> vector<8x128xf32>
    %c6_302 = arith.constant 6 : index
    %c0_303 = arith.constant 0 : index
    %c0_304 = arith.constant 0 : index
    %407 = vector.load %arg3[%c6_302, %c0_303, %c0_304] : memref<9x1x128xf32, #tpu.memory_space<vmem>>, vector<1x1x128xf32>
    %408 = vector.shape_cast %407 : vector<1x1x128xf32> to vector<1x128xf32>
    %409 = vector.broadcast %408 : vector<1x128xf32> to vector<8x128xf32>
    %410 = arith.mulf %406, %409 : vector<8x128xf32>
    %c120_i32_305 = arith.constant 120 : i32
    %411 = tpu.dynamic_rotate %380 by %c120_i32_305 dim 1 : vector<8x128xf32>, i32 -> vector<8x128xf32>
    %c7_306 = arith.constant 7 : index
    %c0_307 = arith.constant 0 : index
    %c0_308 = arith.constant 0 : index
    %412 = vector.load %arg3[%c7_306, %c0_307, %c0_308] : memref<9x1x128xf32, #tpu.memory_space<vmem>>, vector<1x1x128xf32>
    %413 = vector.shape_cast %412 : vector<1x1x128xf32> to vector<1x128xf32>
    %414 = vector.broadcast %413 : vector<1x128xf32> to vector<8x128xf32>
    %415 = arith.mulf %411, %414 : vector<8x128xf32>
    %c119_i32_309 = arith.constant 119 : i32
    %416 = tpu.dynamic_rotate %380 by %c119_i32_309 dim 1 : vector<8x128xf32>, i32 -> vector<8x128xf32>
    %c8_310 = arith.constant 8 : index
    %c0_311 = arith.constant 0 : index
    %c0_312 = arith.constant 0 : index
    %417 = vector.load %arg3[%c8_310, %c0_311, %c0_312] : memref<9x1x128xf32, #tpu.memory_space<vmem>>, vector<1x1x128xf32>
    %418 = vector.shape_cast %417 : vector<1x1x128xf32> to vector<1x128xf32>
    %419 = vector.broadcast %418 : vector<1x128xf32> to vector<8x128xf32>
    %420 = arith.mulf %416, %419 : vector<8x128xf32>
    %421 = tpu.concatenate %385, %390, %395, %400, %380, %405, %410, %415, %420 in 0 : vector<8x128xf32>, vector<8x128xf32>, vector<8x128xf32>, vector<8x128xf32>, vector<8x128xf32>, vector<8x128xf32>, vector<8x128xf32>, vector<8x128xf32>, vector<8x128xf32> -> vector<72x128xf32>
    %422 = arith.truncf %421 : vector<72x128xf32> to vector<72x128xbf16>
    %cst_313 = arith.constant dense<0.000000e+00> : vector<8x128xf32>
    %423 = tpu.matmul %331, %422, %cst_313 {dimension_numbers = #tpu.dot_dimension_numbers<[1], [0], [0], [1], [0, 0, 1, 1], [], []>} : vector<8x72xbf16>, vector<72x128xbf16>, vector<8x128xf32> -> vector<8x128xf32>
    %424 = vector.broadcast %333 : vector<8x1xf32> to vector<8x128xf32>
    %425 = arith.addf %423, %424 : vector<8x128xf32>
    %cst_314 = arith.constant 0.000000e+00 : f32
    %426 = vector.broadcast %cst_314 : f32 to vector<8x128xf32>
    %427 = arith.maximumf %425, %426 : vector<8x128xf32>
    %c9_i32_315 = arith.constant 9 : i32
    %428 = tpu.dynamic_rotate %427 by %c9_i32_315 dim 1 : vector<8x128xf32>, i32 -> vector<8x128xf32>
    %c0_316 = arith.constant 0 : index
    %c0_317 = arith.constant 0 : index
    %c0_318 = arith.constant 0 : index
    %429 = vector.load %arg3[%c0_316, %c0_317, %c0_318] : memref<9x1x128xf32, #tpu.memory_space<vmem>>, vector<1x1x128xf32>
    %430 = vector.shape_cast %429 : vector<1x1x128xf32> to vector<1x128xf32>
    %431 = vector.broadcast %430 : vector<1x128xf32> to vector<8x128xf32>
    %432 = arith.mulf %428, %431 : vector<8x128xf32>
    %c8_i32_319 = arith.constant 8 : i32
    %433 = tpu.dynamic_rotate %427 by %c8_i32_319 dim 1 : vector<8x128xf32>, i32 -> vector<8x128xf32>
    %c1_320 = arith.constant 1 : index
    %c0_321 = arith.constant 0 : index
    %c0_322 = arith.constant 0 : index
    %434 = vector.load %arg3[%c1_320, %c0_321, %c0_322] : memref<9x1x128xf32, #tpu.memory_space<vmem>>, vector<1x1x128xf32>
    %435 = vector.shape_cast %434 : vector<1x1x128xf32> to vector<1x128xf32>
    %436 = vector.broadcast %435 : vector<1x128xf32> to vector<8x128xf32>
    %437 = arith.mulf %433, %436 : vector<8x128xf32>
    %c7_i32_323 = arith.constant 7 : i32
    %438 = tpu.dynamic_rotate %427 by %c7_i32_323 dim 1 : vector<8x128xf32>, i32 -> vector<8x128xf32>
    %c2_324 = arith.constant 2 : index
    %c0_325 = arith.constant 0 : index
    %c0_326 = arith.constant 0 : index
    %439 = vector.load %arg3[%c2_324, %c0_325, %c0_326] : memref<9x1x128xf32, #tpu.memory_space<vmem>>, vector<1x1x128xf32>
    %440 = vector.shape_cast %439 : vector<1x1x128xf32> to vector<1x128xf32>
    %441 = vector.broadcast %440 : vector<1x128xf32> to vector<8x128xf32>
    %442 = arith.mulf %438, %441 : vector<8x128xf32>
    %c1_i32_327 = arith.constant 1 : i32
    %443 = tpu.dynamic_rotate %427 by %c1_i32_327 dim 1 : vector<8x128xf32>, i32 -> vector<8x128xf32>
    %c3_328 = arith.constant 3 : index
    %c0_329 = arith.constant 0 : index
    %c0_330 = arith.constant 0 : index
    %444 = vector.load %arg3[%c3_328, %c0_329, %c0_330] : memref<9x1x128xf32, #tpu.memory_space<vmem>>, vector<1x1x128xf32>
    %445 = vector.shape_cast %444 : vector<1x1x128xf32> to vector<1x128xf32>
    %446 = vector.broadcast %445 : vector<1x128xf32> to vector<8x128xf32>
    %447 = arith.mulf %443, %446 : vector<8x128xf32>
    %c127_i32_331 = arith.constant 127 : i32
    %448 = tpu.dynamic_rotate %427 by %c127_i32_331 dim 1 : vector<8x128xf32>, i32 -> vector<8x128xf32>
    %c5_332 = arith.constant 5 : index
    %c0_333 = arith.constant 0 : index
    %c0_334 = arith.constant 0 : index
    %449 = vector.load %arg3[%c5_332, %c0_333, %c0_334] : memref<9x1x128xf32, #tpu.memory_space<vmem>>, vector<1x1x128xf32>
    %450 = vector.shape_cast %449 : vector<1x1x128xf32> to vector<1x128xf32>
    %451 = vector.broadcast %450 : vector<1x128xf32> to vector<8x128xf32>
    %452 = arith.mulf %448, %451 : vector<8x128xf32>
    %c121_i32_335 = arith.constant 121 : i32
    %453 = tpu.dynamic_rotate %427 by %c121_i32_335 dim 1 : vector<8x128xf32>, i32 -> vector<8x128xf32>
    %c6_336 = arith.constant 6 : index
    %c0_337 = arith.constant 0 : index
    %c0_338 = arith.constant 0 : index
    %454 = vector.load %arg3[%c6_336, %c0_337, %c0_338] : memref<9x1x128xf32, #tpu.memory_space<vmem>>, vector<1x1x128xf32>
    %455 = vector.shape_cast %454 : vector<1x1x128xf32> to vector<1x128xf32>
    %456 = vector.broadcast %455 : vector<1x128xf32> to vector<8x128xf32>
    %457 = arith.mulf %453, %456 : vector<8x128xf32>
    %c120_i32_339 = arith.constant 120 : i32
    %458 = tpu.dynamic_rotate %427 by %c120_i32_339 dim 1 : vector<8x128xf32>, i32 -> vector<8x128xf32>
    %c7_340 = arith.constant 7 : index
    %c0_341 = arith.constant 0 : index
    %c0_342 = arith.constant 0 : index
    %459 = vector.load %arg3[%c7_340, %c0_341, %c0_342] : memref<9x1x128xf32, #tpu.memory_space<vmem>>, vector<1x1x128xf32>
    %460 = vector.shape_cast %459 : vector<1x1x128xf32> to vector<1x128xf32>
    %461 = vector.broadcast %460 : vector<1x128xf32> to vector<8x128xf32>
    %462 = arith.mulf %458, %461 : vector<8x128xf32>
    %c119_i32_343 = arith.constant 119 : i32
    %463 = tpu.dynamic_rotate %427 by %c119_i32_343 dim 1 : vector<8x128xf32>, i32 -> vector<8x128xf32>
    %c8_344 = arith.constant 8 : index
    %c0_345 = arith.constant 0 : index
    %c0_346 = arith.constant 0 : index
    %464 = vector.load %arg3[%c8_344, %c0_345, %c0_346] : memref<9x1x128xf32, #tpu.memory_space<vmem>>, vector<1x1x128xf32>
    %465 = vector.shape_cast %464 : vector<1x1x128xf32> to vector<1x128xf32>
    %466 = vector.broadcast %465 : vector<1x128xf32> to vector<8x128xf32>
    %467 = arith.mulf %463, %466 : vector<8x128xf32>
    %468 = tpu.concatenate %432, %437, %442, %447, %427, %452, %457, %462, %467 in 0 : vector<8x128xf32>, vector<8x128xf32>, vector<8x128xf32>, vector<8x128xf32>, vector<8x128xf32>, vector<8x128xf32>, vector<8x128xf32>, vector<8x128xf32>, vector<8x128xf32> -> vector<72x128xf32>
    %469 = arith.truncf %468 : vector<72x128xf32> to vector<72x128xbf16>
    %cst_347 = arith.constant dense<0.000000e+00> : vector<8x128xf32>
    %470 = tpu.matmul %331, %469, %cst_347 {dimension_numbers = #tpu.dot_dimension_numbers<[1], [0], [0], [1], [0, 0, 1, 1], [], []>} : vector<8x72xbf16>, vector<72x128xbf16>, vector<8x128xf32> -> vector<8x128xf32>
    %471 = vector.broadcast %333 : vector<8x1xf32> to vector<8x128xf32>
    %472 = arith.addf %470, %471 : vector<8x128xf32>
    %cst_348 = arith.constant 0.000000e+00 : f32
    %473 = vector.broadcast %cst_348 : f32 to vector<8x128xf32>
    %474 = arith.maximumf %472, %473 : vector<8x128xf32>
    %c24 = arith.constant 24 : index
    %c0_349 = arith.constant 0 : index
    %475 = vector.load %arg16[%c24, %c0_349] : memref<32x128xf32, #tpu.memory_space<vmem>>, vector<8x128xf32>
    tpu.vector_store %arg16[%c24, %c0_349], %474 {strides = array<i32>} : memref<32x128xf32, #tpu.memory_space<vmem>>, vector<8x128xf32>,
    %c0_350 = arith.constant 0 : index
    %c0_351 = arith.constant 0 : index
    %476 = vector.load %arg4[%c0_350, %c0_351] : memref<256x256xbf16, #tpu.memory_space<vmem>>, vector<256x256xbf16>
    %c0_352 = arith.constant 0 : index
    %c0_353 = arith.constant 0 : index
    %477 = vector.load %arg16[%c0_352, %c0_353] : memref<32x128xf32, #tpu.memory_space<vmem>>, vector<32x64xf32>
    %478 = arith.truncf %477 : vector<32x64xf32> to vector<32x64xbf16>
    %c0_354 = arith.constant 0 : index
    %c0_355 = arith.constant 0 : index
    %c0_356 = arith.constant 0 : index
    %479 = vector.load %arg13[%c0_354, %c0_355, %c0_356] : memref<4x4x32xbf16, #tpu.memory_space<vmem>>, vector<1x4x32xbf16>
    %480 = vector.shape_cast %479 : vector<1x4x32xbf16> to vector<4x32xbf16>
    %cst_357 = arith.constant dense<0.000000e+00> : vector<4x64xf32>
    %481 = tpu.matmul %480, %478, %cst_357 {dimension_numbers = #tpu.dot_dimension_numbers<[1], [0], [0], [1], [0, 0, 1, 1], [], []>} : vector<4x32xbf16>, vector<32x64xbf16>, vector<4x64xf32> -> vector<4x64xf32>
    %c0_358 = arith.constant 0 : index
    %c0_359 = arith.constant 0 : index
    %482 = vector.load %arg17[%c0_358, %c0_359] : memref<4x256xf32, #tpu.memory_space<vmem>>, vector<4x64xf32>
    tpu.vector_store %arg17[%c0_358, %c0_359], %481 {strides = array<i32>} : memref<4x256xf32, #tpu.memory_space<vmem>>, vector<4x64xf32>,
    %c1_360 = arith.constant 1 : index
    %c0_361 = arith.constant 0 : index
    %c0_362 = arith.constant 0 : index
    %483 = vector.load %arg13[%c1_360, %c0_361, %c0_362] : memref<4x4x32xbf16, #tpu.memory_space<vmem>>, vector<1x4x32xbf16>
    %484 = vector.shape_cast %483 : vector<1x4x32xbf16> to vector<4x32xbf16>
    %cst_363 = arith.constant dense<0.000000e+00> : vector<4x64xf32>
    %485 = tpu.matmul %484, %478, %cst_363 {dimension_numbers = #tpu.dot_dimension_numbers<[1], [0], [0], [1], [0, 0, 1, 1], [], []>} : vector<4x32xbf16>, vector<32x64xbf16>, vector<4x64xf32> -> vector<4x64xf32>
    %c0_364 = arith.constant 0 : index
    %c64_365 = arith.constant 64 : index
    %486 = vector.load %arg17[%c0_364, %c64_365] : memref<4x256xf32, #tpu.memory_space<vmem>>, vector<4x64xf32>
    tpu.vector_store %arg17[%c0_364, %c64_365], %485 {strides = array<i32>} : memref<4x256xf32, #tpu.memory_space<vmem>>, vector<4x64xf32>,
    %c2_366 = arith.constant 2 : index
    %c0_367 = arith.constant 0 : index
    %c0_368 = arith.constant 0 : index
    %487 = vector.load %arg13[%c2_366, %c0_367, %c0_368] : memref<4x4x32xbf16, #tpu.memory_space<vmem>>, vector<1x4x32xbf16>
    %488 = vector.shape_cast %487 : vector<1x4x32xbf16> to vector<4x32xbf16>
    %cst_369 = arith.constant dense<0.000000e+00> : vector<4x64xf32>
    %489 = tpu.matmul %488, %478, %cst_369 {dimension_numbers = #tpu.dot_dimension_numbers<[1], [0], [0], [1], [0, 0, 1, 1], [], []>} : vector<4x32xbf16>, vector<32x64xbf16>, vector<4x64xf32> -> vector<4x64xf32>
    %c0_370 = arith.constant 0 : index
    %c128 = arith.constant 128 : index
    %490 = vector.load %arg17[%c0_370, %c128] : memref<4x256xf32, #tpu.memory_space<vmem>>, vector<4x64xf32>
    tpu.vector_store %arg17[%c0_370, %c128], %489 {strides = array<i32>} : memref<4x256xf32, #tpu.memory_space<vmem>>, vector<4x64xf32>,
    %c3_371 = arith.constant 3 : index
    %c0_372 = arith.constant 0 : index
    %c0_373 = arith.constant 0 : index
    %491 = vector.load %arg13[%c3_371, %c0_372, %c0_373] : memref<4x4x32xbf16, #tpu.memory_space<vmem>>, vector<1x4x32xbf16>
    %492 = vector.shape_cast %491 : vector<1x4x32xbf16> to vector<4x32xbf16>
    %cst_374 = arith.constant dense<0.000000e+00> : vector<4x64xf32>
    %493 = tpu.matmul %492, %478, %cst_374 {dimension_numbers = #tpu.dot_dimension_numbers<[1], [0], [0], [1], [0, 0, 1, 1], [], []>} : vector<4x32xbf16>, vector<32x64xbf16>, vector<4x64xf32> -> vector<4x64xf32>
    %c0_375 = arith.constant 0 : index
    %c192 = arith.constant 192 : index
    %494 = vector.load %arg17[%c0_375, %c192] : memref<4x256xf32, #tpu.memory_space<vmem>>, vector<4x64xf32>
    tpu.vector_store %arg17[%c0_375, %c192], %493 {strides = array<i32>} : memref<4x256xf32, #tpu.memory_space<vmem>>, vector<4x64xf32>,
    %c0_376 = arith.constant 0 : index
    %c0_377 = arith.constant 0 : index
    %495 = vector.load %arg17[%c0_376, %c0_377] : memref<4x256xf32, #tpu.memory_space<vmem>>, vector<4x256xf32>
    %496 = arith.truncf %495 : vector<4x256xf32> to vector<4x256xbf16>
    %cst_378 = arith.constant dense<0.000000e+00> : vector<4x256xf32>
    %497 = tpu.matmul %496, %476, %cst_378 {dimension_numbers = #tpu.dot_dimension_numbers<[1], [0], [0], [1], [0, 0, 1, 1], [], []>} : vector<4x256xbf16>, vector<256x256xbf16>, vector<4x256xf32> -> vector<4x256xf32>
    %c0_379 = arith.constant 0 : index
    %c0_380 = arith.constant 0 : index
    %498 = vector.load %arg14[%c0_379, %c0_380] : memref<4x1xf32, #tpu.memory_space<vmem>>, vector<4x1xf32>
    %499 = vector.broadcast %498 : vector<4x1xf32> to vector<4x256xf32>
    %500 = arith.addf %497, %499 : vector<4x256xf32>
    %c0_381 = arith.constant 0 : index
    %c0_382 = arith.constant 0 : index
    %c0_383 = arith.constant 0 : index
    %501 = vector.load %arg1[%c0_381, %c0_382, %c0_383] : memref<2x4x256xf32, #tpu.memory_space<vmem>>, vector<1x4x256xf32>
    %502 = vector.shape_cast %501 : vector<1x4x256xf32> to vector<4x256xf32>
    %503 = arith.addf %502, %500 : vector<4x256xf32>
    %c0_384 = arith.constant 0 : index
    %c0_385 = arith.constant 0 : index
    %c0_386 = arith.constant 0 : index
    %504 = vector.load %arg15[%c0_384, %c0_385, %c0_386] : memref<2x4x256xf32, #tpu.memory_space<vmem>>, vector<1x4x256xf32>
    %505 = vector.shape_cast %504 : vector<1x4x256xf32> to vector<4x256xf32>
    %506 = vector.shape_cast %503 : vector<4x256xf32> to vector<1x4x256xf32>
    tpu.vector_store %arg15[%c0_384, %c0_385, %c0_386], %506 {strides = array<i32>} : memref<2x4x256xf32, #tpu.memory_space<vmem>>, vector<1x4x256xf32>,
    %c0_387 = arith.constant 0 : index
    %c64_388 = arith.constant 64 : index
    %507 = vector.load %arg16[%c0_387, %c64_388] : memref<32x128xf32, #tpu.memory_space<vmem>>, vector<32x64xf32>
    %508 = arith.truncf %507 : vector<32x64xf32> to vector<32x64xbf16>
    %c0_389 = arith.constant 0 : index
    %c0_390 = arith.constant 0 : index
    %c0_391 = arith.constant 0 : index
    %509 = vector.load %arg13[%c0_389, %c0_390, %c0_391] : memref<4x4x32xbf16, #tpu.memory_space<vmem>>, vector<1x4x32xbf16>
    %510 = vector.shape_cast %509 : vector<1x4x32xbf16> to vector<4x32xbf16>
    %cst_392 = arith.constant dense<0.000000e+00> : vector<4x64xf32>
    %511 = tpu.matmul %510, %508, %cst_392 {dimension_numbers = #tpu.dot_dimension_numbers<[1], [0], [0], [1], [0, 0, 1, 1], [], []>} : vector<4x32xbf16>, vector<32x64xbf16>, vector<4x64xf32> -> vector<4x64xf32>
    %c0_393 = arith.constant 0 : index
    %c0_394 = arith.constant 0 : index
    %512 = vector.load %arg17[%c0_393, %c0_394] : memref<4x256xf32, #tpu.memory_space<vmem>>, vector<4x64xf32>
    tpu.vector_store %arg17[%c0_393, %c0_394], %511 {strides = array<i32>} : memref<4x256xf32, #tpu.memory_space<vmem>>, vector<4x64xf32>,
    %c1_395 = arith.constant 1 : index
    %c0_396 = arith.constant 0 : index
    %c0_397 = arith.constant 0 : index
    %513 = vector.load %arg13[%c1_395, %c0_396, %c0_397] : memref<4x4x32xbf16, #tpu.memory_space<vmem>>, vector<1x4x32xbf16>
    %514 = vector.shape_cast %513 : vector<1x4x32xbf16> to vector<4x32xbf16>
    %cst_398 = arith.constant dense<0.000000e+00> : vector<4x64xf32>
    %515 = tpu.matmul %514, %508, %cst_398 {dimension_numbers = #tpu.dot_dimension_numbers<[1], [0], [0], [1], [0, 0, 1, 1], [], []>} : vector<4x32xbf16>, vector<32x64xbf16>, vector<4x64xf32> -> vector<4x64xf32>
    %c0_399 = arith.constant 0 : index
    %c64_400 = arith.constant 64 : index
    %516 = vector.load %arg17[%c0_399, %c64_400] : memref<4x256xf32, #tpu.memory_space<vmem>>, vector<4x64xf32>
    tpu.vector_store %arg17[%c0_399, %c64_400], %515 {strides = array<i32>} : memref<4x256xf32, #tpu.memory_space<vmem>>, vector<4x64xf32>,
    %c2_401 = arith.constant 2 : index
    %c0_402 = arith.constant 0 : index
    %c0_403 = arith.constant 0 : index
    %517 = vector.load %arg13[%c2_401, %c0_402, %c0_403] : memref<4x4x32xbf16, #tpu.memory_space<vmem>>, vector<1x4x32xbf16>
    %518 = vector.shape_cast %517 : vector<1x4x32xbf16> to vector<4x32xbf16>
    %cst_404 = arith.constant dense<0.000000e+00> : vector<4x64xf32>
    %519 = tpu.matmul %518, %508, %cst_404 {dimension_numbers = #tpu.dot_dimension_numbers<[1], [0], [0], [1], [0, 0, 1, 1], [], []>} : vector<4x32xbf16>, vector<32x64xbf16>, vector<4x64xf32> -> vector<4x64xf32>
    %c0_405 = arith.constant 0 : index
    %c128_406 = arith.constant 128 : index
    %520 = vector.load %arg17[%c0_405, %c128_406] : memref<4x256xf32, #tpu.memory_space<vmem>>, vector<4x64xf32>
    tpu.vector_store %arg17[%c0_405, %c128_406], %519 {strides = array<i32>} : memref<4x256xf32, #tpu.memory_space<vmem>>, vector<4x64xf32>,
    %c3_407 = arith.constant 3 : index
    %c0_408 = arith.constant 0 : index
    %c0_409 = arith.constant 0 : index
    %521 = vector.load %arg13[%c3_407, %c0_408, %c0_409] : memref<4x4x32xbf16, #tpu.memory_space<vmem>>, vector<1x4x32xbf16>
    %522 = vector.shape_cast %521 : vector<1x4x32xbf16> to vector<4x32xbf16>
    %cst_410 = arith.constant dense<0.000000e+00> : vector<4x64xf32>
    %523 = tpu.matmul %522, %508, %cst_410 {dimension_numbers = #tpu.dot_dimension_numbers<[1], [0], [0], [1], [0, 0, 1, 1], [], []>} : vector<4x32xbf16>, vector<32x64xbf16>, vector<4x64xf32> -> vector<4x64xf32>
    %c0_411 = arith.constant 0 : index
    %c192_412 = arith.constant 192 : index
    %524 = vector.load %arg17[%c0_411, %c192_412] : memref<4x256xf32, #tpu.memory_space<vmem>>, vector<4x64xf32>
    tpu.vector_store %arg17[%c0_411, %c192_412], %523 {strides = array<i32>} : memref<4x256xf32, #tpu.memory_space<vmem>>, vector<4x64xf32>,
    %c0_413 = arith.constant 0 : index
    %c0_414 = arith.constant 0 : index
    %525 = vector.load %arg17[%c0_413, %c0_414] : memref<4x256xf32, #tpu.memory_space<vmem>>, vector<4x256xf32>
    %526 = arith.truncf %525 : vector<4x256xf32> to vector<4x256xbf16>
    %cst_415 = arith.constant dense<0.000000e+00> : vector<4x256xf32>
    %527 = tpu.matmul %526, %476, %cst_415 {dimension_numbers = #tpu.dot_dimension_numbers<[1], [0], [0], [1], [0, 0, 1, 1], [], []>} : vector<4x256xbf16>, vector<256x256xbf16>, vector<4x256xf32> -> vector<4x256xf32>
    %c0_416 = arith.constant 0 : index
    %c0_417 = arith.constant 0 : index
    %528 = vector.load %arg14[%c0_416, %c0_417] : memref<4x1xf32, #tpu.memory_space<vmem>>, vector<4x1xf32>
    %529 = vector.broadcast %528 : vector<4x1xf32> to vector<4x256xf32>
    %530 = arith.addf %527, %529 : vector<4x256xf32>
    %c1_418 = arith.constant 1 : index
    %c0_419 = arith.constant 0 : index
    %c0_420 = arith.constant 0 : index
    %531 = vector.load %arg1[%c1_418, %c0_419, %c0_420] : memref<2x4x256xf32, #tpu.memory_space<vmem>>, vector<1x4x256xf32>
    %532 = vector.shape_cast %531 : vector<1x4x256xf32> to vector<4x256xf32>
    %533 = arith.addf %532, %530 : vector<4x256xf32>
    %c1_421 = arith.constant 1 : index
    %c0_422 = arith.constant 0 : index
    %c0_423 = arith.constant 0 : index
    %534 = vector.load %arg15[%c1_421, %c0_422, %c0_423] : memref<2x4x256xf32, #tpu.memory_space<vmem>>, vector<1x4x256xf32>
    %535 = vector.shape_cast %534 : vector<1x4x256xf32> to vector<4x256xf32>
    %536 = vector.shape_cast %533 : vector<4x256xf32> to vector<1x4x256xf32>
    tpu.vector_store %arg15[%c1_421, %c0_422, %c0_423], %536 {strides = array<i32>} : memref<2x4x256xf32, #tpu.memory_space<vmem>>, vector<1x4x256xf32>,
    return
  }
  func.func @transform_0(%arg0: i32) -> (i32, i32, i32) {
    %c0_i32 = arith.constant 0 : i32
    %c0_i32_0 = arith.constant 0 : i32
    %c0_i32_1 = arith.constant 0 : i32
    return %arg0, %c0_i32, %c0_i32_0 : i32, i32, i32
  }
  func.func @transform_1(%arg0: i32) -> (i32, i32) {
    %c0_i32 = arith.constant 0 : i32
    %c0_i32_0 = arith.constant 0 : i32
    %c0_i32_1 = arith.constant 0 : i32
    return %c0_i32, %c0_i32_0 : i32, i32
  }
  func.func @transform_2(%arg0: i32) -> (i32, i32, i32) {
    %c0_i32 = arith.constant 0 : i32
    %c0_i32_0 = arith.constant 0 : i32
    %c0_i32_1 = arith.constant 0 : i32
    %c0_i32_2 = arith.constant 0 : i32
    return %c0_i32, %c0_i32_0, %c0_i32_1 : i32, i32, i32
  }
  func.func @transform_3(%arg0: i32) -> (i32, i32) {
    %c0_i32 = arith.constant 0 : i32
    %c0_i32_0 = arith.constant 0 : i32
    %c0_i32_1 = arith.constant 0 : i32
    return %c0_i32, %c0_i32_0 : i32, i32
  }
  func.func @transform_4(%arg0: i32) -> (i32, i32, i32) {
    %c0_i32 = arith.constant 0 : i32
    %c0_i32_0 = arith.constant 0 : i32
    %c0_i32_1 = arith.constant 0 : i32
    %c0_i32_2 = arith.constant 0 : i32
    return %c0_i32, %c0_i32_0, %c0_i32_1 : i32, i32, i32
  }
  func.func @transform_5(%arg0: i32) -> (i32, i32, i32) {
    %c0_i32 = arith.constant 0 : i32
    %c0_i32_0 = arith.constant 0 : i32
    %c0_i32_1 = arith.constant 0 : i32
    %c0_i32_2 = arith.constant 0 : i32
    return %c0_i32, %c0_i32_0, %c0_i32_1 : i32, i32, i32
  }
  func.func @transform_6(%arg0: i32) -> (i32, i32) {
    %c0_i32 = arith.constant 0 : i32
    %c0_i32_0 = arith.constant 0 : i32
    %c0_i32_1 = arith.constant 0 : i32
    return %c0_i32, %c0_i32_0 : i32, i32
  }
  func.func @transform_7(%arg0: i32) -> (i32, i32) {
    %c0_i32 = arith.constant 0 : i32
    %c0_i32_0 = arith.constant 0 : i32
    %c0_i32_1 = arith.constant 0 : i32
    return %c0_i32, %c0_i32_0 : i32, i32
  }
  func.func @transform_8(%arg0: i32) -> (i32, i32) {
    %c0_i32 = arith.constant 0 : i32
    %c0_i32_0 = arith.constant 0 : i32
    %c0_i32_1 = arith.constant 0 : i32
    return %c0_i32, %c0_i32_0 : i32, i32
  }
  func.func @transform_9(%arg0: i32) -> (i32, i32) {
    %c0_i32 = arith.constant 0 : i32
    %c0_i32_0 = arith.constant 0 : i32
    %c0_i32_1 = arith.constant 0 : i32
    return %c0_i32, %c0_i32_0 : i32, i32
  }
  func.func @transform_10(%arg0: i32) -> (i32, i32) {
    %c0_i32 = arith.constant 0 : i32
    %c0_i32_0 = arith.constant 0 : i32
    %c0_i32_1 = arith.constant 0 : i32
    return %c0_i32, %c0_i32_0 : i32, i32
  }
  func.func @transform_11(%arg0: i32) -> (i32, i32) {
    %c0_i32 = arith.constant 0 : i32
    %c0_i32_0 = arith.constant 0 : i32
    %c0_i32_1 = arith.constant 0 : i32
    return %c0_i32, %c0_i32_0 : i32, i32
  }
  func.func @transform_12(%arg0: i32) -> (i32, i32, i32) {
    %c0_i32 = arith.constant 0 : i32
    %c0_i32_0 = arith.constant 0 : i32
    %c0_i32_1 = arith.constant 0 : i32
    %c0_i32_2 = arith.constant 0 : i32
    return %c0_i32, %c0_i32_0, %c0_i32_1 : i32, i32, i32
  }
  func.func @transform_13(%arg0: i32) -> (i32, i32) {
    %c0_i32 = arith.constant 0 : i32
    %c0_i32_0 = arith.constant 0 : i32
    %c0_i32_1 = arith.constant 0 : i32
    return %c0_i32, %c0_i32_0 : i32, i32
  }
  func.func @transform_14(%arg0: i32) -> (i32, i32, i32) {
    %c0_i32 = arith.constant 0 : i32
    %c0_i32_0 = arith.constant 0 : i32
    %c0_i32_1 = arith.constant 0 : i32
    return %arg0, %c0_i32, %c0_i32_0 : i32, i32, i32
  }
}

</mosaic_0001>

<bundles_post_ra>
// kernel: tpu_custom_call.1
= control target key start
LH: loop header
LB: loop body
LE: loop exit
PB: predicated region body
PF: predicated region fallthrough
CT: control target
= control target key end

     0   :  { %s4347_s0 = inlined_call_operand.hbm [shape: f32[4,4,256], index: 0, kind: input, shape index: {}]   ;;  %s4348_s1 = inlined_call_operand.vmem [shape: bf16[256,64], index: 1, kind: input, shape index: {}]   ;;  %s4349_s2 = inlined_call_operand.hbm [shape: f32[9,1,128], index: 2, kind: input, shape index: {}]   ;;  %s4350_s3 = inlined_call_operand.vmem [shape: bf16[256,256], index: 3, kind: input, shape index: {}]   ;;  %s4351_s4 = inlined_call_operand.vmem [shape: bf16[3,8,72], index: 4, kind: input, shape index: {}]   ;;  %s4352_s5 = inlined_call_operand.vmem [shape: f32[3,8,1], index: 5, kind: input, shape index: {}]   ;;  %s4353_s6 = inlined_call_operand.vmem [shape: bf16[8,4], index: 6, kind: input, shape index: {}]   ;;  %s4354_s7 = inlined_call_operand.vmem [shape: f32[8,1], index: 7, kind: input, shape index: {}]   ;;  %s4355_s8 = inlined_call_operand.vmem [shape: bf16[8,16], index: 8, kind: input, shape index: {}]   ;;  %s4356_s9 = inlined_call_operand.vmem [shape: f32[8,1], index: 9, kind: input, shape index: {}]   ;;  %s4357_s10 = inlined_call_operand.vmem [shape: bf16[8,24], index: 10, kind: input, shape index: {}]   ;;  %s4358_s11 = inlined_call_operand.vmem [shape: f32[8,1], index: 11, kind: input, shape index: {}]   ;;  %s4359_s12 = inlined_call_operand.vmem [shape: bf16[4,4,32], index: 12, kind: input, shape index: {}]   ;;  %s4360_s13 = inlined_call_operand.vmem [shape: f32[4,1], index: 13, kind: input, shape index: {}]   ;;  %s4361_s14 = inlined_call_operand.hbm [shape: f32[4,4,256], index: 14, kind: output, shape index: {}]  }
   0x1   :  { %4375 = sst [smem:[#allocation16_spill]] %s4347_s0 }
   0x2   :  { %4376 = sst [smem:[#allocation17_spill]] %s4350_s3 }
   0x3   :  { %4377 = sst [smem:[#allocation18_spill]] %s4359_s12 }
   0x4   :  { %4378 = sst [smem:[#allocation19_spill]] %s4360_s13 }
   0x5   :  { %4379 = sst [smem:[#allocation20_spill]] %s4361_s14 }
   0x6   :  { %19 = vsyncpa [#allocation5], 0 }
   0x7   :  { %21 = vsyncpa [#allocation5 + $0x1], 0 }
   0x8   :  { %22 = vsyncpa [#allocation8], 0 }
   0x9   :  { %23 = vsyncpa [#allocation6], 0 }
   0xa   :  { %25 = vsyncpa [#allocation6 + $0x1], 0  ;;  %s3485_s29 = smov 0   ;;  %s3487_s30 = smov 0  }
   0xb   :  { %s3489_s15 = smov 0   ;;  %s3491_s16 = smov 0  }
   0xc LB: > { %4380 = sst [smem:[#allocation13_spill]] %s3376_s29  ;;  %s3506_s17 = sadd.s32 4294967295, %s3388_s16   ;;  %s3388_s16 = sphi %s3491_s16, %s4406_s16   ;;  %s3384_s15 = sphi %s3489_s15, %s4409_s15   ;;  %s3380_s30 = sphi %s3487_s30, %s4408_s30   ;;  %s3376_s29 = sphi %s3485_s29, %s4407_s29  }
   0xd   : > { %s2642_s18 = sadd.s32 4294967294, %s3388_s16   ;;  %p51_p0 = scmp.ne.s32.totalorder %s3380_s30, %s3376_s29 }
   0xe   : > { %p4366_p1 = scmp.eq.s32.totalorder %s3506_s17, 0  ;;  %p354_p3 = scmp.eq.s32.totalorder %s2642_s18, 1 }
   0xf   : > { %p2643_p5 = scmp.ge.s32.totalorder %s3388_s16, 1  ;;  %p361_p7 = scmp.lt.s32.totalorder %s3388_s16, 3 }
  0x10   : > { %p3515_p4 = por %p4366_p1, %p51_p0  ;;  %p3520_p6 = por %p354_p3, %p51_p0 }
  0x11   : > { %p3525_p8 = pnand %p2643_p5, %p361_p7  ;;  %s3390_s22 = smov [#allocation7]  }
  0x12   : > { %s4381_s19 = scalar_select %p3515_p4, 1, 0 }
  0x13   : > { %s4382_s20 = scalar_select %p3520_p6, 1, 0 }
  0x14   : > { %s376_s23 = sshll.u32 %s3390_s22, 4  ;;  %p3125_p9 = pneg %p3525_p8  ;;  %s3529_s23 = int_to_ptr.vmem [resolvable:$true] %s376_s23 }
  0x15   : > { %4383 = sst [smem:[#allocation14_spill]] %s4382_s20  ;;  %s3541_s25 = sadd.s32 1, %s3388_s16  }
  0x16   : > { %p3536_p11 = pnand %p3125_p9, %p4366_p1  ;;  %4386 = sst [smem:[#allocation15_spill]] %s3541_s25 }
  0x17   : > { %s38_s26 = sadd.s32 1, %s3384_s15  ;;  %s35_s27 = ssub.s32 %s3388_s16, %s3541_s25 }
  0x18   : > { %s3260_s22 = scalar_lea.hbm %s4349_s2, 144  ;;  %p3262_p13 = pneg %p3536_p11 }
  0x19   : > { %p3261_p12 = scmp.ne.s32.totalorder %s4349_s2, %s3260_s22  ;;  %p3267_p5 = scmp.lt.u32.totalorder %s3260_s22, %s4349_s2 }
  0x1b   : > { %p3263_p0 = pnand %p3262_p13, %p3261_p12 }
  0x1d   : > { %p3264_p3 = pneg %p3263_p0 }
  0x1f   : > { %p3269_p7 = pnand %p3267_p5, %p3264_p3 }
  0x21   : > { %3272 = shalt.err (!%p3269_p7)
}
  0x22   : > { %s3273_s28 = scalar_lea.vmem %s3529_s23, 144  ;;  %s3280_s29 = scalar_lea.vmem %s3529_s23, 160 }
  0x23   : > { %p3274_p9 = scmp.ne.s32.totalorder %s3529_s23, %s3273_s28  ;;  %p3281_p2 = scmp.lt.s32.totalorder %s3529_s23, %s3529_s23 }
  0x24   : > { %p3282_p6 = scmp.lt.s32.totalorder %s3280_s29, %s3273_s28 }
  0x25   : > { %p3276_p10 = pnand %p3274_p9, %p3262_p13 }
  0x26   : > { %p3283_p12 = por %p3282_p6, %p3281_p2 }
  0x27   : > { %p3277_p1 = pneg %p3276_p10 }
  0x29   : > { %p3284_p0 = pnand %p3283_p12, %p3277_p1 }
  0x2b   : > { %3287 = shalt.err (!%p3284_p0)
}
  0x2c   : > { %s3391_s20 = smov 16   ;;  %s3392_s13 = smov 1  }
  0x2d   : > { %3128 = dma.hbm_to_vmem [thread:$0]  (!%p3536_p11), %s4349_s2, 144, %s3529_s23, [#allocation8], %s3391_s20, %s3391_s20, %s3392_s13  }
  0x2e   : > { %p36_p2 = scmp.eq.s32.totalorder %s35_s27, 0  ;;  %p45_p1 = scmp.ne.s32.totalorder %s3384_s15, %s3380_s30 }
  0x2f   : > { %p46_p6 = scmp.eq.s32.totalorder %s3388_s16, 0  ;;  %p3138_p10 = scmp.lt.s32.totalorder %s3388_s16, 2 }
  0x30   : > { %s3573_s22 = scalar_select %p36_p2, %s3384_s15, %s38_s26  }
  0x31   : > { %p47_p13 = por %p46_p6, %p45_p1  ;;  %p4387_p3 = scmp.eq.s32.totalorder %s3506_s17, 1 }
  0x32   : > { %s423_s29 = sand.u32 1, %s3384_s15   ;;  %s2767_s25 = sshll.u32 %s3388_s16, 8 }
  0x33   : > { %p3577_p5 = por %p4387_p3, %p45_p1  ;;  %s2646_s3 = sshll.u32 %s423_s29, 4 }
  0x34   : > { %s4389_s0 = sld [smem:[#allocation16_spill]]  ;;  %s427_s23 = scalar_lea.vmem [#allocation4], %s2646_s3 }
  0x35   : > { %s4388_s28 = scalar_select %p3577_p5, 1, 0 }
  0x36   : > { %s435_s26 = sshll.u32 %s427_s23, 4  ;;  %p3588_p11 = pnand %p3138_p10, %p47_p13  ;;  %s3592_s26 = int_to_ptr.vmem [resolvable:$true] %s435_s26 }
  0x37   : > { %s3594_s20 = scalar_lea.sflag [#allocation5], %s423_s29 }
  0x38   : > { %p3290_p9 = pneg %p3588_p11 }
  0x3a   : > { %s3586_s14 = scalar_lea.hbm %s4389_s0, %s2767_s25  ;;  %s3293_s25 = scalar_lea.hbm %s4389_s0, 512 }
  0x3b   : > { %s3288_s13 = scalar_lea.hbm %s3586_s14, 256  ;;  %p3294_p2 = scmp.lt.u32.totalorder %s3586_s14, %s4389_s0 }
  0x3c   : > { %p3289_p7 = scmp.ne.s32.totalorder %s3586_s14, %s3288_s13  ;;  %p3295_p1 = scmp.lt.u32.totalorder %s3293_s25, %s3288_s13 }
  0x3d   : > { %p3297_p10 = scmp.lt.u32.totalorder %s3288_s13, %s3586_s14 }
  0x3e   : > { %p3291_p12 = pnand %p3290_p9, %p3289_p7  ;;  %p3296_p6 = por %p3295_p1, %p3294_p2 }
  0x40   : > { %p3292_p0 = pneg %p3291_p12  ;;  %p3298_p13 = por %p3297_p10, %p3296_p6 }
  0x42   : > { %p3299_p3 = pnand %p3298_p13, %p3292_p0 }
  0x44   : > { %3302 = shalt.err (!%p3299_p3)
}
  0x45   : > { %s3303_s29 = scalar_lea.vmem %s3592_s26, 256  ;;  %s3393_s23 = smov [#allocation4]  }
  0x46   : > { %p3304_p7 = scmp.ne.s32.totalorder %s3592_s26, %s3303_s29  ;;  %s3308_s3 = sshll.u32 %s3393_s23, 4  ;;  %s3309_s3 = int_to_ptr.vmem [resolvable:$false] %s3308_s3 }
  0x47   : > { %s3310_s12 = scalar_lea.vmem %s3309_s3, 512  ;;  %p3311_p4 = scmp.lt.s32.totalorder %s3592_s26, %s3309_s3 }
  0x48   : > { %p3306_p12 = pnand %p3304_p7, %p3290_p9  ;;  %p3312_p2 = scmp.lt.s32.totalorder %s3310_s12, %s3303_s29 }
  0x4a   : > { %p3307_p5 = pneg %p3306_p12  ;;  %p3313_p1 = por %p3312_p2, %p3311_p4 }
  0x4c   : > { %p3314_p6 = pnand %p3313_p1, %p3307_p5 }
  0x4e   : > { %3317 = shalt.err (!%p3314_p6)
}
  0x4f   : > { %s3394_s13 = smov 128   ;;  %s3395_s25 = smov 8  }
  0x50   : > { %3132 = dma.hbm_to_vmem [thread:$0]  (!%p3588_p11), %s3586_s14, 256, %s3592_s26, %s3594_s20, %s3394_s13, %s3394_s13, %s3395_s25  }
  0x51   : > { %447 = sbr.rel (%p3525_p8) target bundleno = 5279 (0x149f), region = 76  ;;  %s3625_s18 = sand.u32 (!%p3525_p8), 1, %s3380_s30  }
  0x52   : > { %s4374_s24 = sshll.u32 (!%p3525_p8), %s3625_s18, 4  ;;  %s450_s29 = scalar_lea.sflag (!%p3525_p8), [#allocation5], %s3625_s18 }
  0x53   : > { %s3631_s23 = scalar_lea.vmem (!%p3525_p8), [#allocation4], %s4374_s24  ;;  %p4391_p4 = scmp.ne.s32.totalorder (!%p3525_p8), %s4381_s19, 0 }
  0x58   : > { %3363 = dma.done.wait (%p4391_p4), %s450_s29, 256  }
  0x59   : > { %3365 = vsyncadd (%p4391_p4), %s450_s29, 4294967040  ;;  %p4392_p5 = scmp.eq.s32.totalorder %s3506_s17, 0 }
  0x5b   : > { %3367 = dma.done.wait (%p4392_p5), [#allocation8], 144   ;;  %p4393_p8 = pmov %p4392_p5 }
  0x5c   : > { %v3644_v0 = vld [vmem:[%s4348_s1 + $0x40] sm:$0xff]   ;;  %v3655_v2 = vld [vmem:[%s4348_s1 + $0x48] sm:$0xff]   ;;  %v3197_v4 = vld [vmem:[%s4348_s1 + $0x50] sm:$0xff]   ;;  %v3396_v20 = vmov 0.0   ;;  %vm3397_vm0 = vmmov 0   ;;  %v3398_v22 = vmov 0  }
  0x5d   : > { %3369 = vsyncadd (%p4393_p8), [#allocation8], 4294967152  ;;  %v3649_v1 = vld [vmem:[%s4348_s1] sm:$0xff]   ;;  %2770 = vmatprep.subr.bf16.mxu0 %v3644_v0  ;;  %v3661_v3 = vld [vmem:[%s4348_s1 + $0x8] sm:$0xff]   ;;  %2901 = vmatprep.subr.bf16.mxu1 %v3396_v20  ;;  %vm691_vm1 = vcmask 1041408   ;;  %vm687_vm2 = vcmask 31744  }
  0x5e   : > { %2771 = vmatpush3.bf16.msra.mxu0 %v3649_v1  ;;  %v3198_v5 = vld [vmem:[%s4348_s1 + $0x10] sm:$0xff]   ;;  %v3199_v6 = vld [vmem:[%s4348_s1 + $0x58] sm:$0xff]   ;;  %v3201_v8 = vld [vmem:[%s4348_s1 + $0x60] sm:$0xff]   ;;  %2903 = vmatprep.mubr.msk.bf16.mxu1 %vm3397_vm0, %v3396_v20  ;;  %vm735_vm3 = vcmask 523264   ;;  %s3399_s20 = smov 64   ;;  %vm842_vm4 = vcmask 1048064  }
  0x5f   : > { %2772 = vmatprep.subr.bf16.mxu0 %v3655_v2  ;;  %v3200_v7 = vld [vmem:[%s4348_s1 + $0x18] sm:$0xff]   ;;  %v3202_v9 = vld [vmem:[%s4348_s1 + $0x20] sm:$0xff]   ;;  %v3203_v10 = vld [vmem:[%s4348_s1 + $0x68] sm:$0xff]   ;;  %3191 = vset.pattern.permute.xlu0 %v3398_v22  ;;  %s4373_s3 = smov 8   ;;  %s3401_s12 = smov 9   ;;  %vm948_vm5 = vcmask 1043456  }
  0x60   : > { %v537_v11 = vld [vmem:[%s3631_s23] sm:$0xff]  ;;  %v3205_v14 = vld [vmem:[%s4348_s1 + $0x70] sm:$0xff]   ;;  %v786_v21 = vld [vmem:[%s4354_s7] sm:$0xff]  ;;  %3192 = vset.pattern.permute.xlu1 %v3398_v22  ;;  %s3402_s13 = smov 1   ;;  %s3403_s25 = smov 7   ;;  %vm944_vm6 = vcmask 588800  }
  0x61   : > { %v3204_v12 = vld [vmem:[%s4348_s1 + $0x28] sm:$0xff]   ;;  %v539_v13 = vcombine.high %v537_v11, %v537_v11  ;;  %v3206_v16 = vld [vmem:[%s4348_s1 + $0x30] sm:$0xff]   ;;  %v3207_v17 = vld [vmem:[%s4348_s1 + $0x78] sm:$0xff]   ;;  %v541_v19 = vpack.c.bf16 %v537_v11, %v537_v11  ;;  %789 = vperm.xlu0 %3191, %v786_v21   ;;  %s3404_s29 = smov 121   ;;  %s3405_s21 = smov 127   ;;  %vm1150_vm7 = vcmask 130048  }
  0x62   : > { %2773 = vmatpush3.bf16.msra.mxu0 %v3661_v3  ;;  %v3208_v18 = vld [vmem:[%s4348_s1 + $0x38] sm:$0xff]   ;;  %v2671_v24 = vld [vmem:[%s3631_s23 + $0x8] sm:$0xff]  ;;  %s3406_s14 = smov 119   ;;  %s3407_s26 = smov 120   ;;  %v3754_v58 = vld [vmem:[#allocation7 + $0x1] ss:$0 sm:$0xff] }
  0x63   : > { %2774 = vmatprep.subr.bf16.mxu0 %v3197_v4  ;;  %v542_v15 = vpack.c.bf16 %v539_v13, %v539_v13  ;;  %v740_v29 = vcombine.high %v2671_v24, %v2671_v24  ;;  %v679_v32 = vld [vmem:[%s4353_s6] sm:$0xf]  ;;  %v742_v34 = vpack.c.bf16 %v2671_v24, %v2671_v24  ;;  %v3756_v59 = vld [vmem:[#allocation7] ss:$0 sm:$0xff]  ;;  %v3772_v13 = vld [vmem:[#allocation7 + $0x8] ss:$0 sm:$0xff] }
  0x64   : > { %v784_v49 = vld [vmem:[%s4353_s6] sm:$0xf]  ;;  %vm1494_vm8 = vcmask 195584   ;;  %vm1868_vm9 = vcmask 261120   ;;  %vm1912_vm10 = vcmask 519168   ;;  %vm1963_vm11 = vcmask 1043968  }
  0x65   : > { %671 = vmatprep.mubr.bf16.mxu0 %v542_v15  ;;  %684 = vperm.xlu0 %3191, %v786_v21   ;;  %v743_v33 = vpack.c.bf16 %v740_v29, %v740_v29  ;;  %v846_v57 = vld [vmem:[%s4352_s5] sm:$0xff]  ;;  %s2769_s19 = sshll.u32 %s3506_s17, 8  ;;  %s4399_s24 = sld [smem:[#allocation20_spill]] }
  0x66   : > { %2775 = vmatpush3.bf16.msra.mxu0 %v3198_v5  ;;  %p4400_p9 = scmp.ne.s32.totalorder %s4388_s28, 0  ;;  %s3408_s17 = smov [#allocation9]  }
  0x67   : > { %2776 = vmatprep.subr.bf16.mxu0 %v3199_v6 }
  0x6a   : > { %2777 = vmatpush3.bf16.msra.mxu0 %v3200_v7 }
  0x6b   : > { %2778 = vmatprep.subr.bf16.mxu0 %v3201_v8 }
  0x6e   : > { %2779 = vmatpush3.bf16.msra.mxu0 %v3202_v9 }
  0x6f   : > { %2780 = vmatprep.subr.bf16.mxu0 %v3203_v10 }
  0x72   : > { %2781 = vmatpush3.bf16.msra.mxu0 %v3204_v12 }
  0x73   : > { %2782 = vmatprep.subr.bf16.mxu0 %v3205_v14 }
  0x76   : > { %2783 = vmatpush3.bf16.msra.mxu0 %v3206_v16 }
  0x77   : > { %2784 = vmatprep.subr.bf16.mxu0 %v3207_v17 }
  0x7a   : > { %2785 = vmatpush3.bf16.msra.mxu0 %v3208_v18 }
  0x7b   : > { %2907 = vmatprep.subr.bf16.mxu0 %v3396_v20 }
  0x7d   : > { %672 = vmatmul.mubr.bf16.vlgmr.msra.gmra.mrb[0].mxu0 %v541_v19 }
  0x7e   : > { %2909 = vmatprep.mubr.msk.bf16.mxu0 %vm3397_vm0, %v3396_v20 }
  0xe0   : > { %v790_v35 = vpop.permute.xlu0 %789 }
  0xe4   : > { %v685_v36 = vpop.permute.xlu0 %684 }
 0x150   : > { %v2786_v23 = vpop.f32.mrb[0].mxu0 }
 0x151   : > { %v2787_v25 = vpop.f32.mrb[1].mxu0 }
 0x152   : > { %v2788_v26 = vadd.f32 %v2787_v25, %v2786_v23  ;;  %v2789_v27 = vpop.f32.mrb[2].mxu0  ;;  %v3787_v25 = vld [vmem:[%s4351_s4] sm:$0xf] }
 0x153   : > { %v2790_v28 = vpop.f32.mrb[3].mxu0 }
 0x154   : > { %v680_v30 = vpack.c.bf16 %v2788_v26, %v2788_v26 }
 0x156   : > { %v693_v31 = vsel %vm691_vm1, %v680_v30, 0 }
 0x157   : > { %2902 = vmatpush3.bf16.msra.mxu1 %v693_v31 }
 0x158   : > { %2794 = vmatprep.subr.bf16.mxu1 %v3644_v0  ;;  %v3760_v0 = vld [vmem:[#allocation7 + $0x3] ss:$0 sm:$0xff] }
 0x15a   : > { %2904 = vmatmul.mubr.msk.bf16.vlgmr.msra.gmra.mrb[0].mxu1 %vm687_vm2, %v679_v32 }
 0x15b   : > { %2795 = vmatpush3.bf16.msra.mxu1 %v3649_v1  ;;  %776 = vmatprep.mubr.bf16.mxu1 %v743_v33  ;;  %v3762_v1 = vld [vmem:[#allocation7 + $0x2] ss:$0 sm:$0xff] }
 0x15c   : > { %2796 = vmatprep.subr.bf16.mxu1 %v3655_v2 }
 0x15f   : > { %2797 = vmatpush3.bf16.msra.mxu1 %v3661_v3 }
 0x160   : > { %2798 = vmatprep.subr.bf16.mxu1 %v3197_v4 }
 0x163   : > { %2799 = vmatpush3.bf16.msra.mxu1 %v3198_v5 }
 0x164   : > { %2800 = vmatprep.subr.bf16.mxu1 %v3199_v6 }
 0x167   : > { %2801 = vmatpush3.bf16.msra.mxu1 %v3200_v7  ;;  %v3767_v7 = vld [vmem:[#allocation7 + $0x5] ss:$0 sm:$0xff] }
 0x168   : > { %2802 = vmatprep.subr.bf16.mxu1 %v3201_v8 }
 0x16b   : > { %2803 = vmatpush3.bf16.msra.mxu1 %v3202_v9 }
 0x16c   : > { %2804 = vmatprep.subr.bf16.mxu1 %v3203_v10 }
 0x16f   : > { %2805 = vmatpush3.bf16.msra.mxu1 %v3204_v12  ;;  %v3770_v12 = vld [vmem:[#allocation7 + $0x6] ss:$0 sm:$0xff] }
 0x170   : > { %2806 = vmatprep.subr.bf16.mxu1 %v3205_v14  ;;  %v3775_v14 = vld [vmem:[#allocation7 + $0x7] ss:$0 sm:$0xff] }
 0x173   : > { %2807 = vmatpush3.bf16.msra.mxu1 %v3206_v16 }
 0x174   : > { %2808 = vmatprep.subr.bf16.mxu1 %v3207_v17 }
 0x177   : > { %2809 = vmatpush3.bf16.msra.mxu1 %v3208_v18 }
 0x178   : > { %2941 = vmatprep.subr.bf16.mxu1 %v3396_v20 }
 0x17a   : > { %777 = vmatmul.mubr.bf16.vlgmr.msra.gmra.mrb[4].mxu1 %v742_v34 }
 0x17b   : > { %2951 = vmatprep.mubr.msk.bf16.mxu1 %vm3397_vm0, %v3396_v20 }
 0x22d   : > { %v729_v37 = vpop.f32.mrb[0].mxu1 }
 0x22e   : > { %v730_v38 = vadd.f32 %v729_v37, %v685_v36  ;;  %v2905_v39 = vpop.f32.mrb[1].mxu1 }
 0x22f   : > { %v732_v40 = vpop.f32.mrb[2].mxu1 }
 0x230   : > { %736 = vst.msk [vmem:[#allocation2] sm:$0xff] %vm735_vm3, %v730_v38  ;;  %v2906_v41 = vpop.f32.mrb[3].mxu1 }
 0x24d   : > { %v2810_v42 = vpop.f32.mrb[4].mxu1 }
 0x24e   : > { %v2811_v43 = vpop.f32.mrb[5].mxu1 }
 0x24f   : > { %v2812_v44 = vadd.f32 %v2811_v43, %v2810_v42  ;;  %v2813_v45 = vpop.f32.mrb[6].mxu1 }
 0x250   : > { %v2814_v46 = vpop.f32.mrb[7].mxu1 }
 0x251   : > { %v785_v47 = vpack.c.bf16 %v2812_v44, %v2812_v44 }
 0x253   : > { %v796_v48 = vsel %vm691_vm1, %v785_v47, 0 }
 0x254   : > { %2908 = vmatpush3.bf16.msra.mxu0 %v796_v48 }
 0x255   : > { %2913 = vmatprep.subr.bf16.mxu0 %v3396_v20 }
 0x257   : > { %2910 = vmatmul.mubr.msk.bf16.vlgmr.msra.gmra.mrb[4].mxu0 %vm687_vm2, %v784_v49 }
 0x258   : > { %2923 = vmatprep.mubr.msk.bf16.mxu0 %vm3397_vm0, %v3396_v20 }
 0x32a   : > { %v832_v50 = vpop.f32.mrb[4].mxu0 }
 0x32b   : > { %v833_v51 = vadd.f32 %v832_v50, %v790_v35  ;;  %v2911_v52 = vpop.f32.mrb[5].mxu0 }
 0x32c   : > { %v835_v53 = vpop.f32.mrb[6].mxu0 }
 0x32d   : > { %839 = vrot.lane.b32.xlu1 %v833_v51, %s3399_s20  ;;  %v2912_v54 = vpop.f32.mrb[7].mxu0 }
 0x39f   : > { %v840_v55 = vpop.permute.xlu1 %839 }
 0x3a0   : > { %843 = vst.msk [vmem:[#allocation2] sm:$0xff] %vm842_vm4, %v840_v55 }
 0x3a7   : > { %v3733_v56 = vld [vmem:[#allocation2] sm:$0xff] }
 0x3a8   : > { %857 = vrot.lane.b32.xlu0 %v3733_v56, %s4373_s3  ;;  %847 = vrot.lane.b32.xlu1 %v3733_v56, %s3401_s12 }
 0x3ac   : > { %879 = vrot.lane.b32.xlu0 %v3733_v56, %s3402_s13  ;;  %868 = vrot.lane.b32.xlu1 %v3733_v56, %s3403_s25 }
 0x3b0   : > { %901 = vrot.lane.b32.xlu0 %v3733_v56, %s3404_s29  ;;  %890 = vrot.lane.b32.xlu1 %v3733_v56, %s3405_s21 }
 0x3b4   : > { %923 = vrot.lane.b32.xlu0 %v3733_v56, %s3406_s14  ;;  %912 = vrot.lane.b32.xlu1 %v3733_v56, %s3407_s26 }
 0x3b8   : > { %941 = vperm.xlu1 %3192, %v846_v57  }
 0x41a   : > { %v858_v60 = vpop.permute.xlu0 %857  ;;  %v848_v61 = vpop.permute.xlu1 %847 }
 0x41b   : > { %v867_v62 = vmul.f32 %v3754_v58, %v858_v60  ;;  %v856_v63 = vmul.f32 %v3756_v59, %v848_v61 }
 0x41d   : > { %v934_v2 = vpack.c.bf16 %v867_v62, %v856_v63 }
 0x41e   : > { %v880_v3 = vpop.permute.xlu0 %879  ;;  %v869_v4 = vpop.permute.xlu1 %868 }
 0x41f   : > { %v889_v5 = vmul.f32 %v3760_v0, %v880_v3  ;;  %v878_v6 = vmul.f32 %v3762_v1, %v869_v4  ;;  %2914 = vmatpush3.bf16.msra.mxu0 %v934_v2  ;;  %v1144_v2 = vld [vmem:[%s4356_s9] sm:$0xff] }
 0x420   : > { %2915 = vmatprep.subr.bf16.mxu0 %v3396_v20 }
 0x421   : > { %v935_v8 = vpack.c.bf16 %v889_v5, %v878_v6 }
 0x422   : > { %v902_v9 = vpop.permute.xlu0 %901  ;;  %v891_v10 = vpop.permute.xlu1 %890 }
 0x423   : > { %v900_v11 = vmul.f32 %v3767_v7, %v891_v10  ;;  %2916 = vmatpush3.bf16.msra.mxu0 %v935_v8  ;;  %v911_v18 = vmul.f32 %v3770_v12, %v902_v9 }
 0x424   : > { %2917 = vmatprep.subr.bf16.mxu0 %v3396_v20 }
 0x425   : > { %v936_v15 = vpack.c.bf16 %v900_v11, %v3733_v56 }
 0x426   : > { %v924_v16 = vpop.permute.xlu0 %923  ;;  %v913_v17 = vpop.permute.xlu1 %912 }
 0x427   : > { %v933_v19 = vmul.f32 %v3772_v13, %v924_v16  ;;  %v922_v21 = vmul.f32 %v3775_v14, %v913_v17  ;;  %2918 = vmatpush3.bf16.msra.mxu0 %v936_v15 }
 0x428   : > { %2919 = vmatprep.subr.bf16.mxu0 %v3396_v20 }
 0x429   : > { %v937_v22 = vpack.c.bf16 %v922_v21, %v911_v18  ;;  %v938_v23 = vpack.c.bf16 %v933_v19, %v933_v19 }
 0x42b   : > { %2920 = vmatpush3.bf16.msra.mxu0 %v937_v22  ;;  %v950_v24 = vsel %vm948_vm5, %v938_v23, 0 }
 0x42c   : > { %2921 = vmatprep.subr.bf16.mxu0 %v3396_v20 }
 0x42f   : > { %2922 = vmatpush3.bf16.msra.mxu0 %v950_v24 }
 0x430   : > { %2927 = vmatprep.subr.bf16.mxu0 %v3396_v20 }
 0x432   : > { %2924 = vmatmul.mubr.msk.bf16.vlgmr.msra.gmra.mrb[8].mxu0 %vm944_vm6, %v3787_v25 }
 0x433   : > { %2937 = vmatprep.mubr.msk.bf16.mxu0 %vm3397_vm0, %v3396_v20 }
 0x437   : > { %v3794_v26 = vpop.permute.xlu1 %941 }
 0x505   : > { %v986_v27 = vpop.f32.mrb[8].mxu0 }
 0x506   : > { %v987_v28 = vadd.f32 %v986_v27, %v3794_v26  ;;  %v2925_v29 = vpop.f32.mrb[9].mxu0 }
 0x507   : > { %v989_v30 = vpop.f32.mrb[10].mxu0 }
 0x508   : > { %v992_v31 = vmax.f32 %v987_v28, 0.0  ;;  %v2926_v32 = vpop.f32.mrb[11].mxu0 }
 0x50a   : > { %996 = vrot.lane.b32.xlu1 %v992_v31, %s4373_s3  ;;  %993 = vrot.lane.b32.xlu0 %v992_v31, %s3401_s12 }
 0x50e   : > { %1002 = vrot.lane.b32.xlu1 %v992_v31, %s3402_s13  ;;  %999 = vrot.lane.b32.xlu0 %v992_v31, %s3403_s25 }
 0x512   : > { %1008 = vrot.lane.b32.xlu1 %v992_v31, %s3404_s29  ;;  %1005 = vrot.lane.b32.xlu0 %v992_v31, %s3405_s21 }
 0x516   : > { %1014 = vrot.lane.b32.xlu1 %v992_v31, %s3406_s14  ;;  %1011 = vrot.lane.b32.xlu0 %v992_v31, %s3407_s26 }
 0x57c   : > { %v997_v33 = vpop.permute.xlu1 %996  ;;  %v994_v34 = vpop.permute.xlu0 %993 }
 0x57d   : > { %v998_v35 = vmul.f32 %v3754_v58, %v997_v33  ;;  %v995_v36 = vmul.f32 %v3756_v59, %v994_v34 }
 0x57f   : > { %v1017_v37 = vpack.c.bf16 %v998_v35, %v995_v36 }
 0x580   : > { %v1003_v38 = vpop.permute.xlu1 %1002  ;;  %v1000_v39 = vpop.permute.xlu0 %999 }
 0x581   : > { %v1004_v40 = vmul.f32 %v3760_v0, %v1003_v38  ;;  %v1001_v41 = vmul.f32 %v3762_v1, %v1000_v39  ;;  %2928 = vmatpush3.bf16.msra.mxu0 %v1017_v37  ;;  %v1140_v39 = vld [vmem:[%s4355_s8] sm:$0xf] }
 0x582   : > { %2929 = vmatprep.subr.bf16.mxu0 %v3396_v20 }
 0x583   : > { %v1018_v42 = vpack.c.bf16 %v1004_v40, %v1001_v41 }
 0x584   : > { %v1009_v43 = vpop.permute.xlu1 %1008  ;;  %v1006_v44 = vpop.permute.xlu0 %1005 }
 0x585   : > { %v1007_v45 = vmul.f32 %v3767_v7, %v1006_v44  ;;  %2930 = vmatpush3.bf16.msra.mxu0 %v1018_v42  ;;  %v1010_v49 = vmul.f32 %v3770_v12, %v1009_v43  ;;  %v2686_v43 = vld [vmem:[%s4352_s5 + $0x8] sm:$0xff] }
 0x586   : > { %2931 = vmatprep.subr.bf16.mxu0 %v3396_v20 }
 0x587   : > { %v1019_v46 = vpack.c.bf16 %v1007_v45, %v992_v31 }
 0x588   : > { %v1015_v47 = vpop.permute.xlu1 %1014  ;;  %v1012_v48 = vpop.permute.xlu0 %1011 }
 0x589   : > { %v1016_v50 = vmul.f32 %v3772_v13, %v1015_v47  ;;  %v1013_v51 = vmul.f32 %v3775_v14, %v1012_v48  ;;  %2932 = vmatpush3.bf16.msra.mxu0 %v1019_v46 }
 0x58a   : > { %2933 = vmatprep.subr.bf16.mxu0 %v3396_v20 }
 0x58b   : > { %v1020_v52 = vpack.c.bf16 %v1013_v51, %v1010_v49  ;;  %v1021_v53 = vpack.c.bf16 %v1016_v50, %v1016_v50 }
 0x58d   : > { %2934 = vmatpush3.bf16.msra.mxu0 %v1020_v52  ;;  %v1023_v54 = vsel %vm948_vm5, %v1021_v53, 0 }
 0x58e   : > { %2935 = vmatprep.subr.bf16.mxu0 %v3396_v20 }
 0x591   : > { %2936 = vmatpush3.bf16.msra.mxu0 %v1023_v54 }
 0x592   : > { %2955 = vmatprep.subr.bf16.mxu0 %v3396_v20 }
 0x594   : > { %2938 = vmatmul.mubr.msk.bf16.vlgmr.msra.gmra.mrb[12].mxu0 %vm944_vm6, %v3787_v25 }
 0x595   : > { %2957 = vmatprep.mubr.msk.bf16.mxu0 %vm3397_vm0, %v3396_v20 }
 0x667   : > { %v1059_v55 = vpop.f32.mrb[12].mxu0 }
 0x668   : > { %v1060_v57 = vadd.f32 %v1059_v55, %v3794_v26  ;;  %v2939_v60 = vpop.f32.mrb[13].mxu0 }
 0x669   : > { %v1062_v61 = vpop.f32.mrb[14].mxu0 }
 0x66a   : > { %v1065_v62 = vmax.f32 %v1060_v57, 0.0  ;;  %v2940_v63 = vpop.f32.mrb[15].mxu0 }
 0x66c   : > { %1069 = vrot.lane.b32.xlu1 %v1065_v62, %s4373_s3  ;;  %1066 = vrot.lane.b32.xlu0 %v1065_v62, %s3401_s12 }
 0x670   : > { %1075 = vrot.lane.b32.xlu1 %v1065_v62, %s3402_s13  ;;  %1072 = vrot.lane.b32.xlu0 %v1065_v62, %s3403_s25 }
 0x674   : > { %1081 = vrot.lane.b32.xlu1 %v1065_v62, %s3404_s29  ;;  %1078 = vrot.lane.b32.xlu0 %v1065_v62, %s3405_s21 }
 0x678   : > { %1087 = vrot.lane.b32.xlu1 %v1065_v62, %s3406_s14  ;;  %1084 = vrot.lane.b32.xlu0 %v1065_v62, %s3407_s26 }
 0x67c   : > { %1147 = vperm.xlu0 %3191, %v1144_v2  }
 0x6de   : > { %v1070_v3 = vpop.permute.xlu1 %1069  ;;  %v1067_v4 = vpop.permute.xlu0 %1066 }
 0x6df   : > { %v1071_v5 = vmul.f32 %v3754_v58, %v1070_v3  ;;  %v1068_v6 = vmul.f32 %v3756_v59, %v1067_v4 }
 0x6e1   : > { %v1090_v8 = vpack.c.bf16 %v1071_v5, %v1068_v6 }
 0x6e2   : > { %v1076_v9 = vpop.permute.xlu1 %1075  ;;  %v1073_v10 = vpop.permute.xlu0 %1072 }
 0x6e3   : > { %v1077_v11 = vmul.f32 %v3760_v0, %v1076_v9  ;;  %v1074_v15 = vmul.f32 %v3762_v1, %v1073_v10  ;;  %2942 = vmatpush3.bf16.msra.mxu1 %v1090_v8  ;;  %v3891_v8 = vld [vmem:[%s4351_s4 + $0x4] sm:$0xf] }
 0x6e4   : > { %2943 = vmatprep.subr.bf16.mxu1 %v3396_v20 }
 0x6e5   : > { %v1091_v16 = vpack.c.bf16 %v1077_v11, %v1074_v15 }
 0x6e6   : > { %v1082_v17 = vpop.permute.xlu1 %1081  ;;  %v1079_v18 = vpop.permute.xlu0 %1078 }
 0x6e7   : > { %v1080_v19 = vmul.f32 %v3767_v7, %v1079_v18  ;;  %2944 = vmatpush3.bf16.msra.mxu1 %v1091_v16  ;;  %v1083_v24 = vmul.f32 %v3770_v12, %v1082_v17 }
 0x6e8   : > { %2945 = vmatprep.subr.bf16.mxu1 %v3396_v20 }
 0x6e9   : > { %v1092_v21 = vpack.c.bf16 %v1080_v19, %v1065_v62 }
 0x6ea   : > { %v1088_v22 = vpop.permute.xlu1 %1087  ;;  %v1085_v23 = vpop.permute.xlu0 %1084 }
 0x6eb   : > { %v1089_v27 = vmul.f32 %v3772_v13, %v1088_v22  ;;  %v1086_v28 = vmul.f32 %v3775_v14, %v1085_v23  ;;  %2946 = vmatpush3.bf16.msra.mxu1 %v1092_v21 }
 0x6ec   : > { %2947 = vmatprep.subr.bf16.mxu1 %v3396_v20 }
 0x6ed   : > { %v1093_v29 = vpack.c.bf16 %v1086_v28, %v1083_v24  ;;  %v1094_v30 = vpack.c.bf16 %v1089_v27, %v1089_v27 }
 0x6ef   : > { %2948 = vmatpush3.bf16.msra.mxu1 %v1093_v29  ;;  %v1096_v31 = vsel %vm948_vm5, %v1094_v30, 0 }
 0x6f0   : > { %2949 = vmatprep.subr.bf16.mxu1 %v3396_v20 }
 0x6f3   : > { %2950 = vmatpush3.bf16.msra.mxu1 %v1096_v31 }
 0x6f4   : > { %2975 = vmatprep.subr.bf16.mxu1 %v3396_v20 }
 0x6f6   : > { %2952 = vmatmul.mubr.msk.bf16.vlgmr.msra.gmra.mrb[8].mxu1 %vm944_vm6, %v3787_v25 }
 0x6f7   : > { %2985 = vmatprep.mubr.msk.bf16.mxu1 %vm3397_vm0, %v3396_v20 }
 0x6fb   : > { %v1148_v25 = vpop.permute.xlu0 %1147 }
 0x7c9   : > { %v1132_v32 = vpop.f32.mrb[8].mxu1 }
 0x7ca   : > { %v1133_v33 = vadd.f32 %v1132_v32, %v3794_v26  ;;  %v2953_v34 = vpop.f32.mrb[9].mxu1 }
 0x7cb   : > { %v1135_v35 = vpop.f32.mrb[10].mxu1 }
 0x7cc   : > { %v1138_v36 = vmax.f32 %v1133_v33, 0.0  ;;  %v2954_v37 = vpop.f32.mrb[11].mxu1 }
 0x7ce   : > { %v3855_v38 = vpack.c.bf16 %v1138_v36, %v3733_v56 }
 0x7d0   : > { %2956 = vmatpush3.bf16.msra.mxu0 %v3855_v38 }
 0x7d1   : > { %2961 = vmatprep.subr.bf16.mxu0 %v3396_v20 }
 0x7d3   : > { %2958 = vmatmul.mubr.msk.bf16.vlgmr.msra.gmra.mrb[16].mxu0 %vm1150_vm7, %v1140_v39 }
 0x7d4   : > { %2971 = vmatprep.mubr.msk.bf16.mxu0 %vm3397_vm0, %v3396_v20 }
 0x8a6   : > { %v1188_v26 = vpop.f32.mrb[16].mxu0 }
 0x8a7   : > { %v1189_v40 = vadd.f32 %v1188_v26, %v1148_v25  ;;  %v2959_v41 = vpop.f32.mrb[17].mxu0 }
 0x8a8   : > { %v1191_v42 = vpop.f32.mrb[18].mxu0 }
 0x8a9   : > { %1208 = vrot.lane.b32.xlu0 %v1189_v40, %s4373_s3  ;;  %1198 = vrot.lane.b32.xlu1 %v1189_v40, %s3401_s12  ;;  %v2960_v56 = vpop.f32.mrb[19].mxu0 }
 0x8ad   : > { %1228 = vrot.lane.b32.xlu0 %v1189_v40, %s3402_s13  ;;  %1218 = vrot.lane.b32.xlu1 %v1189_v40, %s3403_s25 }
 0x8b1   : > { %1248 = vrot.lane.b32.xlu0 %v1189_v40, %s3404_s29  ;;  %1238 = vrot.lane.b32.xlu1 %v1189_v40, %s3405_s21 }
 0x8b5   : > { %1268 = vrot.lane.b32.xlu0 %v1189_v40, %s3406_s14  ;;  %1258 = vrot.lane.b32.xlu1 %v1189_v40, %s3407_s26 }
 0x8b9   : > { %1285 = vperm.xlu1 %3192, %v2686_v43  }
 0x91b   : > { %v1209_v44 = vpop.permute.xlu0 %1208  ;;  %v1199_v45 = vpop.permute.xlu1 %1198 }
 0x91c   : > { %v1217_v46 = vmul.f32 %v3754_v58, %v1209_v44  ;;  %v1207_v47 = vmul.f32 %v3756_v59, %v1199_v45 }
 0x91e   : > { %v1278_v48 = vpack.c.bf16 %v1217_v46, %v1207_v47 }
 0x91f   : > { %v1229_v49 = vpop.permute.xlu0 %1228  ;;  %v1219_v50 = vpop.permute.xlu1 %1218 }
 0x920   : > { %v1237_v51 = vmul.f32 %v3760_v0, %v1229_v49  ;;  %v1227_v52 = vmul.f32 %v3762_v1, %v1219_v50  ;;  %2962 = vmatpush3.bf16.msra.mxu0 %v1278_v48  ;;  %v1488_v48 = vld [vmem:[%s4358_s11] sm:$0xff] }
 0x921   : > { %2963 = vmatprep.subr.bf16.mxu0 %v3396_v20 }
 0x922   : > { %v1279_v53 = vpack.c.bf16 %v1237_v51, %v1227_v52 }
 0x923   : > { %v1249_v54 = vpop.permute.xlu0 %1248  ;;  %v1239_v55 = vpop.permute.xlu1 %1238 }
 0x924   : > { %v1247_v57 = vmul.f32 %v3767_v7, %v1239_v55  ;;  %2964 = vmatpush3.bf16.msra.mxu0 %v1279_v53  ;;  %v1257_v63 = vmul.f32 %v3770_v12, %v1249_v54 }
 0x925   : > { %2965 = vmatprep.subr.bf16.mxu0 %v3396_v20 }
 0x926   : > { %v1280_v60 = vpack.c.bf16 %v1247_v57, %v1189_v40 }
 0x927   : > { %v1269_v61 = vpop.permute.xlu0 %1268  ;;  %v1259_v62 = vpop.permute.xlu1 %1258 }
 0x928   : > { %v1277_v2 = vmul.f32 %v3772_v13, %v1269_v61  ;;  %v1267_v3 = vmul.f32 %v3775_v14, %v1259_v62  ;;  %2966 = vmatpush3.bf16.msra.mxu0 %v1280_v60 }
 0x929   : > { %2967 = vmatprep.subr.bf16.mxu0 %v3396_v20 }
 0x92a   : > { %v1281_v4 = vpack.c.bf16 %v1267_v3, %v1257_v63  ;;  %v1282_v5 = vpack.c.bf16 %v1277_v2, %v1277_v2 }
 0x92c   : > { %2968 = vmatpush3.bf16.msra.mxu0 %v1281_v4  ;;  %v1292_v6 = vsel %vm948_vm5, %v1282_v5, 0 }
 0x92d   : > { %2969 = vmatprep.subr.bf16.mxu0 %v3396_v20 }
 0x930   : > { %2970 = vmatpush3.bf16.msra.mxu0 %v1292_v6 }
 0x931   : > { %2989 = vmatprep.subr.bf16.mxu0 %v3396_v20 }
 0x933   : > { %2972 = vmatmul.mubr.msk.bf16.vlgmr.msra.gmra.mrb[20].mxu0 %vm944_vm6, %v3891_v8 }
 0x934   : > { %2999 = vmatprep.mubr.msk.bf16.mxu0 %vm3397_vm0, %v3396_v20 }
 0x938   : > { %v3898_v9 = vpop.permute.xlu1 %1285 }
 0xa06   : > { %v1328_v10 = vpop.f32.mrb[20].mxu0 }
 0xa07   : > { %v1329_v11 = vadd.f32 %v1328_v10, %v3898_v9  ;;  %v2973_v15 = vpop.f32.mrb[21].mxu0 }
 0xa08   : > { %v1331_v16 = vpop.f32.mrb[22].mxu0 }
 0xa09   : > { %v1334_v17 = vmax.f32 %v1329_v11, 0.0  ;;  %v2974_v18 = vpop.f32.mrb[23].mxu0 }
 0xa0b   : > { %1338 = vrot.lane.b32.xlu1 %v1334_v17, %s4373_s3  ;;  %1335 = vrot.lane.b32.xlu0 %v1334_v17, %s3401_s12 }
 0xa0f   : > { %1344 = vrot.lane.b32.xlu1 %v1334_v17, %s3402_s13  ;;  %1341 = vrot.lane.b32.xlu0 %v1334_v17, %s3403_s25 }
 0xa13   : > { %1350 = vrot.lane.b32.xlu1 %v1334_v17, %s3404_s29  ;;  %1347 = vrot.lane.b32.xlu0 %v1334_v17, %s3405_s21 }
 0xa17   : > { %1356 = vrot.lane.b32.xlu1 %v1334_v17, %s3406_s14  ;;  %1353 = vrot.lane.b32.xlu0 %v1334_v17, %s3407_s26 }
 0xa7d   : > { %v1339_v19 = vpop.permute.xlu1 %1338  ;;  %v1336_v21 = vpop.permute.xlu0 %1335 }
 0xa7e   : > { %v1340_v22 = vmul.f32 %v3754_v58, %v1339_v19  ;;  %v1337_v23 = vmul.f32 %v3756_v59, %v1336_v21 }
 0xa80   : > { %v1359_v24 = vpack.c.bf16 %v1340_v22, %v1337_v23 }
 0xa81   : > { %v1345_v27 = vpop.permute.xlu1 %1344  ;;  %v1342_v28 = vpop.permute.xlu0 %1341 }
 0xa82   : > { %v1346_v29 = vmul.f32 %v3760_v0, %v1345_v27  ;;  %v1343_v30 = vmul.f32 %v3762_v1, %v1342_v28  ;;  %2976 = vmatpush3.bf16.msra.mxu1 %v1359_v24 }
 0xa83   : > { %2977 = vmatprep.subr.bf16.mxu1 %v3396_v20 }
 0xa84   : > { %v1360_v31 = vpack.c.bf16 %v1346_v29, %v1343_v30 }
 0xa85   : > { %v1351_v32 = vpop.permute.xlu1 %1350  ;;  %v1348_v33 = vpop.permute.xlu0 %1347 }
 0xa86   : > { %v1349_v34 = vmul.f32 %v3767_v7, %v1348_v33  ;;  %2978 = vmatpush3.bf16.msra.mxu1 %v1360_v31  ;;  %v1352_v39 = vmul.f32 %v3770_v12, %v1351_v32 }
 0xa87   : > { %2979 = vmatprep.subr.bf16.mxu1 %v3396_v20 }
 0xa88   : > { %v1361_v35 = vpack.c.bf16 %v1349_v34, %v1334_v17  ;;  %v2700_v34 = vld [vmem:[%s4352_s5 + $0x10] sm:$0xff] }
 0xa89   : > { %v1357_v36 = vpop.permute.xlu1 %1356  ;;  %v1354_v37 = vpop.permute.xlu0 %1353 }
 0xa8a   : > { %v1358_v25 = vmul.f32 %v3772_v13, %v1357_v36  ;;  %v1355_v26 = vmul.f32 %v3775_v14, %v1354_v37  ;;  %2980 = vmatpush3.bf16.msra.mxu1 %v1361_v35 }
 0xa8b   : > { %2981 = vmatprep.subr.bf16.mxu1 %v3396_v20 }
 0xa8c   : > { %v1362_v40 = vpack.c.bf16 %v1355_v26, %v1352_v39  ;;  %v1363_v41 = vpack.c.bf16 %v1358_v25, %v1358_v25 }
 0xa8e   : > { %2982 = vmatpush3.bf16.msra.mxu1 %v1362_v40  ;;  %v1365_v42 = vsel %vm948_vm5, %v1363_v41, 0 }
 0xa8f   : > { %2983 = vmatprep.subr.bf16.mxu1 %v3396_v20 }
 0xa92   : > { %2984 = vmatpush3.bf16.msra.mxu1 %v1365_v42 }
 0xa93   : > { %3003 = vmatprep.subr.bf16.mxu1 %v3396_v20 }
 0xa95   : > { %2986 = vmatmul.mubr.msk.bf16.vlgmr.msra.gmra.mrb[12].mxu1 %vm944_vm6, %v3891_v8 }
 0xa96   : > { %3004 = vmatpush3.bf16.msra.mxu1 %v3855_v38  ;;  %3007 = vmatprep.mubr.msk.bf16.mxu1 %vm3397_vm0, %v3396_v20 }
 0xa97   : > { %3005 = vmatprep.subr.bf16.mxu1 %v3396_v20 }
 0xb68   : > { %v1401_v56 = vpop.f32.mrb[12].mxu1 }
 0xb69   : > { %v1402_v43 = vadd.f32 %v1401_v56, %v3898_v9  ;;  %v2987_v44 = vpop.f32.mrb[13].mxu1 }
 0xb6a   : > { %v1404_v45 = vpop.f32.mrb[14].mxu1 }
 0xb6b   : > { %v1407_v46 = vmax.f32 %v1402_v43, 0.0  ;;  %v2988_v47 = vpop.f32.mrb[15].mxu1 }
 0xb6d   : > { %1411 = vrot.lane.b32.xlu1 %v1407_v46, %s4373_s3  ;;  %1408 = vrot.lane.b32.xlu0 %v1407_v46, %s3401_s12 }
 0xb71   : > { %1417 = vrot.lane.b32.xlu1 %v1407_v46, %s3402_s13  ;;  %1414 = vrot.lane.b32.xlu0 %v1407_v46, %s3403_s25 }
 0xb75   : > { %1423 = vrot.lane.b32.xlu1 %v1407_v46, %s3404_s29  ;;  %1420 = vrot.lane.b32.xlu0 %v1407_v46, %s3405_s21 }
 0xb79   : > { %1429 = vrot.lane.b32.xlu1 %v1407_v46, %s3406_s14  ;;  %1426 = vrot.lane.b32.xlu0 %v1407_v46, %s3407_s26 }
 0xb7d   : > { %1491 = vperm.xlu0 %3191, %v1488_v48  }
 0xbdf   : > { %v1412_v49 = vpop.permute.xlu1 %1411  ;;  %v1409_v50 = vpop.permute.xlu0 %1408 }
 0xbe0   : > { %v1413_v51 = vmul.f32 %v3754_v58, %v1412_v49  ;;  %v1410_v52 = vmul.f32 %v3756_v59, %v1409_v50 }
 0xbe2   : > { %v1432_v53 = vpack.c.bf16 %v1413_v51, %v1410_v52 }
 0xbe3   : > { %v1418_v54 = vpop.permute.xlu1 %1417  ;;  %v1415_v55 = vpop.permute.xlu0 %1414 }
 0xbe4   : > { %v1419_v57 = vmul.f32 %v3760_v0, %v1418_v54  ;;  %v1416_v60 = vmul.f32 %v3762_v1, %v1415_v55  ;;  %2990 = vmatpush3.bf16.msra.mxu0 %v1432_v53  ;;  %v3998_v55 = vld [vmem:[%s4351_s4 + $0x8] sm:$0xf] }
 0xbe5   : > { %2991 = vmatprep.subr.bf16.mxu0 %v3396_v20 }
 0xbe6   : > { %v1433_v61 = vpack.c.bf16 %v1419_v57, %v1416_v60 }
 0xbe7   : > { %v1424_v62 = vpop.permute.xlu1 %1423  ;;  %v1421_v63 = vpop.permute.xlu0 %1420 }
 0xbe8   : > { %v1422_v2 = vmul.f32 %v3767_v7, %v1421_v63  ;;  %2992 = vmatpush3.bf16.msra.mxu0 %v1433_v61  ;;  %v1425_v6 = vmul.f32 %v3770_v12, %v1424_v62 }
 0xbe9   : > { %2993 = vmatprep.subr.bf16.mxu0 %v3396_v20 }
 0xbea   : > { %v1434_v3 = vpack.c.bf16 %v1422_v2, %v1407_v46 }
 0xbeb   : > { %v1430_v4 = vpop.permute.xlu1 %1429  ;;  %v1427_v5 = vpop.permute.xlu0 %1426 }
 0xbec   : > { %v1431_v10 = vmul.f32 %v3772_v13, %v1430_v4  ;;  %v1428_v11 = vmul.f32 %v3775_v14, %v1427_v5  ;;  %2994 = vmatpush3.bf16.msra.mxu0 %v1434_v3 }
 0xbed   : > { %2995 = vmatprep.subr.bf16.mxu0 %v3396_v20 }
 0xbee   : > { %v1435_v15 = vpack.c.bf16 %v1428_v11, %v1425_v6  ;;  %v1436_v16 = vpack.c.bf16 %v1431_v10, %v1431_v10 }
 0xbf0   : > { %2996 = vmatpush3.bf16.msra.mxu0 %v1435_v15  ;;  %v1438_v17 = vsel %vm948_vm5, %v1436_v16, 0 }
 0xbf1   : > { %2997 = vmatprep.subr.bf16.mxu0 %v3396_v20 }
 0xbf4   : > { %2998 = vmatpush3.bf16.msra.mxu0 %v1438_v17 }
 0xbf5   : > { %3025 = vmatprep.subr.bf16.mxu0 %v3396_v20 }
 0xbf7   : > { %3000 = vmatmul.mubr.msk.bf16.vlgmr.msra.gmra.mrb[24].mxu0 %vm944_vm6, %v3891_v8  ;;  %v1482_v8 = vld [vmem:[%s4357_s10] sm:$0xf] }
 0xbf8   : > { %3035 = vmatprep.mubr.msk.bf16.mxu0 %vm3397_vm0, %v3396_v20 }
 0xcca   : > { %v1474_v18 = vpop.f32.mrb[24].mxu0 }
 0xccb   : > { %v1475_v19 = vadd.f32 %v1474_v18, %v3898_v9  ;;  %v3001_v21 = vpop.f32.mrb[25].mxu0  ;;  %v1492_v9 = vpop.permute.xlu0 %1491 }
 0xccc   : > { %v1477_v22 = vpop.f32.mrb[26].mxu0 }
 0xccd   : > { %v3960_v23 = vmax.f32 %v1475_v19, 0.0  ;;  %v3002_v24 = vpop.f32.mrb[27].mxu0 }
 0xccf   : > { %v1487_v27 = vpack.c.bf16 %v3960_v23, %v3960_v23 }
 0xcd1   : > { %v1499_v28 = vsel %vm948_vm5, %v1487_v27, 0 }
 0xcd2   : > { %3006 = vmatpush3.bf16.msra.mxu1 %v1499_v28 }
 0xcd3   : > { %3011 = vmatprep.subr.bf16.mxu1 %v3396_v20 }
 0xcd5   : > { %3008 = vmatmul.mubr.msk.bf16.vlgmr.msra.gmra.mrb[16].mxu1 %vm1494_vm8, %v1482_v8 }
 0xcd6   : > { %3021 = vmatprep.mubr.msk.bf16.mxu1 %vm3397_vm0, %v3396_v20 }
 0xda8   : > { %v1535_v29 = vpop.f32.mrb[16].mxu1 }
 0xda9   : > { %v1536_v30 = vadd.f32 %v1535_v29, %v1492_v9  ;;  %v3009_v31 = vpop.f32.mrb[17].mxu1 }
 0xdaa   : > { %v1538_v32 = vpop.f32.mrb[18].mxu1 }
 0xdab   : > { %1555 = vrot.lane.b32.xlu0 %v1536_v30, %s4373_s3  ;;  %1545 = vrot.lane.b32.xlu1 %v1536_v30, %s3401_s12  ;;  %v3010_v33 = vpop.f32.mrb[19].mxu1 }
 0xdaf   : > { %1575 = vrot.lane.b32.xlu0 %v1536_v30, %s3402_s13  ;;  %1565 = vrot.lane.b32.xlu1 %v1536_v30, %s3403_s25 }
 0xdb3   : > { %1595 = vrot.lane.b32.xlu0 %v1536_v30, %s3404_s29  ;;  %1585 = vrot.lane.b32.xlu1 %v1536_v30, %s3405_s21 }
 0xdb7   : > { %1615 = vrot.lane.b32.xlu0 %v1536_v30, %s3406_s14  ;;  %1605 = vrot.lane.b32.xlu1 %v1536_v30, %s3407_s26 }
 0xdbb   : > { %1632 = vperm.xlu1 %3192, %v2700_v34  }
 0xe1d   : > { %v1556_v35 = vpop.permute.xlu0 %1555  ;;  %v1546_v36 = vpop.permute.xlu1 %1545 }
 0xe1e   : > { %v1564_v37 = vmul.f32 %v3754_v58, %v1556_v35  ;;  %v1554_v39 = vmul.f32 %v3756_v59, %v1546_v36 }
 0xe20   : > { %v1625_v25 = vpack.c.bf16 %v1564_v37, %v1554_v39 }
 0xe21   : > { %v1576_v26 = vpop.permute.xlu0 %1575  ;;  %v1566_v40 = vpop.permute.xlu1 %1565 }
 0xe22   : > { %v1584_v41 = vmul.f32 %v3760_v0, %v1576_v26  ;;  %v1574_v42 = vmul.f32 %v3762_v1, %v1566_v40  ;;  %3012 = vmatpush3.bf16.msra.mxu1 %v1625_v25 }
 0xe23   : > { %3013 = vmatprep.subr.bf16.mxu1 %v3396_v20 }
 0xe24   : > { %v1626_v56 = vpack.c.bf16 %v1584_v41, %v1574_v42 }
 0xe25   : > { %v1596_v43 = vpop.permute.xlu0 %1595  ;;  %v1586_v44 = vpop.permute.xlu1 %1585 }
 0xe26   : > { %v1594_v45 = vmul.f32 %v3767_v7, %v1586_v44  ;;  %3014 = vmatpush3.bf16.msra.mxu1 %v1626_v56  ;;  %v1604_v49 = vmul.f32 %v3770_v12, %v1596_v43 }
 0xe27   : > { %3015 = vmatprep.subr.bf16.mxu1 %v3396_v20 }
 0xe28   : > { %v1627_v46 = vpack.c.bf16 %v1594_v45, %v1536_v30 }
 0xe29   : > { %v1616_v47 = vpop.permute.xlu0 %1615  ;;  %v1606_v48 = vpop.permute.xlu1 %1605 }
 0xe2a   : > { %v1624_v50 = vmul.f32 %v3772_v13, %v1616_v47  ;;  %v1614_v51 = vmul.f32 %v3775_v14, %v1606_v48  ;;  %3016 = vmatpush3.bf16.msra.mxu1 %v1627_v46 }
 0xe2b   : > { %3017 = vmatprep.subr.bf16.mxu1 %v3396_v20 }
 0xe2c   : > { %v1628_v52 = vpack.c.bf16 %v1614_v51, %v1604_v49  ;;  %v1629_v53 = vpack.c.bf16 %v1624_v50, %v1624_v50 }
 0xe2e   : > { %3018 = vmatpush3.bf16.msra.mxu1 %v1628_v52  ;;  %v1639_v54 = vsel %vm948_vm5, %v1629_v53, 0 }
 0xe2f   : > { %3019 = vmatprep.subr.bf16.mxu1 %v3396_v20 }
 0xe32   : > { %3020 = vmatpush3.bf16.msra.mxu1 %v1639_v54 }
 0xe33   : > { %3039 = vmatprep.subr.bf16.mxu1 %v3396_v20 }
 0xe35   : > { %3022 = vmatmul.mubr.msk.bf16.vlgmr.msra.gmra.mrb[20].mxu1 %vm944_vm6, %v3998_v55 }
 0xe36   : > { %3049 = vmatprep.mubr.msk.bf16.mxu1 %vm3397_vm0, %v3396_v20 }
 0xe3a   : > { %v4005_v57 = vpop.permute.xlu1 %1632 }
 0xf08   : > { %v1675_v60 = vpop.f32.mrb[20].mxu1 }
 0xf09   : > { %v1676_v61 = vadd.f32 %v1675_v60, %v4005_v57  ;;  %v3023_v62 = vpop.f32.mrb[21].mxu1 }
 0xf0a   : > { %v1678_v63 = vpop.f32.mrb[22].mxu1 }
 0xf0b   : > { %v1681_v2 = vmax.f32 %v1676_v61, 0.0  ;;  %v3024_v3 = vpop.f32.mrb[23].mxu1 }
 0xf0d   : > { %1685 = vrot.lane.b32.xlu1 %v1681_v2, %s4373_s3  ;;  %1682 = vrot.lane.b32.xlu0 %v1681_v2, %s3401_s12 }
 0xf11   : > { %1691 = vrot.lane.b32.xlu1 %v1681_v2, %s3402_s13  ;;  %1688 = vrot.lane.b32.xlu0 %v1681_v2, %s3403_s25 }
 0xf15   : > { %1697 = vrot.lane.b32.xlu1 %v1681_v2, %s3404_s29  ;;  %1694 = vrot.lane.b32.xlu0 %v1681_v2, %s3405_s21 }
 0xf19   : > { %1703 = vrot.lane.b32.xlu1 %v1681_v2, %s3406_s14  ;;  %1700 = vrot.lane.b32.xlu0 %v1681_v2, %s3407_s26 }
 0xf7f   : > { %v1686_v4 = vpop.permute.xlu1 %1685  ;;  %v1683_v5 = vpop.permute.xlu0 %1682 }
 0xf80   : > { %v1687_v6 = vmul.f32 %v3754_v58, %v1686_v4  ;;  %v1684_v10 = vmul.f32 %v3756_v59, %v1683_v5 }
 0xf82   : > { %v1706_v11 = vpack.c.bf16 %v1687_v6, %v1684_v10 }
 0xf83   : > { %v1692_v15 = vpop.permute.xlu1 %1691  ;;  %v1689_v16 = vpop.permute.xlu0 %1688 }
 0xf84   : > { %v1693_v17 = vmul.f32 %v3760_v0, %v1692_v15  ;;  %v1690_v18 = vmul.f32 %v3762_v1, %v1689_v16  ;;  %3026 = vmatpush3.bf16.msra.mxu0 %v1706_v11 }
 0xf85   : > { %3027 = vmatprep.subr.bf16.mxu0 %v3396_v20 }
 0xf86   : > { %v1707_v19 = vpack.c.bf16 %v1693_v17, %v1690_v18 }
 0xf87   : > { %v1698_v21 = vpop.permute.xlu1 %1697  ;;  %v1695_v22 = vpop.permute.xlu0 %1694 }
 0xf88   : > { %v1696_v24 = vmul.f32 %v3767_v7, %v1695_v22  ;;  %3028 = vmatpush3.bf16.msra.mxu0 %v1707_v19  ;;  %v1699_v9 = vmul.f32 %v3770_v12, %v1698_v21 }
 0xf89   : > { %3029 = vmatprep.subr.bf16.mxu0 %v3396_v20 }
 0xf8a   : > { %v1708_v27 = vpack.c.bf16 %v1696_v24, %v1681_v2 }
 0xf8b   : > { %v1704_v28 = vpop.permute.xlu1 %1703  ;;  %v1701_v8 = vpop.permute.xlu0 %1700 }
 0xf8c   : > { %v1705_v29 = vmul.f32 %v3772_v13, %v1704_v28  ;;  %v1702_v30 = vmul.f32 %v3775_v14, %v1701_v8  ;;  %3030 = vmatpush3.bf16.msra.mxu0 %v1708_v27 }
 0xf8d   : > { %3031 = vmatprep.subr.bf16.mxu0 %v3396_v20 }
 0xf8e   : > { %v1709_v31 = vpack.c.bf16 %v1702_v30, %v1699_v9  ;;  %v1710_v32 = vpack.c.bf16 %v1705_v29, %v1705_v29 }
 0xf90   : > { %3032 = vmatpush3.bf16.msra.mxu0 %v1709_v31  ;;  %v1712_v33 = vsel %vm948_vm5, %v1710_v32, 0 }
 0xf91   : > { %3033 = vmatprep.subr.bf16.mxu0 %v3396_v20 }
 0xf94   : > { %3034 = vmatpush3.bf16.msra.mxu0 %v1712_v33 }
 0xf95   : > { %3053 = vmatprep.subr.bf16.mxu0 %v3396_v20 }
 0xf97   : > { %3036 = vmatmul.mubr.msk.bf16.vlgmr.msra.gmra.mrb[28].mxu0 %vm944_vm6, %v3998_v55 }
 0xf98   : > { %3054 = vmatpush3.bf16.msra.mxu0 %v3855_v38  ;;  %3057 = vmatprep.mubr.msk.bf16.mxu0 %vm3397_vm0, %v3396_v20 }
 0xf99   : > { %3055 = vmatprep.subr.bf16.mxu0 %v3396_v20 }
0x106a   : > { %v1748_v34 = vpop.f32.mrb[28].mxu0 }
0x106b   : > { %v1749_v35 = vadd.f32 %v1748_v34, %v4005_v57  ;;  %v3037_v36 = vpop.f32.mrb[29].mxu0 }
0x106c   : > { %v1751_v37 = vpop.f32.mrb[30].mxu0 }
0x106d   : > { %v1754_v39 = vmax.f32 %v1749_v35, 0.0  ;;  %v3038_v25 = vpop.f32.mrb[31].mxu0 }
0x106f   : > { %1758 = vrot.lane.b32.xlu1 %v1754_v39, %s4373_s3  ;;  %1755 = vrot.lane.b32.xlu0 %v1754_v39, %s3401_s12  ;;  %s4397_s3 = sld [smem:[#allocation19_spill]] }
0x1073   : > { %1764 = vrot.lane.b32.xlu1 %v1754_v39, %s3402_s13  ;;  %1761 = vrot.lane.b32.xlu0 %v1754_v39, %s3403_s25  ;;  %s4394_s25 = sld [smem:[#allocation18_spill]] }
0x1077   : > { %1770 = vrot.lane.b32.xlu1 %v1754_v39, %s3404_s29  ;;  %1767 = vrot.lane.b32.xlu0 %v1754_v39, %s3405_s21  ;;  %s4395_s29 = sld [smem:[#allocation17_spill]] }
0x1079   : > { %v2713_v2 = vld [vmem:[%s4394_s25 + $0x2] sm:$0x3]  ;;  %v2715_v3 = vld [vmem:[%s4394_s25 + $0x4] sm:$0x3]  ;;  %v2287_v24 = vld [vmem:[%s4394_s25] sm:$0x3] }
0x107a   : > { %v2752_v29 = vld [vmem:[%s4394_s25 + $0x2] sm:$0x3]  ;;  %v2754_v34 = vld [vmem:[%s4394_s25 + $0x4] sm:$0x3]  ;;  %v2756_v25 = vld [vmem:[%s4394_s25 + $0x6] sm:$0x3] }
0x107b   : > { %1776 = vrot.lane.b32.xlu1 %v1754_v39, %s3406_s14  ;;  %1773 = vrot.lane.b32.xlu0 %v1754_v39, %s3407_s26  ;;  %s2545_s14 = scalar_lea.sflag [#allocation6], %s3625_s18 }
0x107d   : > { %s4396_s21 = smov %s4395_s29  ;;  %v4106_v4 = vld [vmem:[%s4395_s29] ss:$8 sps:$4 sm:$0xff]   ;;  %s4302_s29 = scalar_lea.hbm %s4399_s24, %s2769_s19 }
0x107e   : > { %v4116_v5 = vld [vmem:[%s4396_s21 + $0x14] ss:$8 sps:$4 sm:$0xff]   ;;  %v4123_v6 = vld [vmem:[%s4396_s21 + $0x10] ss:$8 sps:$4 sm:$0xff]   ;;  %v4129_v10 = vld [vmem:[%s4396_s21 + $0x24] ss:$8 sps:$4 sm:$0xff]  }
0x107f   : > { %2290 = vrot.lane.b32.xlu0 %v3855_v38, %s3399_s20  ;;  %v4135_v11 = vld [vmem:[%s4396_s21 + $0x20] ss:$8 sps:$4 sm:$0xff]   ;;  %v4141_v15 = vld [vmem:[%s4396_s21 + $0x34] ss:$8 sps:$4 sm:$0xff]   ;;  %v4147_v16 = vld [vmem:[%s4396_s21 + $0x30] ss:$8 sps:$4 sm:$0xff]  }
0x1080   : > { %v4153_v17 = vld [vmem:[%s4396_s21 + $0x44] ss:$8 sps:$4 sm:$0xff]   ;;  %v4159_v18 = vld [vmem:[%s4396_s21 + $0x40] ss:$8 sps:$4 sm:$0xff]   ;;  %v4165_v19 = vld [vmem:[%s4396_s21 + $0x54] ss:$8 sps:$4 sm:$0xff]  }
0x1081   : > { %v3226_v22 = vld [vmem:[%s4396_s21 + $0x50] ss:$8 sps:$4 sm:$0xff]   ;;  %v3231_v27 = vld [vmem:[%s4396_s21 + $0x64] ss:$8 sps:$4 sm:$0xff]   ;;  %v3229_v28 = vld [vmem:[%s4396_s21 + $0x60] ss:$8 sps:$4 sm:$0xff]  }
0x1082   : > { %v3234_v8 = vld [vmem:[%s4396_s21 + $0x74] ss:$8 sps:$4 sm:$0xff]   ;;  %v3232_v9 = vld [vmem:[%s4396_s21 + $0x70] ss:$8 sps:$4 sm:$0xff]   ;;  %v3237_v30 = vld [vmem:[%s4396_s21 + $0x84] ss:$8 sps:$4 sm:$0xff]  }
0x1083   : > { %v3235_v31 = vld [vmem:[%s4396_s21 + $0x80] ss:$8 sps:$4 sm:$0xff]   ;;  %v3240_v32 = vld [vmem:[%s4396_s21 + $0x94] ss:$8 sps:$4 sm:$0xff]   ;;  %v3238_v33 = vld [vmem:[%s4396_s21 + $0x90] ss:$8 sps:$4 sm:$0xff]  }
0x1084   : > { %v3243_v35 = vld [vmem:[%s4396_s21 + $0xa4] ss:$8 sps:$4 sm:$0xff]   ;;  %v3241_v36 = vld [vmem:[%s4396_s21 + $0xa0] ss:$8 sps:$4 sm:$0xff]   ;;  %v3246_v37 = vld [vmem:[%s4396_s21 + $0xb4] ss:$8 sps:$4 sm:$0xff]  }
0x10e1   : > { %v1759_v26 = vpop.permute.xlu1 %1758  ;;  %v1756_v40 = vpop.permute.xlu0 %1755 }
0x10e2   : > { %v1760_v41 = vmul.f32 %v3754_v58, %v1759_v26  ;;  %v1757_v42 = vmul.f32 %v3756_v59, %v1756_v40  ;;  %v3249_v26 = vld [vmem:[%s4396_s21 + $0xc4] ss:$8 sps:$4 sm:$0xff]   ;;  %v3252_v40 = vld [vmem:[%s4396_s21 + $0xd4] ss:$8 sps:$4 sm:$0xff]  }
0x10e4   : > { %v1779_v56 = vpack.c.bf16 %v1760_v41, %v1757_v42  ;;  %v3250_v41 = vld [vmem:[%s4396_s21 + $0xd0] ss:$8 sps:$4 sm:$0xff]  }
0x10e5   : > { %v1765_v43 = vpop.permute.xlu1 %1764  ;;  %v1762_v44 = vpop.permute.xlu0 %1761 }
0x10e6   : > { %v1766_v45 = vmul.f32 %v3760_v0, %v1765_v43  ;;  %v1763_v46 = vmul.f32 %v3762_v1, %v1762_v44  ;;  %3040 = vmatpush3.bf16.msra.mxu1 %v1779_v56  ;;  %v3255_v56 = vld [vmem:[%s4396_s21 + $0xe4] ss:$8 sps:$4 sm:$0xff]  }
0x10e7   : > { %3041 = vmatprep.subr.bf16.mxu1 %v3396_v20 }
0x10e8   : > { %v1780_v47 = vpack.c.bf16 %v1766_v45, %v1763_v46  ;;  %v3253_v45 = vld [vmem:[%s4396_s21 + $0xe0] ss:$8 sps:$4 sm:$0xff]  }
0x10e9   : > { %v1771_v48 = vpop.permute.xlu1 %1770  ;;  %v1768_v49 = vpop.permute.xlu0 %1767 }
0x10ea   : > { %v1769_v50 = vmul.f32 %v3767_v7, %v1768_v49  ;;  %3042 = vmatpush3.bf16.msra.mxu1 %v1780_v47  ;;  %v1772_v52 = vmul.f32 %v3770_v12, %v1771_v48 }
0x10eb   : > { %3043 = vmatprep.subr.bf16.mxu1 %v3396_v20 }
0x10ec   : > { %v1781_v58 = vpack.c.bf16 %v1769_v50, %v1754_v39  ;;  %v3244_v39 = vld [vmem:[%s4396_s21 + $0xb0] ss:$8 sps:$4 sm:$0xff]  }
0x10ed   : > { %v1777_v59 = vpop.permute.xlu1 %1776  ;;  %v1774_v51 = vpop.permute.xlu0 %1773 }
0x10ee   : > { %v1778_v0 = vmul.f32 %v3772_v13, %v1777_v59  ;;  %v1775_v1 = vmul.f32 %v3775_v14, %v1774_v51  ;;  %3044 = vmatpush3.bf16.msra.mxu1 %v1781_v58  ;;  %v3256_v58 = vld [vmem:[%s4396_s21 + $0xf0] ss:$8 sps:$4 sm:$0xff]   ;;  %v3258_v59 = vld [vmem:[%s4396_s21 + $0xf4] ss:$8 sps:$4 sm:$0xff]  }
0x10ef   : > { %3045 = vmatprep.subr.bf16.mxu1 %v3396_v20 }
0x10f0   : > { %v1782_v53 = vpack.c.bf16 %v1775_v1, %v1772_v52  ;;  %v1783_v54 = vpack.c.bf16 %v1778_v0, %v1778_v0 }
0x10f2   : > { %3046 = vmatpush3.bf16.msra.mxu1 %v1782_v53  ;;  %v1785_v7 = vsel %vm948_vm5, %v1783_v54, 0 }
0x10f3   : > { %3047 = vmatprep.subr.bf16.mxu1 %v3396_v20 }
0x10f6   : > { %3048 = vmatpush3.bf16.msra.mxu1 %v1785_v7 }
0x10f7   : > { %3077 = vmatprep.subr.bf16.mxu1 %v3396_v20 }
0x10f9   : > { %3050 = vmatmul.mubr.msk.bf16.vlgmr.msra.gmra.mrb[24].mxu1 %vm944_vm6, %v3998_v55  ;;  %v1867_v55 = vld [vmem:[%s4394_s25] sm:$0x3] }
0x10fa   : > { %3078 = vmatpush3.bf16.msra.mxu1 %v3855_v38  ;;  %3081 = vmatprep.mubr.msk.bf16.mxu1 %vm3397_vm0, %v3396_v20 }
0x10fb   : > { %3079 = vmatprep.subr.bf16.mxu1 %v3396_v20 }
0x11cc   : > { %v1821_v12 = vpop.f32.mrb[24].mxu1 }
0x11cd   : > { %v1822_v13 = vadd.f32 %v1821_v12, %v4005_v57  ;;  %v3051_v14 = vpop.f32.mrb[25].mxu1  ;;  %v2717_v57 = vld [vmem:[%s4394_s25 + $0x6] sm:$0x3] }
0x11ce   : > { %v1824_v60 = vpop.f32.mrb[26].mxu1 }
0x11cf   : > { %v1827_v61 = vmax.f32 %v1822_v13, 0.0  ;;  %v3052_v62 = vpop.f32.mrb[27].mxu1 }
0x11d1   : > { %v2286_v63 = vpack.c.bf16 %v1827_v61, %v3960_v23  ;;  %v4079_v23 = vpop.permute.xlu0 %2290 }
0x11d3   : > { %2292 = vrot.lane.b32.xlu1 %v2286_v63, %s3399_s20  ;;  %3056 = vmatpush3.bf16.msra.mxu0 %v2286_v63 }
0x11d4   : > { %3080 = vmatpush3.bf16.msra.mxu1 %v2286_v63  ;;  %3061 = vmatprep.subr.bf16.mxu0 %v3396_v20 }
0x11d5   : > { %3085 = vmatprep.subr.bf16.mxu1 %v3396_v20 }
0x11d6   : > { %3058 = vmatmul.mubr.msk.bf16.vlgmr.msra.gmra.mrb[32].mxu0 %vm1868_vm9, %v1867_v55 }
0x11d7   : > { %3062 = vmatpush3.bf16.msra.mxu0 %v3855_v38  ;;  %3082 = vmatmul.mubr.msk.bf16.vlgmr.msra.gmra.mrb[28].mxu1 %vm1868_vm9, %v2717_v57 }
0x11d8   : > { %3086 = vmatpush3.bf16.msra.mxu1 %v4079_v23  ;;  %3063 = vmatprep.subr.bf16.mxu0 %v3396_v20 }
0x11d9   : > { %3065 = vmatprep.mubr.msk.bf16.mxu0 %vm3397_vm0, %v3396_v20  ;;  %3087 = vmatprep.subr.bf16.mxu1 %v3396_v20 }
0x11da   : > { %3089 = vmatprep.mubr.msk.bf16.mxu1 %vm3397_vm0, %v3396_v20 }
0x11db   : > { %3064 = vmatpush3.bf16.msra.mxu0 %v2286_v63 }
0x11dc   : > { %3069 = vmatprep.subr.bf16.mxu0 %v3396_v20 }
0x11de   : > { %3066 = vmatmul.mubr.msk.bf16.vlgmr.msra.gmra.mrb[36].mxu0 %vm1868_vm9, %v2713_v2  ;;  %v2067_v2 = vld [vmem:[%s4397_s3] sm:$0xf] }
0x11df   : > { %3070 = vmatpush3.bf16.msra.mxu0 %v3855_v38  ;;  %3073 = vmatprep.mubr.msk.bf16.mxu0 %vm3397_vm0, %v3396_v20  ;;  %v4111_v38 = vld [vmem:[%s4396_s21 + $0x4] ss:$8 sps:$4 sm:$0xff]  }
0x11e0   : > { %3071 = vmatprep.subr.bf16.mxu0 %v3396_v20 }
0x11e3   : > { %3072 = vmatpush3.bf16.msra.mxu0 %v2286_v63 }
0x11e4   : > { %2233 = vmatprep.subr.bf16.mxu0 %v4111_v38 }
0x11e6   : > { %3074 = vmatmul.mubr.msk.bf16.vlgmr.msra.gmra.mrb[40].mxu0 %vm1868_vm9, %v2715_v3 }
0x11e7   : > { %2234 = vmatpush1.bf16.msra.mxu0 %v4106_v4 }
0x11e8   : > { %2235 = vmatprep.subr.bf16.mxu0 %v4116_v5 }
0x11eb   : > { %2236 = vmatpush1.bf16.msra.mxu0 %v4123_v6 }
0x11ec   : > { %2237 = vmatprep.subr.bf16.mxu0 %v4129_v10 }
0x11ef   : > { %2238 = vmatpush1.bf16.msra.mxu0 %v4135_v11 }
0x11f0   : > { %2239 = vmatprep.subr.bf16.mxu0 %v4141_v15 }
0x11f3   : > { %2240 = vmatpush1.bf16.msra.mxu0 %v4147_v16 }
0x11f4   : > { %2241 = vmatprep.subr.bf16.mxu0 %v4153_v17 }
0x11f7   : > { %2242 = vmatpush1.bf16.msra.mxu0 %v4159_v18 }
0x11f8   : > { %2243 = vmatprep.subr.bf16.mxu0 %v4165_v19 }
0x11fb   : > { %2244 = vmatpush1.bf16.msra.mxu0 %v3226_v22 }
0x11fc   : > { %2245 = vmatprep.subr.bf16.mxu0 %v3231_v27 }
0x11ff   : > { %2246 = vmatpush1.bf16.msra.mxu0 %v3229_v28 }
0x1200   : > { %2247 = vmatprep.subr.bf16.mxu0 %v3234_v8 }
0x1203   : > { %2248 = vmatpush1.bf16.msra.mxu0 %v3232_v9 }
0x1204   : > { %2249 = vmatprep.subr.bf16.mxu0 %v3237_v30 }
0x1207   : > { %2250 = vmatpush1.bf16.msra.mxu0 %v3235_v31 }
0x1208   : > { %2251 = vmatprep.subr.bf16.mxu0 %v3240_v32 }
0x120b   : > { %2252 = vmatpush1.bf16.msra.mxu0 %v3238_v33 }
0x120c   : > { %2253 = vmatprep.subr.bf16.mxu0 %v3243_v35 }
0x120f   : > { %2254 = vmatpush1.bf16.msra.mxu0 %v3241_v36 }
0x1210   : > { %2255 = vmatprep.subr.bf16.mxu0 %v3246_v37 }
0x1213   : > { %2256 = vmatpush1.bf16.msra.mxu0 %v3244_v39 }
0x1214   : > { %2257 = vmatprep.subr.bf16.mxu0 %v3249_v26 }
0x1245   : > { %v2293_v21 = vpop.permute.xlu1 %2292 }
0x1246   : > { %3088 = vmatpush3.bf16.msra.mxu1 %v2293_v21 }
0x1247   : > { %3093 = vmatprep.subr.bf16.mxu1 %v3396_v20 }
0x1249   : > { %3090 = vmatmul.mubr.msk.bf16.vlgmr.msra.gmra.mrb[32].mxu1 %vm1868_vm9, %v2287_v24 }
0x124a   : > { %3094 = vmatpush3.bf16.msra.mxu1 %v4079_v23  ;;  %3097 = vmatprep.mubr.msk.bf16.mxu1 %vm3397_vm0, %v3396_v20 }
0x124b   : > { %3095 = vmatprep.subr.bf16.mxu1 %v3396_v20 }
0x124e   : > { %3096 = vmatpush3.bf16.msra.mxu1 %v2293_v21 }
0x124f   : > { %3101 = vmatprep.subr.bf16.mxu1 %v3396_v20 }
0x1251   : > { %3098 = vmatmul.mubr.msk.bf16.vlgmr.msra.gmra.mrb[36].mxu1 %vm1868_vm9, %v2752_v29 }
0x1252   : > { %3102 = vmatpush3.bf16.msra.mxu1 %v4079_v23  ;;  %3105 = vmatprep.mubr.msk.bf16.mxu1 %vm3397_vm0, %v3396_v20 }
0x1253   : > { %3103 = vmatprep.subr.bf16.mxu1 %v3396_v20 }
0x1256   : > { %3104 = vmatpush3.bf16.msra.mxu1 %v2293_v21 }
0x1257   : > { %3109 = vmatprep.subr.bf16.mxu1 %v3396_v20 }
0x1259   : > { %3106 = vmatmul.mubr.msk.bf16.vlgmr.msra.gmra.mrb[40].mxu1 %vm1868_vm9, %v2754_v34 }
0x125a   : > { %3110 = vmatpush3.bf16.msra.mxu1 %v4079_v23  ;;  %3113 = vmatprep.mubr.msk.bf16.mxu1 %vm3397_vm0, %v3396_v20 }
0x125b   : > { %3111 = vmatprep.subr.bf16.mxu1 %v3396_v20  ;;  %v3247_v20 = vld [vmem:[%s4396_s21 + $0xc0] ss:$8 sps:$4 sm:$0xff]  }
0x125c   : > { %2258 = vmatpush1.bf16.msra.mxu0 %v3247_v20 }
0x125d   : > { %2259 = vmatprep.subr.bf16.mxu0 %v3252_v40 }
0x125e   : > { %3112 = vmatpush3.bf16.msra.mxu1 %v2293_v21  ;;  %v2489_v21 = vld [vmem:[%s4397_s3] sm:$0xf] }
0x125f   : > { %2495 = vmatprep.subr.bf16.mxu1 %v4111_v38 }
0x1260   : > { %2260 = vmatpush1.bf16.msra.mxu0 %v3250_v41 }
0x1261   : > { %3114 = vmatmul.mubr.msk.bf16.vlgmr.msra.gmra.mrb[44].mxu1 %vm1868_vm9, %v2756_v25  ;;  %2261 = vmatprep.subr.bf16.mxu0 %v3255_v56 }
0x1262   : > { %2496 = vmatpush1.bf16.msra.mxu1 %v4106_v4 }
0x1263   : > { %2497 = vmatprep.subr.bf16.mxu1 %v4116_v5 }
0x1264   : > { %2262 = vmatpush1.bf16.msra.mxu0 %v3253_v45 }
0x1265   : > { %2263 = vmatprep.subr.bf16.mxu0 %v3258_v59 }
0x1266   : > { %2498 = vmatpush1.bf16.msra.mxu1 %v4123_v6 }
0x1267   : > { %2499 = vmatprep.subr.bf16.mxu1 %v4129_v10 }
0x1268   : > { %2264 = vmatpush1.bf16.msra.mxu0 %v3256_v58 }
0x126a   : > { %2500 = vmatpush1.bf16.msra.mxu1 %v4135_v11 }
0x126b   : > { %2501 = vmatprep.subr.bf16.mxu1 %v4141_v15 }
0x126e   : > { %2502 = vmatpush1.bf16.msra.mxu1 %v4147_v16 }
0x126f   : > { %2503 = vmatprep.subr.bf16.mxu1 %v4153_v17 }
0x1272   : > { %2504 = vmatpush1.bf16.msra.mxu1 %v4159_v18 }
0x1273   : > { %2505 = vmatprep.subr.bf16.mxu1 %v4165_v19 }
0x1276   : > { %2506 = vmatpush1.bf16.msra.mxu1 %v3226_v22 }
0x1277   : > { %2507 = vmatprep.subr.bf16.mxu1 %v3231_v27 }
0x127a   : > { %2508 = vmatpush1.bf16.msra.mxu1 %v3229_v28 }
0x127b   : > { %2509 = vmatprep.subr.bf16.mxu1 %v3234_v8 }
0x127e   : > { %2510 = vmatpush1.bf16.msra.mxu1 %v3232_v9 }
0x127f   : > { %2511 = vmatprep.subr.bf16.mxu1 %v3237_v30 }
0x1282   : > { %2512 = vmatpush1.bf16.msra.mxu1 %v3235_v31 }
0x1283   : > { %2513 = vmatprep.subr.bf16.mxu1 %v3240_v32 }
0x1286   : > { %2514 = vmatpush1.bf16.msra.mxu1 %v3238_v33 }
0x1287   : > { %2515 = vmatprep.subr.bf16.mxu1 %v3243_v35 }
0x128a   : > { %2516 = vmatpush1.bf16.msra.mxu1 %v3241_v36  ;;  %v2274_v36 = vld [vmem:[%s3631_s23] sm:$0xff] }
0x128b   : > { %2517 = vmatprep.subr.bf16.mxu1 %v3246_v37 }
0x128e   : > { %2518 = vmatpush1.bf16.msra.mxu1 %v3244_v39 }
0x128f   : > { %2519 = vmatprep.subr.bf16.mxu1 %v3249_v26 }
0x1292   : > { %2520 = vmatpush1.bf16.msra.mxu1 %v3247_v20 }
0x1293   : > { %2521 = vmatprep.subr.bf16.mxu1 %v3252_v40 }
0x1296   : > { %2522 = vmatpush1.bf16.msra.mxu1 %v3250_v41 }
0x1297   : > { %2523 = vmatprep.subr.bf16.mxu1 %v3255_v56 }
0x129a   : > { %2524 = vmatpush1.bf16.msra.mxu1 %v3253_v45 }
0x129b   : > { %2525 = vmatprep.subr.bf16.mxu1 %v3258_v59 }
0x129e   : > { %2526 = vmatpush1.bf16.msra.mxu1 %v3256_v58 }
0x12a9   : > { %v1906_v42 = vpop.f32.mrb[32].mxu0 }
0x12aa   : > { %1913 = vst.msk [vmem:[#allocation3] sm:$0xf] %vm1912_vm10, %v1906_v42  ;;  %v3059_v43 = vpop.f32.mrb[33].mxu0  ;;  %v2050_v44 = vpop.f32.mrb[28].mxu1 }
0x12ab   : > { %v1909_v46 = vpop.f32.mrb[34].mxu0  ;;  %2057 = vrot.lane.b32.xlu1 %v2050_v44, %s3399_s20  ;;  %v3083_v47 = vpop.f32.mrb[29].mxu1  ;;  %v2758_v43 = vld [vmem:[%s3631_s23 + $0x8] sm:$0xff]  ;;  %s3322_s23 = sshll.u32 %s3408_s17, 4  ;;  %s3323_s23 = int_to_ptr.vmem [resolvable:$false] %s3322_s23 }
0x12ac   : > { %v3060_v48 = vpop.f32.mrb[35].mxu0  ;;  %v2053_v49 = vpop.f32.mrb[30].mxu1  ;;  %s3324_s0 = scalar_lea.vmem %s3323_s23, 512 }
0x12ad   : > { %v3084_v50 = vpop.f32.mrb[31].mxu1 }
0x12b1   : > { %v1953_v51 = vpop.f32.mrb[36].mxu0 }
0x12b2   : > { %1960 = vrot.lane.b32.xlu0 %v1953_v51, %s3399_s20  ;;  %v3067_v52 = vpop.f32.mrb[37].mxu0 }
0x12b3   : > { %v1956_v0 = vpop.f32.mrb[38].mxu0 }
0x12b4   : > { %v3068_v1 = vpop.f32.mrb[39].mxu0 }
0x12b9   : > { %v2004_v53 = vpop.f32.mrb[40].mxu0 }
0x12ba   : > { %2010 = vst.msk [vmem:[#allocation3 + $0x4] sm:$0xf] %vm1912_vm10, %v2004_v53  ;;  %v3075_v54 = vpop.f32.mrb[41].mxu0 }
0x12bb   : > { %v2007_v7 = vpop.f32.mrb[42].mxu0 }
0x12bc   : > { %v3076_v12 = vpop.f32.mrb[43].mxu0 }
0x131c   : > { %v2333_v13 = vpop.f32.mrb[32].mxu1 }
0x131d   : > { %v3091_v14 = vpop.f32.mrb[33].mxu1  ;;  %v2058_v60 = vpop.permute.xlu1 %2057 }
0x131e   : > { %v2336_v61 = vpop.f32.mrb[34].mxu1  ;;  %2060 = vst.msk [vmem:[#allocation3 + $0x4] sm:$0xf] %vm1963_vm11, %v2058_v60 }
0x131f   : > { %v3092_v62 = vpop.f32.mrb[35].mxu1 }
0x1324   : > { %v2378_v63 = vpop.f32.mrb[36].mxu1  ;;  %v1961_v55 = vpop.permute.xlu0 %1960 }
0x1325   : > { %1964 = vst.msk [vmem:[#allocation3] sm:$0xf] %vm1963_vm11, %v1961_v55  ;;  %2385 = vrot.lane.b32.xlu0 %v2378_v63, %s3399_s20  ;;  %v3099_v57 = vpop.f32.mrb[37].mxu1 }
0x1326   : > { %v2381_v23 = vpop.f32.mrb[38].mxu1 }
0x1327   : > { %v3100_v3 = vpop.f32.mrb[39].mxu1 }
0x1329   : > { %2070 = vperm.xlu0 %3191, %v2067_v2  }
0x132c   : > { %v2061_v4 = vld [vmem:[#allocation3] sm:$0xff]  ;;  %v2427_v38 = vpop.f32.mrb[40].mxu1 }
0x132d   : > { %2339 = vst.msk [vmem:[#allocation3] sm:$0xf] %vm1912_vm10, %v2333_v13  ;;  %2433 = vst.msk [vmem:[#allocation3 + $0x4] sm:$0xf] %vm1912_vm10, %v2427_v38  ;;  %v3107_v5 = vpop.f32.mrb[41].mxu1  ;;  %v2063_v6 = vcombine.high %v2061_v4, %v2061_v4  ;;  %v2065_v11 = vpack.c.bf16 %v2061_v4, %v2061_v4 }
0x132e   : > { %v2430_v10 = vpop.f32.mrb[42].mxu1 }
0x132f   : > { %v2066_v15 = vpack.c.bf16 %v2063_v6, %v2063_v6  ;;  %v3108_v16 = vpop.f32.mrb[43].mxu1 }
0x1331   : > { %2265 = vmatprep.mubr.bf16.mxu0 %v2066_v15 }
0x1332   : > { %2266 = vmatmul.mubr.bf16.vlgmr.msra.gmra.mrb[44].mxu0 %v2065_v11 }
0x1334   : > { %v2472_v17 = vpop.f32.mrb[44].mxu1 }
0x1335   : > { %2479 = vrot.lane.b32.xlu1 %v2472_v17, %s3399_s20  ;;  %v3115_v18 = vpop.f32.mrb[45].mxu1  ;;  %s4398_s20 = sshll.u32 %s3625_s18, 4 }
0x1336   : > { %v2475_v19 = vpop.f32.mrb[46].mxu1  ;;  %s501_s26 = scalar_lea.vmem [#allocation9], %s4398_s20 }
0x1337   : > { %v3116_v22 = vpop.f32.mrb[47].mxu1  ;;  %s2559_s27 = sshll.u32 %s501_s26, 4  ;;  %s4297_s27 = int_to_ptr.vmem [resolvable:$true] %s2559_s27 }
0x1338   : > { %s3318_s20 = scalar_lea.vmem %s4297_s27, 256  ;;  %p3325_p13 = scmp.lt.s32.totalorder %s4297_s27, %s3323_s23 }
0x1339   : > { %2492 = vperm.xlu1 %3192, %v2489_v21   ;;  %p3319_p11 = scmp.ne.s32.totalorder %s4297_s27, %s3318_s20  ;;  %p3326_p3 = scmp.lt.s32.totalorder %s3324_s0, %s3318_s20 }
0x133b   : > { %p3320_p0 = pnand %p3319_p11, %p4400_p9  ;;  %p3327_p7 = por %p3326_p3, %p3325_p13 }
0x133d   : > { %p3321_p10 = pneg %p3320_p0 }
0x133f   : > { %p3328_p12 = pnand %p3327_p7, %p3321_p10 }
0x1397   : > { %v2386_v24 = vpop.permute.xlu0 %2385 }
0x1398   : > { %2388 = vst.msk [vmem:[#allocation3] sm:$0xf] %vm1963_vm11, %v2386_v24 }
0x13a7   : > { %v2480_v27 = vpop.permute.xlu1 %2479 }
0x13a8   : > { %2482 = vst.msk [vmem:[#allocation3 + $0x4] sm:$0xf] %vm1963_vm11, %v2480_v27  ;;  %v2071_v30 = vpop.permute.xlu0 %2070 }
0x13af   : > { %v2483_v28 = vld [vmem:[#allocation3] sm:$0xff] }
0x13b0   : > { %v2485_v8 = vcombine.high %v2483_v28, %v2483_v28  ;;  %v2487_v29 = vpack.c.bf16 %v2483_v28, %v2483_v28 }
0x13b2   : > { %v2488_v9 = vpack.c.bf16 %v2485_v8, %v2485_v8 }
0x13b4   : > { %2527 = vmatprep.mubr.bf16.mxu1 %v2488_v9 }
0x13b5   : > { %2528 = vmatmul.mubr.bf16.vlgmr.msra.gmra.mrb[48].mxu1 %v2487_v29 }
0x13b8   : > { %v2493_v20 = vpop.permute.xlu1 %2492 }
0x1405   : > { %v2267_v31 = vpop.f32.mrb[44].mxu0 }
0x1406   : > { %v2268_v32 = vadd.f32 %v2267_v31, %v2071_v30  ;;  %v2269_v33 = vpop.f32.mrb[45].mxu0 }
0x1407   : > { %v2270_v34 = vadd.f32 %v2269_v33, %v2071_v30  ;;  %v2271_v35 = vpop.f32.mrb[46].mxu0 }
0x1408   : > { %v2272_v37 = vpop.f32.mrb[47].mxu0 }
0x1409   : > { %v2277_v39 = vcombine.low %v2268_v32, %v2270_v34 }
0x140b   : > { %v2279_v25 = vadd.f32 %v2277_v39, %v2274_v36 }
0x140d   : > { %2280 = vst [vmem:[%s501_s26] sm:$0xff] %v2279_v25 }
0x1488   : > { %v2529_v26 = vpop.f32.mrb[48].mxu1 }
0x1489   : > { %v2530_v40 = vadd.f32 %v2529_v26, %v2493_v20  ;;  %v2531_v41 = vpop.f32.mrb[49].mxu1 }
0x148a   : > { %v2532_v42 = vadd.f32 %v2531_v41, %v2493_v20  ;;  %v2533_v56 = vpop.f32.mrb[50].mxu1 }
0x148b   : > { %v2534_v44 = vpop.f32.mrb[51].mxu1 }
0x148c   : > { %v2539_v45 = vcombine.low %v2530_v40, %v2532_v42 }
0x148e   : > { %v2541_v46 = vadd.f32 %v2758_v43, %v2539_v45 }
0x1490   : > { %2759 = vst [vmem:[%s501_s26 + $0x8] sm:$0xff] %v2541_v46 }
0x1491   : > { %3331 = shalt.err (!%p3328_p12)
}
0x1492   : > { %s3332_s26 = scalar_lea.hbm %s4302_s29, 256  ;;  %s3336_s13 = scalar_lea.hbm %s4399_s24, 512 }
0x1493   : > { %p3333_p2 = scmp.ne.s32.totalorder %s4302_s29, %s3332_s26  ;;  %p3337_p4 = scmp.lt.u32.totalorder %s4302_s29, %s4399_s24 }
0x1494   : > { %p3338_p5 = scmp.lt.u32.totalorder %s3336_s13, %s3332_s26  ;;  %p3340_p11 = scmp.lt.u32.totalorder %s3332_s26, %s4302_s29 }
0x1495   : > { %p3334_p1 = pnand %p3333_p2, %p4400_p9 }
0x1496   : > { %p3339_p8 = por %p3338_p5, %p3337_p4 }
0x1497   : > { %p3335_p6 = pneg %p3334_p1 }
0x1498   : > { %p3341_p0 = por %p3340_p11, %p3339_p8 }
0x149a   : > { %p3342_p10 = pnand %p3341_p0, %p3335_p6 }
0x149c   : > { %3345 = shalt.err (!%p3342_p10)
}
0x149d   : > { %s3409_s0 = smov 128   ;;  %s4401_s20 = smov 8  }
0x149e   : > { %3123 = dma.vmem_to_hbm [thread:$0]  (%p4400_p9), %s4297_s27, 256, %s4302_s29, %s2545_s14, %s3409_s0, %s3409_s0, %s4401_s20  }
0x149f PF: > { %s4402_s19 = sld [smem:[#allocation13_spill]]  ;;  %s4403_s12 = sld [smem:[#allocation14_spill]] }
0x14a0   : > { %p4405_p3 = scmp.ge.s32.totalorder %s3388_s16, 2 }
0x14a5   : > { %s2574_s17 = sand.u32 1, %s4402_s19   ;;  %p4404_p13 = scmp.ne.s32.totalorder %s4403_s12, 0 }
0x14a6   : > { %s2575_s26 = scalar_lea.sflag [#allocation6], %s2574_s17 }
0x14a7   : > { %p3134_p7 = pnand %p4405_p3, %p4404_p13 }
0x14a9   : > { %3371 = dma.done.wait (!%p3134_p7), %s2575_s26, 256  }
0x14aa   : > { %3373 = vsyncadd (!%p3134_p7), %s2575_s26, 4294967040  ;;  %s4406_s16 = sld [smem:[#allocation15_spill]]  ;;  %s4407_s29 = smov %s3380_s30 }
0x14ab   : > { %s4408_s30 = smov %s3384_s15  ;;  %s4409_s15 = smov %s3573_s22 }
0x14b0   : > { %p28_p12 = scmp.ge.s32.totalorder %s4406_s16, 4  }
0x14b2   :  { %30 = sbr.rel (!%p28_p12) target bundleno = 12 (0xc), region = 141 }
0x14b9   :  { %2580 = vsyncpa [#allocation5], 1 }
0x14ba   :  { %2582 = vsyncpa [#allocation5 + $0x1], 1 }
0x14bb   :  { %2583 = vsyncpa [#allocation8], 1 }
0x14bc   :  { %2584 = vsyncpa [#allocation6], 1 }
0x14bd   :  { %2586 = vsyncpa [#allocation6 + $0x1], 1 }

</bundles_post_ra>
